<compile_context>
chip_gen: v7x
topology: tpu7x:2x2x1
jax: 0.10.0
libtpu: 0.0.40
codegen_flags: <defaults>
</compile_context>

<pallas_src>
import functools

import jax
import jax.numpy as jnp
from jax import lax
from jax.experimental import pallas as pl
from jax.experimental.pallas import tpu as pltpu


LANES = 128


def _round_up(x, m):
    return ((x + m - 1) // m) * m


# ----------------------------------------------------------------------------
# Pallas kernels
# ----------------------------------------------------------------------------
def _conv_act_kernel(p_ref, w_ref, o_ref, *, negslope):
    """Layer 1 tile: (TILE_M, K) @ (K, Cpad) -> LeakyReLU -> store (bf16)."""
    acc = jnp.dot(p_ref[...], w_ref[...], preferred_element_type=jnp.float32)
    y = jnp.where(acc >= 0, acc, negslope * acc)
    o_ref[...] = y.astype(o_ref.dtype)


def _conv_bn_act_kernel(p_ref, w_ref, g_ref, b_ref, o_ref, *,
                        negslope, eps, m_valid):
    """Layers 2-3: conv matmul + training-mode BatchNorm (batch stats over the
    full M block, biased variance, var clamped >= 0) + LeakyReLU, fused."""
    acc = jnp.dot(p_ref[...], w_ref[...], preferred_element_type=jnp.float32)
    inv_m = 1.0 / m_valid
    mean = jnp.sum(acc, axis=0, keepdims=True) * inv_m
    ex2 = jnp.sum(acc * acc, axis=0, keepdims=True) * inv_m
    var = jnp.maximum(ex2 - mean * mean, 0.0)
    scale = g_ref[...] * lax.rsqrt(var + eps)
    bias = b_ref[...] - mean * scale
    y = acc * scale + bias
    y = jnp.where(y >= 0, y, negslope * y)
    o_ref[...] = y.astype(o_ref.dtype)


def _conv_bn_act_final_kernel(p_ref, w_ref, g_ref, b_ref, w5_ref, sel_ref,
                              o_ref, *, negslope, eps, m_valid):
    """Layer 4 (conv + BN + LeakyReLU) with layer 5 (4x4 valid conv -> one
    scalar per sample) fused on the resident activated block.

    out5[n] = sum_{r,c} y[n*HW + r, c] * w5_rep[n*HW + r, c]
            = row n of (sel @ (y * w5_rep)) summed over lanes.
    """
    acc = jnp.dot(p_ref[...], w_ref[...], preferred_element_type=jnp.float32)
    inv_m = 1.0 / m_valid
    mean = jnp.sum(acc, axis=0, keepdims=True) * inv_m
    ex2 = jnp.sum(acc * acc, axis=0, keepdims=True) * inv_m
    var = jnp.maximum(ex2 - mean * mean, 0.0)
    scale = g_ref[...] * lax.rsqrt(var + eps)
    bias = b_ref[...] - mean * scale
    y = acc * scale + bias
    y = jnp.where(y >= 0, y, negslope * y)

    t = jnp.dot(sel_ref[...], y * w5_ref[...],
                preferred_element_type=jnp.float32)        # (N, Cpad)
    out = jnp.sum(t, axis=1, keepdims=True)                # (N, 1)
    o_ref[...] = jnp.broadcast_to(out, o_ref.shape)


# ----------------------------------------------------------------------------
# Plain-JAX glue: im2col + weight packing
# ----------------------------------------------------------------------------
# TODO(synk): for large batches, avoid materializing the 16x-expanded im2col
# matrix in HBM (restructure as kh*kw shifted (M,Cin)@(Cin,Cout) matmuls
# accumulating in VMEM, or generate patches per-M-tile in-kernel via DMA).
def _im2col(x_nhwc, k, stride, pad):
    """x (N,H,W,C) -> patches (N*Ho*Wo, k*k*C) ordered (kh, kw, c)."""
    n, h, w, c = x_nhwc.shape
    if pad > 0:
        x_nhwc = jnp.pad(x_nhwc, ((0, 0), (pad, pad), (pad, pad), (0, 0)))
    hp, wp = h + 2 * pad, w + 2 * pad
    ho = (hp - k) // stride + 1
    wo = (wp - k) // stride + 1
    cols = []
    for kh in range(k):
        for kw in range(k):
            cols.append(x_nhwc[:, kh:kh + stride * (ho - 1) + 1:stride,
                               kw:kw + stride * (wo - 1) + 1:stride, :])
    patches = jnp.stack(cols, axis=3)                 # (N, Ho, Wo, k*k, C)
    patches = patches.reshape(n * ho * wo, k * k * c)
    return patches, ho, wo


def _weight_matrix(w_pt, cpad):
    """PyTorch (Cout,Cin,kh,kw) -> (kh*kw*Cin, Cpad) bf16, lane-padded."""
    cout, cin, kh, kw = w_pt.shape
    w_mat = jnp.transpose(w_pt, (2, 3, 1, 0)).reshape(kh * kw * cin, cout)
    return jnp.pad(w_mat, ((0, 0), (0, cpad - cout))).astype(jnp.bfloat16)


def _pad_lane_row(v, cpad, fill=0.0):
    c = v.shape[0]
    return jnp.pad(v, (0, cpad - c),
                   constant_values=fill).astype(jnp.float32)[None, :]


# ----------------------------------------------------------------------------
# Layer wrappers (pallas_call)
# ----------------------------------------------------------------------------
def _conv_act_layer(x_nhwc, w_pt, *, k=4, stride=2, pad=1,
                    negslope=0.2, tile_m=512):
    """Layer 1: conv(bias=False) + LeakyReLU, tiled over M (parallel grid)."""
    cout = w_pt.shape[0]
    patches, ho, wo = _im2col(x_nhwc, k, stride, pad)
    m, kk = patches.shape
    cpad = _round_up(cout, LANES)

    tm = min(tile_m, m)
    m_pad = _round_up(m, tm)
    if m_pad != m:
        patches = jnp.pad(patches, ((0, m_pad - m), (0, 0)))
    patches = patches.astype(jnp.bfloat16)
    w_mat = _weight_matrix(w_pt, cpad)

    y = pl.pallas_call(
        functools.partial(_conv_act_kernel, negslope=negslope),
        out_shape=jax.ShapeDtypeStruct((m_pad, cpad), jnp.bfloat16),
        grid=(m_pad // tm,),
        in_specs=[pl.BlockSpec((tm, kk), lambda i: (i, 0)),
                  pl.BlockSpec((kk, cpad), lambda i: (0, 0))],
        out_specs=pl.BlockSpec((tm, cpad), lambda i: (i, 0)),
        compiler_params=pltpu.CompilerParams(
            dimension_semantics=("parallel",)),
    )(patches, w_mat)
    return y[:m, :cout], ho, wo


def _conv_bn_act_layer(x_nhwc, w_pt, gamma, beta, *, k=4, stride=2, pad=1,
                       negslope=0.2, eps=1e-5):
    """Layers 2-3: conv + BatchNorm(train) + LeakyReLU, fully fused.
    Single M block (stats need full M); M here is small (<= 512)."""
    cout = w_pt.shape[0]
    patches, ho, wo = _im2col(x_nhwc, k, stride, pad)
    m, kk = patches.shape
    cpad = _round_up(cout, LANES)
    w_mat = _weight_matrix(w_pt, cpad)
    g = _pad_lane_row(gamma, cpad, fill=1.0)
    b = _pad_lane_row(beta, cpad, fill=0.0)

    y = pl.pallas_call(
        functools.partial(_conv_bn_act_kernel, negslope=negslope, eps=eps,
                          m_valid=float(m)),
        out_shape=jax.ShapeDtypeStruct((m, cpad), jnp.bfloat16),
        grid=(1,),
        in_specs=[pl.BlockSpec((m, kk), lambda i: (0, 0)),
                  pl.BlockSpec((kk, cpad), lambda i: (0, 0)),
                  pl.BlockSpec((1, cpad), lambda i: (0, 0)),
                  pl.BlockSpec((1, cpad), lambda i: (0, 0))],
        out_specs=pl.BlockSpec((m, cpad), lambda i: (0, 0)),
        compiler_params=pltpu.CompilerParams(
            dimension_semantics=("arbitrary",)),
    )(patches.astype(jnp.bfloat16), w_mat, g, b)
    return y[:, :cout], ho, wo


def _conv_bn_act_final_layer(x_nhwc, w4_pt, gamma, beta, w5_pt, *,
                             negslope=0.2, eps=1e-5):
    """Layer 4 (conv + BN + LeakyReLU) with layer 5 fused; returns (N,)."""
    n = x_nhwc.shape[0]
    cout = w4_pt.shape[0]
    patches, ho, wo = _im2col(x_nhwc, 4, 2, 1)
    assert ho == 4 and wo == 4, "input spatial size must be 64"
    m, kk = patches.shape                                # m = n * 16
    hw = ho * wo
    cpad = _round_up(cout, LANES)

    w_mat = _weight_matrix(w4_pt, cpad)
    g = _pad_lane_row(gamma, cpad, fill=1.0)
    b = _pad_lane_row(beta, cpad, fill=0.0)

    # layer-5 weight laid out per spatial position of the layer-4 output:
    #   w5_tile[h*wo + w, c] = w5[0, c, h, w]; tiled over the batch.
    w5_tile = jnp.transpose(w5_pt[0], (1, 2, 0)).reshape(hw, cout)
    w5_tile = jnp.pad(w5_tile, ((0, 0), (0, cpad - cout))).astype(jnp.float32)
    w5_rep = jnp.tile(w5_tile, (n, 1))                   # (m, cpad)
    # per-sample row-selection matrix (n, m): sel[s, s*hw + r] = 1
    sel = (jnp.arange(m)[None, :] // hw
           == jnp.arange(n)[:, None]).astype(jnp.float32)

    out5 = pl.pallas_call(
        functools.partial(_conv_bn_act_final_kernel, negslope=negslope,
                          eps=eps, m_valid=float(m)),
        out_shape=jax.ShapeDtypeStruct((n, LANES), jnp.float32),
        grid=(1,),
        in_specs=[pl.BlockSpec((m, kk), lambda i: (0, 0)),
                  pl.BlockSpec((kk, cpad), lambda i: (0, 0)),
                  pl.BlockSpec((1, cpad), lambda i: (0, 0)),
                  pl.BlockSpec((1, cpad), lambda i: (0, 0)),
                  pl.BlockSpec((m, cpad), lambda i: (0, 0)),
                  pl.BlockSpec((n, m), lambda i: (0, 0))],
        out_specs=pl.BlockSpec((n, LANES), lambda i: (0, 0)),
        compiler_params=pltpu.CompilerParams(
            dimension_semantics=("arbitrary",)),
    )(patches.astype(jnp.bfloat16), w_mat, g, b, w5_rep, sel)
    return out5[:, 0]


# ----------------------------------------------------------------------------
# Full forward pass
# ----------------------------------------------------------------------------
def discriminator_forward(x_nchw, params):
    assert x_nchw.ndim == 4
    n = x_nchw.shape[0]
    x = jnp.transpose(x_nchw, (0, 2, 3, 1)).astype(jnp.float32)   # -> NHWC

    # layer 1: conv(4, s=2, p=1) + LeakyReLU(0.2)   (tiled over M, no BN)
    y, ho, wo = _conv_act_layer(x, params["w1"])
    x = y.reshape(n, ho, wo, -1)

    # layers 2-3: conv + BatchNorm2d(train) + LeakyReLU, fused in one kernel
    for i in (2, 3):
        y, ho, wo = _conv_bn_act_layer(x, params[f"w{i}"],
                                       params[f"g{i}"], params[f"b{i}"])
        x = y.reshape(n, ho, wo, -1)

    # layer 4 (conv + BN + LeakyReLU) with layer 5 (k=4, s=1, p=0) fused
    out = _conv_bn_act_final_layer(x, params["w4"], params["g4"],
                                   params["b4"], params["w5"])
    return out.reshape(-1)


def init_params(key, num_features=8, num_channel=3):
    f = num_features
    shapes = {
        "w1": (f, num_channel, 4, 4),
        "w2": (2 * f, f, 4, 4),
        "w3": (4 * f, 2 * f, 4, 4),
        "w4": (8 * f, 4 * f, 4, 4),
        "w5": (1, 8 * f, 4, 4),
    }
    params = {}
    for name, shp in shapes.items():
        key, sub = jax.random.split(key)
        params[name] = 0.05 * jax.random.normal(sub, shp, dtype=jnp.float32)
    # BatchNorm affine params (PyTorch default init: gamma=1, beta=0)
    for i, c in zip((2, 3, 4), (2 * f, 4 * f, 8 * f)):
        params[f"g{i}"] = jnp.ones((c,), jnp.float32)
        params[f"b{i}"] = jnp.zeros((c,), jnp.float32)
    return params


if __name__ == "__main__":
    key = jax.random.PRNGKey(0)
    key, kx = jax.random.split(key)
    # Spatial size must be 64 so the final 4x4/stride-1/pad-0 conv yields 1x1.
    x = jax.random.normal(kx, (2, 3, 64, 64), dtype=jnp.float32)
    params = init_params(key, num_features=8, num_channel=3)

    fwd = jax.jit(discriminator_forward)
    out = jax.block_until_ready(fwd(x, params))
    assert out.shape == (2,), out.shape
    print("KERNEL_OK")
</pallas_src>

<mosaic_0001>
module attributes {stable_mosaic.version = 11 : i64} {
  func.func @_conv_act_kernel(%arg0: i32, %arg1: memref<512x48xbf16, #tpu.memory_space<vmem>>, %arg2: memref<48x128xbf16, #tpu.memory_space<vmem>>, %arg3: memref<512x128xbf16, #tpu.memory_space<vmem>>) attributes {dimension_semantics = [#tpu.dimension_semantics<parallel>], iteration_bounds = array<i64: 4>, scalar_prefetch = 0 : i64, scratch_operands = 0 : i64, tpu.core_type = #tpu.core_type<tc>, window_params = [{transform_indices = @transform_0, window_bounds = array<i64: 512, 48>}, {pipeline_mode = #tpu.pipeline_mode<synchronous>, transform_indices = @transform_1, window_bounds = array<i64: 48, 128>}, {transform_indices = @transform_2, window_bounds = array<i64: 512, 128>}]} {
    %c0 = arith.constant 0 : index
    %c0_0 = arith.constant 0 : index
    %0 = vector.load %arg1[%c0, %c0_0] : memref<512x48xbf16, #tpu.memory_space<vmem>>, vector<512x48xbf16>
    %c0_1 = arith.constant 0 : index
    %c0_2 = arith.constant 0 : index
    %1 = vector.load %arg2[%c0_1, %c0_2] : memref<48x128xbf16, #tpu.memory_space<vmem>>, vector<48x128xbf16>
    %cst = arith.constant dense<0.000000e+00> : vector<512x128xf32>
    %2 = tpu.matmul %0, %1, %cst {dimension_numbers = #tpu.dot_dimension_numbers<[1], [0], [0], [1], [0, 0, 1, 1], [], []>} : vector<512x48xbf16>, vector<48x128xbf16>, vector<512x128xf32> -> vector<512x128xf32>
    %cst_3 = arith.constant 0.000000e+00 : f32
    %3 = vector.broadcast %cst_3 : f32 to vector<512x128xf32>
    %4 = arith.cmpf oge, %2, %3 : vector<512x128xf32>
    %cst_4 = arith.constant 2.000000e-01 : f32
    %5 = vector.broadcast %cst_4 : f32 to vector<512x128xf32>
    %6 = arith.mulf %5, %2 : vector<512x128xf32>
    %7 = arith.select %4, %2, %6 : vector<512x128xi1>, vector<512x128xf32>
    %8 = arith.truncf %7 : vector<512x128xf32> to vector<512x128xbf16>
    %c0_5 = arith.constant 0 : index
    %c0_6 = arith.constant 0 : index
    %9 = vector.load %arg3[%c0_5, %c0_6] : memref<512x128xbf16, #tpu.memory_space<vmem>>, vector<512x128xbf16>
    tpu.vector_store %arg3[%c0_5, %c0_6], %8 {strides = array<i32>} : memref<512x128xbf16, #tpu.memory_space<vmem>>, vector<512x128xbf16>,
    return
  }
  func.func @transform_0(%arg0: i32) -> (i32, i32) {
    %c0_i32 = arith.constant 0 : i32
    %c0_i32_0 = arith.constant 0 : i32
    return %arg0, %c0_i32 : i32, i32
  }
  func.func @transform_1(%arg0: i32) -> (i32, i32) {
    %c0_i32 = arith.constant 0 : i32
    %c0_i32_0 = arith.constant 0 : i32
    %c0_i32_1 = arith.constant 0 : i32
    return %c0_i32, %c0_i32_0 : i32, i32
  }
  func.func @transform_2(%arg0: i32) -> (i32, i32) {
    %c0_i32 = arith.constant 0 : i32
    %c0_i32_0 = arith.constant 0 : i32
    return %arg0, %c0_i32 : i32, i32
  }
}

module attributes {stable_mosaic.version = 11 : i64} {
  func.func @_conv_bn_act_kernel(%arg0: i32, %arg1: memref<512x128xbf16, #tpu.memory_space<vmem>>, %arg2: memref<128x128xbf16, #tpu.memory_space<vmem>>, %arg3: memref<1x128xf32, #tpu.memory_space<vmem>>, %arg4: memref<1x128xf32, #tpu.memory_space<vmem>>, %arg5: memref<512x128xbf16, #tpu.memory_space<vmem>>) attributes {dimension_semantics = [#tpu.dimension_semantics<arbitrary>], iteration_bounds = array<i64: 1>, scalar_prefetch = 0 : i64, scratch_operands = 0 : i64, tpu.core_type = #tpu.core_type<tc>, window_params = [{pipeline_mode = #tpu.pipeline_mode<synchronous>, transform_indices = @transform_0, window_bounds = array<i64: 512, 128>}, {pipeline_mode = #tpu.pipeline_mode<synchronous>, transform_indices = @transform_1, window_bounds = array<i64: 128, 128>}, {pipeline_mode = #tpu.pipeline_mode<synchronous>, transform_indices = @transform_2, window_bounds = array<i64: 1, 128>}, {pipeline_mode = #tpu.pipeline_mode<synchronous>, transform_indices = @transform_3, window_bounds = array<i64: 1, 128>}, {pipeline_mode = #tpu.pipeline_mode<synchronous>, transform_indices = @transform_4, window_bounds = array<i64: 512, 128>}]} {
    %c0 = arith.constant 0 : index
    %c0_0 = arith.constant 0 : index
    %0 = vector.load %arg1[%c0, %c0_0] : memref<512x128xbf16, #tpu.memory_space<vmem>>, vector<512x128xbf16>
    %c0_1 = arith.constant 0 : index
    %c0_2 = arith.constant 0 : index
    %1 = vector.load %arg2[%c0_1, %c0_2] : memref<128x128xbf16, #tpu.memory_space<vmem>>, vector<128x128xbf16>
    %cst = arith.constant dense<0.000000e+00> : vector<512x128xf32>
    %2 = tpu.matmul %0, %1, %cst {dimension_numbers = #tpu.dot_dimension_numbers<[1], [0], [0], [1], [0, 0, 1, 1], [], []>} : vector<512x128xbf16>, vector<128x128xbf16>, vector<512x128xf32> -> vector<512x128xf32>
    %cst_3 = arith.constant dense<0.000000e+00> : vector<128xf32>
    %3 = vector.multi_reduction <add>, %2, %cst_3 [0] : vector<512x128xf32> to vector<128xf32>
    %4 = vector.shape_cast %3 : vector<128xf32> to vector<1x128xf32>
    %cst_4 = arith.constant 0.001953125 : f32
    %5 = vector.broadcast %cst_4 : f32 to vector<1x128xf32>
    %6 = arith.mulf %4, %5 : vector<1x128xf32>
    %7 = arith.mulf %2, %2 : vector<512x128xf32>
    %cst_5 = arith.constant dense<0.000000e+00> : vector<128xf32>
    %8 = vector.multi_reduction <add>, %7, %cst_5 [0] : vector<512x128xf32> to vector<128xf32>
    %9 = vector.shape_cast %8 : vector<128xf32> to vector<1x128xf32>
    %cst_6 = arith.constant 0.001953125 : f32
    %10 = vector.broadcast %cst_6 : f32 to vector<1x128xf32>
    %11 = arith.mulf %9, %10 : vector<1x128xf32>
    %12 = arith.mulf %6, %6 : vector<1x128xf32>
    %13 = arith.subf %11, %12 : vector<1x128xf32>
    %cst_7 = arith.constant 0.000000e+00 : f32
    %14 = vector.broadcast %cst_7 : f32 to vector<1x128xf32>
    %15 = arith.maximumf %13, %14 : vector<1x128xf32>
    %c0_8 = arith.constant 0 : index
    %c0_9 = arith.constant 0 : index
    %16 = vector.load %arg3[%c0_8, %c0_9] : memref<1x128xf32, #tpu.memory_space<vmem>>, vector<1x128xf32>
    %cst_10 = arith.constant 9.99999974E-6 : f32
    %17 = vector.broadcast %cst_10 : f32 to vector<1x128xf32>
    %18 = arith.addf %15, %17 : vector<1x128xf32>
    %19 = math.rsqrt %18 : vector<1x128xf32>
    %20 = arith.mulf %16, %19 : vector<1x128xf32>
    %c0_11 = arith.constant 0 : index
    %c0_12 = arith.constant 0 : index
    %21 = vector.load %arg4[%c0_11, %c0_12] : memref<1x128xf32, #tpu.memory_space<vmem>>, vector<1x128xf32>
    %22 = arith.mulf %6, %20 : vector<1x128xf32>
    %23 = arith.subf %21, %22 : vector<1x128xf32>
    %24 = vector.broadcast %20 : vector<1x128xf32> to vector<512x128xf32>
    %25 = arith.mulf %2, %24 : vector<512x128xf32>
    %26 = vector.broadcast %23 : vector<1x128xf32> to vector<512x128xf32>
    %27 = arith.addf %25, %26 : vector<512x128xf32>
    %cst_13 = arith.constant 0.000000e+00 : f32
    %28 = vector.broadcast %cst_13 : f32 to vector<512x128xf32>
    %29 = arith.cmpf oge, %27, %28 : vector<512x128xf32>
    %cst_14 = arith.constant 2.000000e-01 : f32
    %30 = vector.broadcast %cst_14 : f32 to vector<512x128xf32>
    %31 = arith.mulf %30, %27 : vector<512x128xf32>
    %32 = arith.select %29, %27, %31 : vector<512x128xi1>, vector<512x128xf32>
    %33 = arith.truncf %32 : vector<512x128xf32> to vector<512x128xbf16>
    %c0_15 = arith.constant 0 : index
    %c0_16 = arith.constant 0 : index
    %34 = vector.load %arg5[%c0_15, %c0_16] : memref<512x128xbf16, #tpu.memory_space<vmem>>, vector<512x128xbf16>
    tpu.vector_store %arg5[%c0_15, %c0_16], %33 {strides = array<i32>} : memref<512x128xbf16, #tpu.memory_space<vmem>>, vector<512x128xbf16>,
    return
  }
  func.func @transform_0(%arg0: i32) -> (i32, i32) {
    %c0_i32 = arith.constant 0 : i32
    %c0_i32_0 = arith.constant 0 : i32
    %c0_i32_1 = arith.constant 0 : i32
    return %c0_i32, %c0_i32_0 : i32, i32
  }
  func.func @transform_1(%arg0: i32) -> (i32, i32) {
    %c0_i32 = arith.constant 0 : i32
    %c0_i32_0 = arith.constant 0 : i32
    %c0_i32_1 = arith.constant 0 : i32
    return %c0_i32, %c0_i32_0 : i32, i32
  }
  func.func @transform_2(%arg0: i32) -> (i32, i32) {
    %c0_i32 = arith.constant 0 : i32
    %c0_i32_0 = arith.constant 0 : i32
    %c0_i32_1 = arith.constant 0 : i32
    return %c0_i32, %c0_i32_0 : i32, i32
  }
  func.func @transform_3(%arg0: i32) -> (i32, i32) {
    %c0_i32 = arith.constant 0 : i32
    %c0_i32_0 = arith.constant 0 : i32
    %c0_i32_1 = arith.constant 0 : i32
    return %c0_i32, %c0_i32_0 : i32, i32
  }
  func.func @transform_4(%arg0: i32) -> (i32, i32) {
    %c0_i32 = arith.constant 0 : i32
    %c0_i32_0 = arith.constant 0 : i32
    %c0_i32_1 = arith.constant 0 : i32
    return %c0_i32, %c0_i32_0 : i32, i32
  }
}

module attributes {stable_mosaic.version = 11 : i64} {
  func.func @_conv_bn_act_kernel(%arg0: i32, %arg1: memref<128x256xbf16, #tpu.memory_space<vmem>>, %arg2: memref<256x128xbf16, #tpu.memory_space<vmem>>, %arg3: memref<1x128xf32, #tpu.memory_space<vmem>>, %arg4: memref<1x128xf32, #tpu.memory_space<vmem>>, %arg5: memref<128x128xbf16, #tpu.memory_space<vmem>>) attributes {dimension_semantics = [#tpu.dimension_semantics<arbitrary>], iteration_bounds = array<i64: 1>, scalar_prefetch = 0 : i64, scratch_operands = 0 : i64, tpu.core_type = #tpu.core_type<tc>, window_params = [{pipeline_mode = #tpu.pipeline_mode<synchronous>, transform_indices = @transform_0, window_bounds = array<i64: 128, 256>}, {pipeline_mode = #tpu.pipeline_mode<synchronous>, transform_indices = @transform_1, window_bounds = array<i64: 256, 128>}, {pipeline_mode = #tpu.pipeline_mode<synchronous>, transform_indices = @transform_2, window_bounds = array<i64: 1, 128>}, {pipeline_mode = #tpu.pipeline_mode<synchronous>, transform_indices = @transform_3, window_bounds = array<i64: 1, 128>}, {pipeline_mode = #tpu.pipeline_mode<synchronous>, transform_indices = @transform_4, window_bounds = array<i64: 128, 128>}]} {
    %c0 = arith.constant 0 : index
    %c0_0 = arith.constant 0 : index
    %0 = vector.load %arg1[%c0, %c0_0] : memref<128x256xbf16, #tpu.memory_space<vmem>>, vector<128x256xbf16>
    %c0_1 = arith.constant 0 : index
    %c0_2 = arith.constant 0 : index
    %1 = vector.load %arg2[%c0_1, %c0_2] : memref<256x128xbf16, #tpu.memory_space<vmem>>, vector<256x128xbf16>
    %cst = arith.constant dense<0.000000e+00> : vector<128x128xf32>
    %2 = tpu.matmul %0, %1, %cst {dimension_numbers = #tpu.dot_dimension_numbers<[1], [0], [0], [1], [0, 0, 1, 1], [], []>} : vector<128x256xbf16>, vector<256x128xbf16>, vector<128x128xf32> -> vector<128x128xf32>
    %cst_3 = arith.constant dense<0.000000e+00> : vector<128xf32>
    %3 = vector.multi_reduction <add>, %2, %cst_3 [0] : vector<128x128xf32> to vector<128xf32>
    %4 = vector.shape_cast %3 : vector<128xf32> to vector<1x128xf32>
    %cst_4 = arith.constant 7.812500e-03 : f32
    %5 = vector.broadcast %cst_4 : f32 to vector<1x128xf32>
    %6 = arith.mulf %4, %5 : vector<1x128xf32>
    %7 = arith.mulf %2, %2 : vector<128x128xf32>
    %cst_5 = arith.constant dense<0.000000e+00> : vector<128xf32>
    %8 = vector.multi_reduction <add>, %7, %cst_5 [0] : vector<128x128xf32> to vector<128xf32>
    %9 = vector.shape_cast %8 : vector<128xf32> to vector<1x128xf32>
    %cst_6 = arith.constant 7.812500e-03 : f32
    %10 = vector.broadcast %cst_6 : f32 to vector<1x128xf32>
    %11 = arith.mulf %9, %10 : vector<1x128xf32>
    %12 = arith.mulf %6, %6 : vector<1x128xf32>
    %13 = arith.subf %11, %12 : vector<1x128xf32>
    %cst_7 = arith.constant 0.000000e+00 : f32
    %14 = vector.broadcast %cst_7 : f32 to vector<1x128xf32>
    %15 = arith.maximumf %13, %14 : vector<1x128xf32>
    %c0_8 = arith.constant 0 : index
    %c0_9 = arith.constant 0 : index
    %16 = vector.load %arg3[%c0_8, %c0_9] : memref<1x128xf32, #tpu.memory_space<vmem>>, vector<1x128xf32>
    %cst_10 = arith.constant 9.99999974E-6 : f32
    %17 = vector.broadcast %cst_10 : f32 to vector<1x128xf32>
    %18 = arith.addf %15, %17 : vector<1x128xf32>
    %19 = math.rsqrt %18 : vector<1x128xf32>
    %20 = arith.mulf %16, %19 : vector<1x128xf32>
    %c0_11 = arith.constant 0 : index
    %c0_12 = arith.constant 0 : index
    %21 = vector.load %arg4[%c0_11, %c0_12] : memref<1x128xf32, #tpu.memory_space<vmem>>, vector<1x128xf32>
    %22 = arith.mulf %6, %20 : vector<1x128xf32>
    %23 = arith.subf %21, %22 : vector<1x128xf32>
    %24 = vector.broadcast %20 : vector<1x128xf32> to vector<128x128xf32>
    %25 = arith.mulf %2, %24 : vector<128x128xf32>
    %26 = vector.broadcast %23 : vector<1x128xf32> to vector<128x128xf32>
    %27 = arith.addf %25, %26 : vector<128x128xf32>
    %cst_13 = arith.constant 0.000000e+00 : f32
    %28 = vector.broadcast %cst_13 : f32 to vector<128x128xf32>
    %29 = arith.cmpf oge, %27, %28 : vector<128x128xf32>
    %cst_14 = arith.constant 2.000000e-01 : f32
    %30 = vector.broadcast %cst_14 : f32 to vector<128x128xf32>
    %31 = arith.mulf %30, %27 : vector<128x128xf32>
    %32 = arith.select %29, %27, %31 : vector<128x128xi1>, vector<128x128xf32>
    %33 = arith.truncf %32 : vector<128x128xf32> to vector<128x128xbf16>
    %c0_15 = arith.constant 0 : index
    %c0_16 = arith.constant 0 : index
    %34 = vector.load %arg5[%c0_15, %c0_16] : memref<128x128xbf16, #tpu.memory_space<vmem>>, vector<128x128xbf16>
    tpu.vector_store %arg5[%c0_15, %c0_16], %33 {strides = array<i32>} : memref<128x128xbf16, #tpu.memory_space<vmem>>, vector<128x128xbf16>,
    return
  }
  func.func @transform_0(%arg0: i32) -> (i32, i32) {
    %c0_i32 = arith.constant 0 : i32
    %c0_i32_0 = arith.constant 0 : i32
    %c0_i32_1 = arith.constant 0 : i32
    return %c0_i32, %c0_i32_0 : i32, i32
  }
  func.func @transform_1(%arg0: i32) -> (i32, i32) {
    %c0_i32 = arith.constant 0 : i32
    %c0_i32_0 = arith.constant 0 : i32
    %c0_i32_1 = arith.constant 0 : i32
    return %c0_i32, %c0_i32_0 : i32, i32
  }
  func.func @transform_2(%arg0: i32) -> (i32, i32) {
    %c0_i32 = arith.constant 0 : i32
    %c0_i32_0 = arith.constant 0 : i32
    %c0_i32_1 = arith.constant 0 : i32
    return %c0_i32, %c0_i32_0 : i32, i32
  }
  func.func @transform_3(%arg0: i32) -> (i32, i32) {
    %c0_i32 = arith.constant 0 : i32
    %c0_i32_0 = arith.constant 0 : i32
    %c0_i32_1 = arith.constant 0 : i32
    return %c0_i32, %c0_i32_0 : i32, i32
  }
  func.func @transform_4(%arg0: i32) -> (i32, i32) {
    %c0_i32 = arith.constant 0 : i32
    %c0_i32_0 = arith.constant 0 : i32
    %c0_i32_1 = arith.constant 0 : i32
    return %c0_i32, %c0_i32_0 : i32, i32
  }
}

module attributes {stable_mosaic.version = 11 : i64} {
  func.func @_conv_bn_act_final_kernel(%arg0: i32, %arg1: memref<32x512xbf16, #tpu.memory_space<vmem>>, %arg2: memref<512x128xbf16, #tpu.memory_space<vmem>>, %arg3: memref<1x128xf32, #tpu.memory_space<vmem>>, %arg4: memref<1x128xf32, #tpu.memory_space<vmem>>, %arg5: memref<32x128xf32, #tpu.memory_space<vmem>>, %arg6: memref<2x32xf32, #tpu.memory_space<vmem>>, %arg7: memref<2x128xf32, #tpu.memory_space<vmem>>) attributes {dimension_semantics = [#tpu.dimension_semantics<arbitrary>], iteration_bounds = array<i64: 1>, scalar_prefetch = 0 : i64, scratch_operands = 0 : i64, tpu.core_type = #tpu.core_type<tc>, window_params = [{pipeline_mode = #tpu.pipeline_mode<synchronous>, transform_indices = @transform_0, window_bounds = array<i64: 32, 512>}, {pipeline_mode = #tpu.pipeline_mode<synchronous>, transform_indices = @transform_1, window_bounds = array<i64: 512, 128>}, {pipeline_mode = #tpu.pipeline_mode<synchronous>, transform_indices = @transform_2, window_bounds = array<i64: 1, 128>}, {pipeline_mode = #tpu.pipeline_mode<synchronous>, transform_indices = @transform_3, window_bounds = array<i64: 1, 128>}, {pipeline_mode = #tpu.pipeline_mode<synchronous>, transform_indices = @transform_4, window_bounds = array<i64: 32, 128>}, {pipeline_mode = #tpu.pipeline_mode<synchronous>, transform_indices = @transform_5, window_bounds = array<i64: 2, 32>}, {pipeline_mode = #tpu.pipeline_mode<synchronous>, transform_indices = @transform_6, window_bounds = array<i64: 2, 128>}]} {
    %c0 = arith.constant 0 : index
    %c0_0 = arith.constant 0 : index
    %0 = vector.load %arg1[%c0, %c0_0] : memref<32x512xbf16, #tpu.memory_space<vmem>>, vector<32x512xbf16>
    %c0_1 = arith.constant 0 : index
    %c0_2 = arith.constant 0 : index
    %1 = vector.load %arg2[%c0_1, %c0_2] : memref<512x128xbf16, #tpu.memory_space<vmem>>, vector<512x128xbf16>
    %cst = arith.constant dense<0.000000e+00> : vector<32x128xf32>
    %2 = tpu.matmul %0, %1, %cst {dimension_numbers = #tpu.dot_dimension_numbers<[1], [0], [0], [1], [0, 0, 1, 1], [], []>} : vector<32x512xbf16>, vector<512x128xbf16>, vector<32x128xf32> -> vector<32x128xf32>
    %cst_3 = arith.constant dense<0.000000e+00> : vector<128xf32>
    %3 = vector.multi_reduction <add>, %2, %cst_3 [0] : vector<32x128xf32> to vector<128xf32>
    %4 = vector.shape_cast %3 : vector<128xf32> to vector<1x128xf32>
    %cst_4 = arith.constant 3.125000e-02 : f32
    %5 = vector.broadcast %cst_4 : f32 to vector<1x128xf32>
    %6 = arith.mulf %4, %5 : vector<1x128xf32>
    %7 = arith.mulf %2, %2 : vector<32x128xf32>
    %cst_5 = arith.constant dense<0.000000e+00> : vector<128xf32>
    %8 = vector.multi_reduction <add>, %7, %cst_5 [0] : vector<32x128xf32> to vector<128xf32>
    %9 = vector.shape_cast %8 : vector<128xf32> to vector<1x128xf32>
    %cst_6 = arith.constant 3.125000e-02 : f32
    %10 = vector.broadcast %cst_6 : f32 to vector<1x128xf32>
    %11 = arith.mulf %9, %10 : vector<1x128xf32>
    %12 = arith.mulf %6, %6 : vector<1x128xf32>
    %13 = arith.subf %11, %12 : vector<1x128xf32>
    %cst_7 = arith.constant 0.000000e+00 : f32
    %14 = vector.broadcast %cst_7 : f32 to vector<1x128xf32>
    %15 = arith.maximumf %13, %14 : vector<1x128xf32>
    %c0_8 = arith.constant 0 : index
    %c0_9 = arith.constant 0 : index
    %16 = vector.load %arg3[%c0_8, %c0_9] : memref<1x128xf32, #tpu.memory_space<vmem>>, vector<1x128xf32>
    %cst_10 = arith.constant 9.99999974E-6 : f32
    %17 = vector.broadcast %cst_10 : f32 to vector<1x128xf32>
    %18 = arith.addf %15, %17 : vector<1x128xf32>
    %19 = math.rsqrt %18 : vector<1x128xf32>
    %20 = arith.mulf %16, %19 : vector<1x128xf32>
    %c0_11 = arith.constant 0 : index
    %c0_12 = arith.constant 0 : index
    %21 = vector.load %arg4[%c0_11, %c0_12] : memref<1x128xf32, #tpu.memory_space<vmem>>, vector<1x128xf32>
    %22 = arith.mulf %6, %20 : vector<1x128xf32>
    %23 = arith.subf %21, %22 : vector<1x128xf32>
    %24 = vector.broadcast %20 : vector<1x128xf32> to vector<32x128xf32>
    %25 = arith.mulf %2, %24 : vector<32x128xf32>
    %26 = vector.broadcast %23 : vector<1x128xf32> to vector<32x128xf32>
    %27 = arith.addf %25, %26 : vector<32x128xf32>
    %cst_13 = arith.constant 0.000000e+00 : f32
    %28 = vector.broadcast %cst_13 : f32 to vector<32x128xf32>
    %29 = arith.cmpf oge, %27, %28 : vector<32x128xf32>
    %cst_14 = arith.constant 2.000000e-01 : f32
    %30 = vector.broadcast %cst_14 : f32 to vector<32x128xf32>
    %31 = arith.mulf %30, %27 : vector<32x128xf32>
    %32 = arith.select %29, %27, %31 : vector<32x128xi1>, vector<32x128xf32>
    %c0_15 = arith.constant 0 : index
    %c0_16 = arith.constant 0 : index
    %33 = vector.load %arg6[%c0_15, %c0_16] : memref<2x32xf32, #tpu.memory_space<vmem>>, vector<2x32xf32>
    %c0_17 = arith.constant 0 : index
    %c0_18 = arith.constant 0 : index
    %34 = vector.load %arg5[%c0_17, %c0_18] : memref<32x128xf32, #tpu.memory_space<vmem>>, vector<32x128xf32>
    %35 = arith.mulf %32, %34 : vector<32x128xf32>
    %cst_19 = arith.constant dense<0.000000e+00> : vector<2x128xf32>
    %36 = tpu.matmul %33, %35, %cst_19 {dimension_numbers = #tpu.dot_dimension_numbers<[1], [0], [0], [1], [0, 0, 1, 1], [], []>} : vector<2x32xf32>, vector<32x128xf32>, vector<2x128xf32> -> vector<2x128xf32>
    %cst_20 = arith.constant dense<0.000000e+00> : vector<2xf32>
    %37 = vector.multi_reduction <add>, %36, %cst_20 [1] : vector<2x128xf32> to vector<2xf32>
    %38 = vector.shape_cast %37 : vector<2xf32> to vector<2x1xf32>
    %39 = vector.shape_cast %38 : vector<2x1xf32> to vector<2x1xf32>
    %40 = vector.broadcast %39 : vector<2x1xf32> to vector<2x128xf32>
    %c0_21 = arith.constant 0 : index
    %c0_22 = arith.constant 0 : index
    %41 = vector.load %arg7[%c0_21, %c0_22] : memref<2x128xf32, #tpu.memory_space<vmem>>, vector<2x128xf32>
    tpu.vector_store %arg7[%c0_21, %c0_22], %40 {strides = array<i32>} : memref<2x128xf32, #tpu.memory_space<vmem>>, vector<2x128xf32>,
    return
  }
  func.func @transform_0(%arg0: i32) -> (i32, i32) {
    %c0_i32 = arith.constant 0 : i32
    %c0_i32_0 = arith.constant 0 : i32
    %c0_i32_1 = arith.constant 0 : i32
    return %c0_i32, %c0_i32_0 : i32, i32
  }
  func.func @transform_1(%arg0: i32) -> (i32, i32) {
    %c0_i32 = arith.constant 0 : i32
    %c0_i32_0 = arith.constant 0 : i32
    %c0_i32_1 = arith.constant 0 : i32
    return %c0_i32, %c0_i32_0 : i32, i32
  }
  func.func @transform_2(%arg0: i32) -> (i32, i32) {
    %c0_i32 = arith.constant 0 : i32
    %c0_i32_0 = arith.constant 0 : i32
    %c0_i32_1 = arith.constant 0 : i32
    return %c0_i32, %c0_i32_0 : i32, i32
  }
  func.func @transform_3(%arg0: i32) -> (i32, i32) {
    %c0_i32 = arith.constant 0 : i32
    %c0_i32_0 = arith.constant 0 : i32
    %c0_i32_1 = arith.constant 0 : i32
    return %c0_i32, %c0_i32_0 : i32, i32
  }
  func.func @transform_4(%arg0: i32) -> (i32, i32) {
    %c0_i32 = arith.constant 0 : i32
    %c0_i32_0 = arith.constant 0 : i32
    %c0_i32_1 = arith.constant 0 : i32
    return %c0_i32, %c0_i32_0 : i32, i32
  }
  func.func @transform_5(%arg0: i32) -> (i32, i32) {
    %c0_i32 = arith.constant 0 : i32
    %c0_i32_0 = arith.constant 0 : i32
    %c0_i32_1 = arith.constant 0 : i32
    return %c0_i32, %c0_i32_0 : i32, i32
  }
  func.func @transform_6(%arg0: i32) -> (i32, i32) {
    %c0_i32 = arith.constant 0 : i32
    %c0_i32_0 = arith.constant 0 : i32
    %c0_i32_1 = arith.constant 0 : i32
    return %c0_i32, %c0_i32_0 : i32, i32
  }
}

</mosaic_0001>

<bundles_post_ra>
// kernel: discriminator_forward.4
= control target key start
LH: loop header
LB: loop body
LE: loop exit
PB: predicated region body
PF: predicated region fallthrough
CT: control target
= control target key end

     0   :  { %s1924_s9 = smov 0   ;;  %s2064_s0 = inlined_call_operand.vmem [shape: bf16[2048,48], index: 0, kind: input, shape index: {}]   ;;  %s2065_s1 = inlined_call_operand.vmem [shape: bf16[48,128], index: 1, kind: input, shape index: {}]   ;;  %s2066_s2 = inlined_call_operand.vmem [shape: bf16[2048,128], index: 2, kind: output, shape index: {}]  }
   0x1 LB: > { %s1350_s10 = sadd.s32 4294967295, %s1907_s9   ;;  %p1354_p0 = scmp.ge.s32.totalorder %s1907_s9, 1  ;;  %s1907_s9 = sphi %s1924_s9, %s12_s9  }
   0x2   : > { %p113_p1 = scmp.lt.s32.totalorder %s1907_s9, 5 }
   0x4   : > { %p114_p2 = pnand %p1354_p0, %p113_p1 }
   0x5   : > { %v1866_v0 = vld [vmem:[%s2065_s1] sm:$0xff] (!%p114_p2)   ;;  %s1355_s13 = sshll.u32 (!%p114_p2), %s1350_s10, 6  ;;  %v1867_v1 = vld [vmem:[%s2065_s1 + $0x8] sm:$0xff] (!%p114_p2)   ;;  %v1868_v2 = vld [vmem:[%s2065_s1 + $0x10] sm:$0xff] (!%p114_p2)   ;;  %vm396_vm0 = vcmask (!%p114_p2), 392192  }
   0x6   : > { %117 = sbr.rel (%p114_p2) target bundleno = 297 (0x129), region = 28  ;;  %p136_p3 = scmp.lt.s32.totalorder (!%p114_p2), %s1355_s13, 255  ;;  %1782 = vmatprep.subr.bf16.mxu0 (!%p114_p2), %v1866_v0  ;;  %1852 = vmatprep.subr.bf16.mxu1 (!%p114_p2), %v1866_v0 }
   0x7   : > { %1783 = vmatpush3.bf16.msra.mxu0 (!%p114_p2), %v1866_v0  ;;  %1855 = vmatpush3.bf16.msra.mxu1 (!%p114_p2), %v1866_v0 }
   0x8   : > { %1784 = vmatprep.subr.bf16.mxu0 (!%p114_p2), %v1867_v1  ;;  %1853 = vmatprep.subr.bf16.mxu1 (!%p114_p2), %v1867_v1 }
   0xb   : > { %1785 = vmatpush3.bf16.msra.mxu0 (!%p114_p2), %v1867_v1  ;;  %1856 = vmatpush3.bf16.msra.mxu1 (!%p114_p2), %v1867_v1 }
   0xc   : > { %1786 = vmatprep.subr.bf16.mxu0 (!%p114_p2), %v1868_v2  ;;  %1854 = vmatprep.subr.bf16.mxu1 (!%p114_p2), %v1868_v2 }
   0xd   : > { %s2068_s13 = smov (!%p136_p3, %s1355_s13), 255 }
   0xe   : > { %s1356_s18 = sshll.u32 %s2068_s13, 2 }
   0xf   : > { %s1949_s21 = scalar_lea.vmem %s2064_s0, %s1356_s18  ;;  %1787 = vmatpush3.bf16.msra.mxu0 %v1868_v2  ;;  %1857 = vmatpush3.bf16.msra.mxu1 %v1868_v2  ;;  %s2020_s24 = scalar_lea.vmem %s2066_s2, %s1356_s18 }
  0x10   : > { %v1869_v3 = vld [vmem:[%s1949_s21] sm:$0xff]   ;;  %v1871_v5 = vld [vmem:[%s1949_s21 + $0x8] sm:$0xff]   ;;  %v1873_v7 = vld [vmem:[%s1949_s21 + $0x10] sm:$0xff]  }
  0x11   : > { %v1870_v4 = vld [vmem:[%s1949_s21 + $0x80] sm:$0xff]   ;;  %1788 = vmatprep.mubr.msk.bf16.mxu0 %vm396_vm0, %v1869_v3  ;;  %v1872_v6 = vld [vmem:[%s1949_s21 + $0x88] sm:$0xff]   ;;  %v1874_v8 = vld [vmem:[%s1949_s21 + $0x90] sm:$0xff]  }
  0x12   : > { %1820 = vmatprep.mubr.msk.bf16.mxu1 %vm396_vm0, %v1870_v4  ;;  %1789 = vmatmul.mubr.msk.bf16.vlgmr.msra.gmra.mrb[0].mxu0 %vm396_vm0, %v1871_v5  ;;  %v1875_v9 = vld [vmem:[%s1949_s21 + $0x18] sm:$0xff]   ;;  %v1877_v11 = vld [vmem:[%s1949_s21 + $0x20] sm:$0xff]   ;;  %v1879_v13 = vld [vmem:[%s1949_s21 + $0x28] sm:$0xff]  }
  0x13   : > { %1821 = vmatmul.mubr.msk.bf16.vlgmr.msra.gmra.mrb[0].mxu1 %vm396_vm0, %v1872_v6  ;;  %1792 = vmatprep.mubr.msk.bf16.mxu0 %vm396_vm0, %v1873_v7  ;;  %v1876_v10 = vld [vmem:[%s1949_s21 + $0x98] sm:$0xff]   ;;  %v1878_v12 = vld [vmem:[%s1949_s21 + $0xa0] sm:$0xff]   ;;  %v1880_v14 = vld [vmem:[%s1949_s21 + $0xa8] sm:$0xff]  }
  0x14   : > { %1824 = vmatprep.mubr.msk.bf16.mxu1 %vm396_vm0, %v1874_v8  ;;  %v1881_v15 = vld [vmem:[%s1949_s21 + $0x30] sm:$0xff]   ;;  %v1883_v17 = vld [vmem:[%s1949_s21 + $0x38] sm:$0xff]   ;;  %v1885_v19 = vld [vmem:[%s1949_s21 + $0x40] sm:$0xff]  }
  0x15   : > { %v1882_v16 = vld [vmem:[%s1949_s21 + $0xb0] sm:$0xff]   ;;  %v1884_v18 = vld [vmem:[%s1949_s21 + $0xb8] sm:$0xff]   ;;  %v1886_v20 = vld [vmem:[%s1949_s21 + $0xc0] sm:$0xff]  }
  0x16   : > { %v1887_v21 = vld [vmem:[%s1949_s21 + $0x48] sm:$0xff]   ;;  %v1889_v23 = vld [vmem:[%s1949_s21 + $0x50] sm:$0xff]   ;;  %v1891_v25 = vld [vmem:[%s1949_s21 + $0x58] sm:$0xff]  }
  0x17   : > { %v1888_v22 = vld [vmem:[%s1949_s21 + $0xc8] sm:$0xff]   ;;  %v1890_v24 = vld [vmem:[%s1949_s21 + $0xd0] sm:$0xff]   ;;  %v1892_v26 = vld [vmem:[%s1949_s21 + $0xd8] sm:$0xff]  }
  0x18   : > { %v1893_v27 = vld [vmem:[%s1949_s21 + $0x60] sm:$0xff]   ;;  %v1895_v29 = vld [vmem:[%s1949_s21 + $0x68] sm:$0xff]   ;;  %v1897_v31 = vld [vmem:[%s1949_s21 + $0x70] sm:$0xff]  }
  0x19   : > { %v1894_v28 = vld [vmem:[%s1949_s21 + $0xe0] sm:$0xff]   ;;  %v1896_v30 = vld [vmem:[%s1949_s21 + $0xe8] sm:$0xff]   ;;  %v1898_v32 = vld [vmem:[%s1949_s21 + $0xf0] sm:$0xff]  }
  0x1a   : > { %1793 = vmatmul.mubr.msk.bf16.gmra.mrb[4].mxu0 %vm396_vm0, %v1875_v9  ;;  %v1899_v33 = vld [vmem:[%s1949_s21 + $0x78] sm:$0xff]  }
  0x1b   : > { %1825 = vmatmul.mubr.msk.bf16.gmra.mrb[4].mxu1 %vm396_vm0, %v1876_v10  ;;  %1796 = vmatprep.mubr.msk.bf16.mxu0 %vm396_vm0, %v1877_v11  ;;  %v1900_v34 = vld [vmem:[%s1949_s21 + $0xf8] sm:$0xff]  }
  0x1c   : > { %1828 = vmatprep.mubr.msk.bf16.mxu1 %vm396_vm0, %v1878_v12 }
  0x22   : > { %1797 = vmatmul.mubr.msk.bf16.gmra.mrb[8].mxu0 %vm396_vm0, %v1879_v13 }
  0x23   : > { %1829 = vmatmul.mubr.msk.bf16.gmra.mrb[8].mxu1 %vm396_vm0, %v1880_v14  ;;  %1800 = vmatprep.mubr.msk.bf16.mxu0 %vm396_vm0, %v1881_v15 }
  0x24   : > { %1832 = vmatprep.mubr.msk.bf16.mxu1 %vm396_vm0, %v1882_v16 }
  0x2a   : > { %1801 = vmatmul.mubr.msk.bf16.gmra.mrb[12].mxu0 %vm396_vm0, %v1883_v17 }
  0x2b   : > { %1833 = vmatmul.mubr.msk.bf16.gmra.mrb[12].mxu1 %vm396_vm0, %v1884_v18  ;;  %1804 = vmatprep.mubr.msk.bf16.mxu0 %vm396_vm0, %v1885_v19 }
  0x2c   : > { %1836 = vmatprep.mubr.msk.bf16.mxu1 %vm396_vm0, %v1886_v20 }
  0x32   : > { %1805 = vmatmul.mubr.msk.bf16.gmra.mrb[16].mxu0 %vm396_vm0, %v1887_v21 }
  0x33   : > { %1837 = vmatmul.mubr.msk.bf16.gmra.mrb[16].mxu1 %vm396_vm0, %v1888_v22  ;;  %1808 = vmatprep.mubr.msk.bf16.mxu0 %vm396_vm0, %v1889_v23 }
  0x34   : > { %1840 = vmatprep.mubr.msk.bf16.mxu1 %vm396_vm0, %v1890_v24 }
  0x3a   : > { %1809 = vmatmul.mubr.msk.bf16.gmra.mrb[20].mxu0 %vm396_vm0, %v1891_v25 }
  0x3b   : > { %1841 = vmatmul.mubr.msk.bf16.gmra.mrb[20].mxu1 %vm396_vm0, %v1892_v26  ;;  %1812 = vmatprep.mubr.msk.bf16.mxu0 %vm396_vm0, %v1893_v27 }
  0x3c   : > { %1844 = vmatprep.mubr.msk.bf16.mxu1 %vm396_vm0, %v1894_v28 }
  0x42   : > { %1813 = vmatmul.mubr.msk.bf16.gmra.mrb[24].mxu0 %vm396_vm0, %v1895_v29 }
  0x43   : > { %1845 = vmatmul.mubr.msk.bf16.gmra.mrb[24].mxu1 %vm396_vm0, %v1896_v30  ;;  %1816 = vmatprep.mubr.msk.bf16.mxu0 %vm396_vm0, %v1897_v31 }
  0x44   : > { %1848 = vmatprep.mubr.msk.bf16.mxu1 %vm396_vm0, %v1898_v32 }
  0x4a   : > { %1817 = vmatmul.mubr.msk.bf16.gmra.mrb[28].mxu0 %vm396_vm0, %v1899_v33 }
  0x4b   : > { %1849 = vmatmul.mubr.msk.bf16.gmra.mrb[28].mxu1 %vm396_vm0, %v1900_v34 }
  0xe5   : > { %v1790_v35 = vpop.f32.mrb[0].mxu0 }
  0xe6   : > { %v1822_v36 = vpop.f32.mrb[0].mxu1  ;;  %vm784_vm1 = vcmp.ge.f32.partialorder %v1790_v35, 0.0  ;;  %v848_v37 = vmul.f32 0.2, %v1790_v35  ;;  %v527_v39 = vpop.f32.mrb[1].mxu0 }
  0xe7   : > { %v880_v38 = vmul.f32 0.2, %v1822_v36  ;;  %vm816_vm2 = vcmp.ge.f32.partialorder %v1822_v36, 0.0  ;;  %v655_v40 = vpop.f32.mrb[1].mxu1  ;;  %v846_v41 = vmul.f32 0.2, %v527_v39 }
  0xe8   : > { %v1791_v42 = vpop.f32.mrb[2].mxu0  ;;  %v1823_v43 = vpop.f32.mrb[2].mxu1  ;;  %v912_v44 = vsel %vm784_vm1, %v1790_v35, %v848_v37  ;;  %v878_v45 = vmul.f32 0.2, %v655_v40  ;;  %vm782_vm4 = vcmp.ge.f32.partialorder %v527_v39, 0.0  ;;  %vm814_vm6 = vcmp.ge.f32.partialorder %v655_v40, 0.0 }
  0xe9   : > { %vm785_vm3 = vcmp.ge.f32.partialorder %v1791_v42, 0.0  ;;  %v849_v46 = vmul.f32 0.2, %v1791_v42  ;;  %v944_v47 = vsel %vm816_vm2, %v1822_v36, %v880_v38  ;;  %vm817_vm5 = vcmp.ge.f32.partialorder %v1823_v43, 0.0  ;;  %v530_v49 = vpop.f32.mrb[3].mxu0  ;;  %v658_v50 = vpop.f32.mrb[3].mxu1 }
  0xea   : > { %v881_v48 = vmul.f32 0.2, %v1823_v43  ;;  %vm783_vm7 = vcmp.ge.f32.partialorder %v530_v49, 0.0  ;;  %v847_v52 = vmul.f32 0.2, %v530_v49  ;;  %vm815_vm8 = vcmp.ge.f32.partialorder %v658_v50, 0.0 }
  0xeb   : > { %v913_v51 = vsel %vm785_vm3, %v1791_v42, %v849_v46  ;;  %v879_v55 = vmul.f32 0.2, %v658_v50  ;;  %v910_v56 = vsel %vm782_vm4, %v527_v39, %v846_v41  ;;  %v942_v61 = vsel %vm814_vm6, %v655_v40, %v878_v45 }
  0xec   : > { %v1564_v53 = vpack.c.bf16 %v913_v51, %v912_v44  ;;  %v945_v54 = vsel %vm817_vm5, %v1823_v43, %v881_v48  ;;  %v911_v58 = vsel %vm783_vm7, %v530_v49, %v847_v52 }
  0xed   : > { %v1644_v57 = vpack.c.bf16 %v945_v54, %v944_v47  ;;  %v1794_v59 = vpop.f32.mrb[4].mxu0  ;;  %v1559_v62 = vpack.c.bf16 %v911_v58, %v910_v56  ;;  %v943_v63 = vsel %vm815_vm8, %v658_v50, %v879_v55 }
  0xee   : > { %v1826_v60 = vpop.f32.mrb[4].mxu1  ;;  %1716 = vst [vmem:[%s2020_s24 + $0x8] sm:$0xff] %v1564_v53   ;;  %v852_v0 = vmul.f32 0.2, %v1794_v59  ;;  %v543_v1 = vpop.f32.mrb[5].mxu0  ;;  %v1639_v3 = vpack.c.bf16 %v943_v63, %v942_v61  ;;  %vm788_vm9 = vcmp.ge.f32.partialorder %v1794_v59, 0.0 }
  0xef   : > { %v671_v2 = vpop.f32.mrb[5].mxu1  ;;  %1732 = vst [vmem:[%s2020_s24 + $0x88] sm:$0xff] %v1644_v57   ;;  %v884_v4 = vmul.f32 0.2, %v1826_v60  ;;  %v1795_v5 = vpop.f32.mrb[6].mxu0  ;;  %1560 = vst [vmem:[%s2020_s24] sm:$0xff] %v1559_v62   ;;  %vm820_vm10 = vcmp.ge.f32.partialorder %v1826_v60, 0.0 }
  0xf0   : > { %v1827_v6 = vpop.f32.mrb[6].mxu1  ;;  %v850_v7 = vmul.f32 0.2, %v543_v1  ;;  %v882_v8 = vmul.f32 0.2, %v671_v2  ;;  %v546_v9 = vpop.f32.mrb[7].mxu0  ;;  %v916_v12 = vsel %vm788_vm9, %v1794_v59, %v852_v0 }
  0xf1   : > { %1731 = vst [vmem:[%s2020_s24 + $0x80] sm:$0xff] %v1639_v3   ;;  %vm786_vm11 = vcmp.ge.f32.partialorder %v543_v1, 0.0  ;;  %vm789_vm12 = vcmp.ge.f32.partialorder %v1795_v5, 0.0  ;;  %v853_v10 = vmul.f32 0.2, %v1795_v5  ;;  %vm821_vm13 = vcmp.ge.f32.partialorder %v1827_v6, 0.0 }
  0xf2   : > { %v674_v11 = vpop.f32.mrb[7].mxu1  ;;  %vm818_vm14 = vcmp.ge.f32.partialorder %v671_v2, 0.0  ;;  %v885_v13 = vmul.f32 0.2, %v1827_v6  ;;  %vm787_vm15 = vcmp.ge.f32.partialorder %v546_v9, 0.0  ;;  %v948_v17 = vsel %vm820_vm10, %v1826_v60, %v884_v4 }
  0xf3   : > { %v917_v14 = vsel %vm789_vm12, %v1795_v5, %v853_v10  ;;  %v851_v15 = vmul.f32 0.2, %v546_v9  ;;  %vm819_vm0 = vcmp.ge.f32.partialorder %v674_v11, 0.0  ;;  %v883_v16 = vmul.f32 0.2, %v674_v11 }
  0xf4   : > { %v914_v18 = vsel %vm786_vm11, %v543_v1, %v850_v7  ;;  %v1574_v19 = vpack.c.bf16 %v917_v14, %v916_v12  ;;  %v949_v20 = vsel %vm821_vm13, %v1827_v6, %v885_v13  ;;  %v946_v21 = vsel %vm818_vm14, %v671_v2, %v882_v8 }
  0xf5   : > { %v1654_v22 = vpack.c.bf16 %v949_v20, %v948_v17  ;;  %v915_v23 = vsel %vm787_vm15, %v546_v9, %v851_v15  ;;  %v947_v24 = vsel %vm819_vm0, %v674_v11, %v883_v16  ;;  %v1798_v25 = vpop.f32.mrb[8].mxu0 }
  0xf6   : > { %v1830_v26 = vpop.f32.mrb[8].mxu1  ;;  %1718 = vst [vmem:[%s2020_s24 + $0x18] sm:$0xff] %v1574_v19   ;;  %v1569_v27 = vpack.c.bf16 %v915_v23, %v914_v18  ;;  %v1649_v28 = vpack.c.bf16 %v947_v24, %v946_v21  ;;  %vm792_vm1 = vcmp.ge.f32.partialorder %v1798_v25, 0.0  ;;  %v856_v29 = vmul.f32 0.2, %v1798_v25  ;;  %v559_v30 = vpop.f32.mrb[9].mxu0 }
  0xf7   : > { %v687_v31 = vpop.f32.mrb[9].mxu1  ;;  %1734 = vst [vmem:[%s2020_s24 + $0x98] sm:$0xff] %v1654_v22   ;;  %vm824_vm2 = vcmp.ge.f32.partialorder %v1830_v26, 0.0  ;;  %v888_v32 = vmul.f32 0.2, %v1830_v26  ;;  %v1799_v35 = vpop.f32.mrb[10].mxu0 }
  0xf8   : > { %1717 = vst [vmem:[%s2020_s24 + $0x10] sm:$0xff] %v1569_v27   ;;  %1733 = vst [vmem:[%s2020_s24 + $0x90] sm:$0xff] %v1649_v28   ;;  %v854_v33 = vmul.f32 0.2, %v559_v30  ;;  %v886_v34 = vmul.f32 0.2, %v687_v31  ;;  %v920_v37 = vsel %vm792_vm1, %v1798_v25, %v856_v29 }
  0xf9   : > { %v1831_v36 = vpop.f32.mrb[10].mxu1  ;;  %vm790_vm3 = vcmp.ge.f32.partialorder %v559_v30, 0.0  ;;  %vm793_vm4 = vcmp.ge.f32.partialorder %v1799_v35, 0.0  ;;  %v857_v38 = vmul.f32 0.2, %v1799_v35  ;;  %v562_v39 = vpop.f32.mrb[11].mxu0  ;;  %v952_v45 = vsel %vm824_vm2, %v1830_v26, %v888_v32 }
  0xfa   : > { %v690_v40 = vpop.f32.mrb[11].mxu1  ;;  %vm822_vm5 = vcmp.ge.f32.partialorder %v687_v31, 0.0  ;;  %vm825_vm6 = vcmp.ge.f32.partialorder %v1831_v36, 0.0  ;;  %v889_v41 = vmul.f32 0.2, %v1831_v36  ;;  %vm791_vm7 = vcmp.ge.f32.partialorder %v562_v39, 0.0 }
  0xfb   : > { %v921_v42 = vsel %vm793_vm4, %v1799_v35, %v857_v38  ;;  %v855_v43 = vmul.f32 0.2, %v562_v39  ;;  %vm823_vm8 = vcmp.ge.f32.partialorder %v690_v40, 0.0  ;;  %v887_v44 = vmul.f32 0.2, %v690_v40 }
  0xfc   : > { %v918_v46 = vsel %vm790_vm3, %v559_v30, %v854_v33  ;;  %v1584_v47 = vpack.c.bf16 %v921_v42, %v920_v37  ;;  %v953_v48 = vsel %vm825_vm6, %v1831_v36, %v889_v41  ;;  %v950_v49 = vsel %vm822_vm5, %v687_v31, %v886_v34 }
  0xfd   : > { %v1664_v50 = vpack.c.bf16 %v953_v48, %v952_v45  ;;  %v919_v51 = vsel %vm791_vm7, %v562_v39, %v855_v43  ;;  %v951_v52 = vsel %vm823_vm8, %v690_v40, %v887_v44  ;;  %v1802_v53 = vpop.f32.mrb[12].mxu0 }
  0xfe   : > { %v1834_v54 = vpop.f32.mrb[12].mxu1  ;;  %1720 = vst [vmem:[%s2020_s24 + $0x28] sm:$0xff] %v1584_v47   ;;  %v1579_v55 = vpack.c.bf16 %v919_v51, %v918_v46  ;;  %v1659_v56 = vpack.c.bf16 %v951_v52, %v950_v49  ;;  %vm796_vm9 = vcmp.ge.f32.partialorder %v1802_v53, 0.0  ;;  %v860_v57 = vmul.f32 0.2, %v1802_v53  ;;  %v575_v58 = vpop.f32.mrb[13].mxu0 }
  0xff   : > { %v703_v59 = vpop.f32.mrb[13].mxu1  ;;  %1736 = vst [vmem:[%s2020_s24 + $0xa8] sm:$0xff] %v1664_v50   ;;  %vm828_vm10 = vcmp.ge.f32.partialorder %v1834_v54, 0.0  ;;  %v892_v60 = vmul.f32 0.2, %v1834_v54  ;;  %v1803_v63 = vpop.f32.mrb[14].mxu0 }
 0x100   : > { %1719 = vst [vmem:[%s2020_s24 + $0x20] sm:$0xff] %v1579_v55   ;;  %1735 = vst [vmem:[%s2020_s24 + $0xa0] sm:$0xff] %v1659_v56   ;;  %v858_v61 = vmul.f32 0.2, %v575_v58  ;;  %v890_v62 = vmul.f32 0.2, %v703_v59  ;;  %v924_v1 = vsel %vm796_vm9, %v1802_v53, %v860_v57 }
 0x101   : > { %v1835_v0 = vpop.f32.mrb[14].mxu1  ;;  %vm794_vm11 = vcmp.ge.f32.partialorder %v575_v58, 0.0  ;;  %vm797_vm12 = vcmp.ge.f32.partialorder %v1803_v63, 0.0  ;;  %v861_v2 = vmul.f32 0.2, %v1803_v63  ;;  %v578_v3 = vpop.f32.mrb[15].mxu0  ;;  %v956_v9 = vsel %vm828_vm10, %v1834_v54, %v892_v60 }
 0x102   : > { %v706_v4 = vpop.f32.mrb[15].mxu1  ;;  %vm826_vm13 = vcmp.ge.f32.partialorder %v703_v59, 0.0  ;;  %vm829_vm14 = vcmp.ge.f32.partialorder %v1835_v0, 0.0  ;;  %v893_v5 = vmul.f32 0.2, %v1835_v0  ;;  %vm795_vm15 = vcmp.ge.f32.partialorder %v578_v3, 0.0 }
 0x103   : > { %v925_v6 = vsel %vm797_vm12, %v1803_v63, %v861_v2  ;;  %v859_v7 = vmul.f32 0.2, %v578_v3  ;;  %vm827_vm0 = vcmp.ge.f32.partialorder %v706_v4, 0.0  ;;  %v891_v8 = vmul.f32 0.2, %v706_v4 }
 0x104   : > { %v922_v10 = vsel %vm794_vm11, %v575_v58, %v858_v61  ;;  %v1594_v11 = vpack.c.bf16 %v925_v6, %v924_v1  ;;  %v957_v12 = vsel %vm829_vm14, %v1835_v0, %v893_v5  ;;  %v954_v13 = vsel %vm826_vm13, %v703_v59, %v890_v62 }
 0x105   : > { %v1674_v14 = vpack.c.bf16 %v957_v12, %v956_v9  ;;  %v923_v15 = vsel %vm795_vm15, %v578_v3, %v859_v7  ;;  %v955_v16 = vsel %vm827_vm0, %v706_v4, %v891_v8  ;;  %v1806_v17 = vpop.f32.mrb[16].mxu0 }
 0x106   : > { %v1838_v18 = vpop.f32.mrb[16].mxu1  ;;  %1722 = vst [vmem:[%s2020_s24 + $0x38] sm:$0xff] %v1594_v11   ;;  %v1589_v19 = vpack.c.bf16 %v923_v15, %v922_v10  ;;  %v1669_v20 = vpack.c.bf16 %v955_v16, %v954_v13  ;;  %vm800_vm1 = vcmp.ge.f32.partialorder %v1806_v17, 0.0  ;;  %v864_v21 = vmul.f32 0.2, %v1806_v17  ;;  %v591_v22 = vpop.f32.mrb[17].mxu0 }
 0x107   : > { %v719_v23 = vpop.f32.mrb[17].mxu1  ;;  %1738 = vst [vmem:[%s2020_s24 + $0xb8] sm:$0xff] %v1674_v14   ;;  %vm832_vm2 = vcmp.ge.f32.partialorder %v1838_v18, 0.0  ;;  %v896_v24 = vmul.f32 0.2, %v1838_v18  ;;  %v1807_v27 = vpop.f32.mrb[18].mxu0 }
 0x108   : > { %1721 = vst [vmem:[%s2020_s24 + $0x30] sm:$0xff] %v1589_v19   ;;  %1737 = vst [vmem:[%s2020_s24 + $0xb0] sm:$0xff] %v1669_v20   ;;  %v862_v25 = vmul.f32 0.2, %v591_v22  ;;  %v894_v26 = vmul.f32 0.2, %v719_v23  ;;  %v928_v29 = vsel %vm800_vm1, %v1806_v17, %v864_v21 }
 0x109   : > { %v1839_v28 = vpop.f32.mrb[18].mxu1  ;;  %vm798_vm3 = vcmp.ge.f32.partialorder %v591_v22, 0.0  ;;  %vm801_vm4 = vcmp.ge.f32.partialorder %v1807_v27, 0.0  ;;  %v865_v30 = vmul.f32 0.2, %v1807_v27  ;;  %v594_v31 = vpop.f32.mrb[19].mxu0  ;;  %v960_v37 = vsel %vm832_vm2, %v1838_v18, %v896_v24 }
 0x10a   : > { %v722_v32 = vpop.f32.mrb[19].mxu1  ;;  %vm830_vm5 = vcmp.ge.f32.partialorder %v719_v23, 0.0  ;;  %vm833_vm6 = vcmp.ge.f32.partialorder %v1839_v28, 0.0  ;;  %v897_v33 = vmul.f32 0.2, %v1839_v28  ;;  %vm799_vm7 = vcmp.ge.f32.partialorder %v594_v31, 0.0 }
 0x10b   : > { %v929_v34 = vsel %vm801_vm4, %v1807_v27, %v865_v30  ;;  %v863_v35 = vmul.f32 0.2, %v594_v31  ;;  %vm831_vm8 = vcmp.ge.f32.partialorder %v722_v32, 0.0  ;;  %v895_v36 = vmul.f32 0.2, %v722_v32 }
 0x10c   : > { %v926_v38 = vsel %vm798_vm3, %v591_v22, %v862_v25  ;;  %v1604_v39 = vpack.c.bf16 %v929_v34, %v928_v29  ;;  %v961_v40 = vsel %vm833_vm6, %v1839_v28, %v897_v33  ;;  %v958_v41 = vsel %vm830_vm5, %v719_v23, %v894_v26 }
 0x10d   : > { %v1684_v42 = vpack.c.bf16 %v961_v40, %v960_v37  ;;  %v927_v43 = vsel %vm799_vm7, %v594_v31, %v863_v35  ;;  %v959_v44 = vsel %vm831_vm8, %v722_v32, %v895_v36  ;;  %v1810_v45 = vpop.f32.mrb[20].mxu0 }
 0x10e   : > { %v1842_v46 = vpop.f32.mrb[20].mxu1  ;;  %1724 = vst [vmem:[%s2020_s24 + $0x48] sm:$0xff] %v1604_v39   ;;  %v1599_v47 = vpack.c.bf16 %v927_v43, %v926_v38  ;;  %v1679_v48 = vpack.c.bf16 %v959_v44, %v958_v41  ;;  %vm804_vm9 = vcmp.ge.f32.partialorder %v1810_v45, 0.0  ;;  %v868_v49 = vmul.f32 0.2, %v1810_v45  ;;  %v607_v50 = vpop.f32.mrb[21].mxu0 }
 0x10f   : > { %v735_v51 = vpop.f32.mrb[21].mxu1  ;;  %1740 = vst [vmem:[%s2020_s24 + $0xc8] sm:$0xff] %v1684_v42   ;;  %vm836_vm10 = vcmp.ge.f32.partialorder %v1842_v46, 0.0  ;;  %v900_v52 = vmul.f32 0.2, %v1842_v46  ;;  %v1811_v55 = vpop.f32.mrb[22].mxu0 }
 0x110   : > { %1723 = vst [vmem:[%s2020_s24 + $0x40] sm:$0xff] %v1599_v47   ;;  %1739 = vst [vmem:[%s2020_s24 + $0xc0] sm:$0xff] %v1679_v48   ;;  %v866_v53 = vmul.f32 0.2, %v607_v50  ;;  %v898_v54 = vmul.f32 0.2, %v735_v51  ;;  %v932_v57 = vsel %vm804_vm9, %v1810_v45, %v868_v49 }
 0x111   : > { %v1843_v56 = vpop.f32.mrb[22].mxu1  ;;  %vm802_vm11 = vcmp.ge.f32.partialorder %v607_v50, 0.0  ;;  %vm805_vm12 = vcmp.ge.f32.partialorder %v1811_v55, 0.0  ;;  %v869_v58 = vmul.f32 0.2, %v1811_v55  ;;  %v610_v59 = vpop.f32.mrb[23].mxu0  ;;  %v964_v1 = vsel %vm836_vm10, %v1842_v46, %v900_v52 }
 0x112   : > { %v738_v60 = vpop.f32.mrb[23].mxu1  ;;  %vm834_vm13 = vcmp.ge.f32.partialorder %v735_v51, 0.0  ;;  %vm837_vm14 = vcmp.ge.f32.partialorder %v1843_v56, 0.0  ;;  %v901_v61 = vmul.f32 0.2, %v1843_v56  ;;  %vm803_vm15 = vcmp.ge.f32.partialorder %v610_v59, 0.0 }
 0x113   : > { %v933_v62 = vsel %vm805_vm12, %v1811_v55, %v869_v58  ;;  %v867_v63 = vmul.f32 0.2, %v610_v59  ;;  %vm835_vm0 = vcmp.ge.f32.partialorder %v738_v60, 0.0  ;;  %v899_v0 = vmul.f32 0.2, %v738_v60 }
 0x114   : > { %v930_v2 = vsel %vm802_vm11, %v607_v50, %v866_v53  ;;  %v1614_v3 = vpack.c.bf16 %v933_v62, %v932_v57  ;;  %v965_v4 = vsel %vm837_vm14, %v1843_v56, %v901_v61  ;;  %v962_v5 = vsel %vm834_vm13, %v735_v51, %v898_v54 }
 0x115   : > { %v1694_v6 = vpack.c.bf16 %v965_v4, %v964_v1  ;;  %v931_v7 = vsel %vm803_vm15, %v610_v59, %v867_v63  ;;  %v963_v8 = vsel %vm835_vm0, %v738_v60, %v899_v0  ;;  %v1814_v9 = vpop.f32.mrb[24].mxu0 }
 0x116   : > { %v1846_v10 = vpop.f32.mrb[24].mxu1  ;;  %1726 = vst [vmem:[%s2020_s24 + $0x58] sm:$0xff] %v1614_v3   ;;  %v1609_v11 = vpack.c.bf16 %v931_v7, %v930_v2  ;;  %v1689_v12 = vpack.c.bf16 %v963_v8, %v962_v5  ;;  %vm808_vm1 = vcmp.ge.f32.partialorder %v1814_v9, 0.0  ;;  %v872_v13 = vmul.f32 0.2, %v1814_v9  ;;  %v623_v14 = vpop.f32.mrb[25].mxu0 }
 0x117   : > { %v751_v15 = vpop.f32.mrb[25].mxu1  ;;  %1742 = vst [vmem:[%s2020_s24 + $0xd8] sm:$0xff] %v1694_v6   ;;  %vm840_vm2 = vcmp.ge.f32.partialorder %v1846_v10, 0.0  ;;  %v904_v16 = vmul.f32 0.2, %v1846_v10  ;;  %v1815_v19 = vpop.f32.mrb[26].mxu0 }
 0x118   : > { %1725 = vst [vmem:[%s2020_s24 + $0x50] sm:$0xff] %v1609_v11   ;;  %1741 = vst [vmem:[%s2020_s24 + $0xd0] sm:$0xff] %v1689_v12   ;;  %v870_v17 = vmul.f32 0.2, %v623_v14  ;;  %v902_v18 = vmul.f32 0.2, %v751_v15  ;;  %v936_v21 = vsel %vm808_vm1, %v1814_v9, %v872_v13 }
 0x119   : > { %v1847_v20 = vpop.f32.mrb[26].mxu1  ;;  %vm806_vm3 = vcmp.ge.f32.partialorder %v623_v14, 0.0  ;;  %vm809_vm4 = vcmp.ge.f32.partialorder %v1815_v19, 0.0  ;;  %v873_v22 = vmul.f32 0.2, %v1815_v19  ;;  %v626_v23 = vpop.f32.mrb[27].mxu0  ;;  %v968_v29 = vsel %vm840_vm2, %v1846_v10, %v904_v16 }
 0x11a   : > { %v754_v24 = vpop.f32.mrb[27].mxu1  ;;  %vm838_vm5 = vcmp.ge.f32.partialorder %v751_v15, 0.0  ;;  %vm841_vm6 = vcmp.ge.f32.partialorder %v1847_v20, 0.0  ;;  %v905_v25 = vmul.f32 0.2, %v1847_v20  ;;  %vm807_vm7 = vcmp.ge.f32.partialorder %v626_v23, 0.0 }
 0x11b   : > { %v937_v26 = vsel %vm809_vm4, %v1815_v19, %v873_v22  ;;  %v871_v27 = vmul.f32 0.2, %v626_v23  ;;  %vm839_vm8 = vcmp.ge.f32.partialorder %v754_v24, 0.0  ;;  %v903_v28 = vmul.f32 0.2, %v754_v24 }
 0x11c   : > { %v934_v30 = vsel %vm806_vm3, %v623_v14, %v870_v17  ;;  %v1624_v31 = vpack.c.bf16 %v937_v26, %v936_v21  ;;  %v969_v32 = vsel %vm841_vm6, %v1847_v20, %v905_v25  ;;  %v966_v33 = vsel %vm838_vm5, %v751_v15, %v902_v18 }
 0x11d   : > { %v1704_v34 = vpack.c.bf16 %v969_v32, %v968_v29  ;;  %v935_v35 = vsel %vm807_vm7, %v626_v23, %v871_v27  ;;  %v967_v36 = vsel %vm839_vm8, %v754_v24, %v903_v28  ;;  %v1818_v37 = vpop.f32.mrb[28].mxu0 }
 0x11e   : > { %v1850_v38 = vpop.f32.mrb[28].mxu1  ;;  %1728 = vst [vmem:[%s2020_s24 + $0x68] sm:$0xff] %v1624_v31   ;;  %v1619_v39 = vpack.c.bf16 %v935_v35, %v934_v30  ;;  %v1699_v40 = vpack.c.bf16 %v967_v36, %v966_v33  ;;  %vm812_vm9 = vcmp.ge.f32.partialorder %v1818_v37, 0.0  ;;  %v876_v41 = vmul.f32 0.2, %v1818_v37  ;;  %v639_v42 = vpop.f32.mrb[29].mxu0 }
 0x11f   : > { %v767_v43 = vpop.f32.mrb[29].mxu1  ;;  %1744 = vst [vmem:[%s2020_s24 + $0xe8] sm:$0xff] %v1704_v34   ;;  %vm844_vm10 = vcmp.ge.f32.partialorder %v1850_v38, 0.0  ;;  %v908_v44 = vmul.f32 0.2, %v1850_v38  ;;  %v1819_v47 = vpop.f32.mrb[30].mxu0 }
 0x120   : > { %1727 = vst [vmem:[%s2020_s24 + $0x60] sm:$0xff] %v1619_v39   ;;  %1743 = vst [vmem:[%s2020_s24 + $0xe0] sm:$0xff] %v1699_v40   ;;  %v874_v45 = vmul.f32 0.2, %v639_v42  ;;  %v906_v46 = vmul.f32 0.2, %v767_v43  ;;  %v940_v49 = vsel %vm812_vm9, %v1818_v37, %v876_v41 }
 0x121   : > { %v1851_v48 = vpop.f32.mrb[30].mxu1  ;;  %vm810_vm11 = vcmp.ge.f32.partialorder %v639_v42, 0.0  ;;  %vm813_vm12 = vcmp.ge.f32.partialorder %v1819_v47, 0.0  ;;  %v877_v50 = vmul.f32 0.2, %v1819_v47  ;;  %v642_v51 = vpop.f32.mrb[31].mxu0  ;;  %v972_v57 = vsel %vm844_vm10, %v1850_v38, %v908_v44 }
 0x122   : > { %v770_v52 = vpop.f32.mrb[31].mxu1  ;;  %vm842_vm13 = vcmp.ge.f32.partialorder %v767_v43, 0.0  ;;  %vm845_vm14 = vcmp.ge.f32.partialorder %v1851_v48, 0.0  ;;  %v909_v53 = vmul.f32 0.2, %v1851_v48  ;;  %vm811_vm15 = vcmp.ge.f32.partialorder %v642_v51, 0.0 }
 0x123   : > { %v941_v54 = vsel %vm813_vm12, %v1819_v47, %v877_v50  ;;  %v875_v55 = vmul.f32 0.2, %v642_v51  ;;  %vm843_vm0 = vcmp.ge.f32.partialorder %v770_v52, 0.0  ;;  %v907_v56 = vmul.f32 0.2, %v770_v52 }
 0x124   : > { %v938_v58 = vsel %vm810_vm11, %v639_v42, %v874_v45  ;;  %v1634_v59 = vpack.c.bf16 %v941_v54, %v940_v49  ;;  %v973_v60 = vsel %vm845_vm14, %v1851_v48, %v909_v53  ;;  %v970_v61 = vsel %vm842_vm13, %v767_v43, %v906_v46 }
 0x125   : > { %v1714_v62 = vpack.c.bf16 %v973_v60, %v972_v57  ;;  %v939_v63 = vsel %vm811_vm15, %v642_v51, %v875_v55  ;;  %v971_v0 = vsel %vm843_vm0, %v770_v52, %v907_v56 }
 0x126   : > { %1730 = vst [vmem:[%s2020_s24 + $0x78] sm:$0xff] %v1634_v59   ;;  %v1629_v1 = vpack.c.bf16 %v939_v63, %v938_v58  ;;  %v1709_v2 = vpack.c.bf16 %v971_v0, %v970_v61 }
 0x127   : > { %1746 = vst [vmem:[%s2020_s24 + $0xf8] sm:$0xff] %v1714_v62  }
 0x128   : > { %1729 = vst [vmem:[%s2020_s24 + $0x70] sm:$0xff] %v1629_v1   ;;  %1745 = vst [vmem:[%s2020_s24 + $0xf0] sm:$0xff] %v1709_v2  }
 0x129 PF: > { %s12_s9 = sadd.s32 1, %s1907_s9  }
 0x12a   : > { %p9_p4 = scmp.ge.s32.totalorder %s12_s9, 6  }
 0x12c   :  { %11 = sbr.rel (!%p9_p4) target bundleno = 1 (0x1), region = 58 }

// kernel: discriminator_forward.5
= control target key start
LH: loop header
LB: loop body
LE: loop exit
PB: predicated region body
PF: predicated region fallthrough
CT: control target
= control target key end

     0   :  { %s3774_s1 = inlined_call_operand.vmem [shape: bf16[128,128], index: 1, kind: input, shape index: {}]   ;;  %s3775_s0 = inlined_call_operand.vmem [shape: bf16[512,128], index: 0, kind: input, shape index: {}]   ;;  %s3776_s2 = inlined_call_operand.vmem [shape: f32[1,128], index: 2, kind: input, shape index: {}]   ;;  %s3777_s3 = inlined_call_operand.vmem [shape: f32[1,128], index: 3, kind: input, shape index: {}]   ;;  %s3778_s4 = inlined_call_operand.vmem [shape: bf16[512,128], index: 4, kind: output, shape index: {}]  }
   0x1   :  { %v1992_v0 = vld [vmem:[%s3774_s1] sm:$0xff]   ;;  %v1993_v1 = vld [vmem:[%s3774_s1 + $0x8] sm:$0xff]   ;;  %v1994_v2 = vld [vmem:[%s3774_s1 + $0x10] sm:$0xff]  }
   0x2   :  { %1896 = vmatprep.subr.bf16.mxu0 %v1992_v0  ;;  %1976 = vmatprep.subr.bf16.mxu1 %v1992_v0  ;;  %v1995_v3 = vld [vmem:[%s3774_s1 + $0x18] sm:$0xff]   ;;  %v2000_v4 = vld [vmem:[%s3775_s0] sm:$0xff]   ;;  %v1997_v6 = vld [vmem:[%s3774_s1 + $0x28] sm:$0xff]  }
   0x3   :  { %1897 = vmatpush3.bf16.msra.mxu0 %v1992_v0  ;;  %1984 = vmatpush3.bf16.msra.mxu1 %v1992_v0  ;;  %v1996_v5 = vld [vmem:[%s3774_s1 + $0x20] sm:$0xff]   ;;  %v1998_v7 = vld [vmem:[%s3774_s1 + $0x30] sm:$0xff]   ;;  %v1999_v8 = vld [vmem:[%s3774_s1 + $0x38] sm:$0xff]  }
   0x4   :  { %1898 = vmatprep.subr.bf16.mxu0 %v1993_v1  ;;  %1977 = vmatprep.subr.bf16.mxu1 %v1993_v1  ;;  %v2016_v9 = vld [vmem:[%s3775_s0 + $0x80] sm:$0xff]   ;;  %v2001_v10 = vld [vmem:[%s3775_s0 + $0x8] sm:$0xff]   ;;  %v2002_v11 = vld [vmem:[%s3775_s0 + $0x10] sm:$0xff]  }
   0x5   :  { %1912 = vmatprep.mubr.bf16.mxu0 %v2000_v4  ;;  %1944 = vmatprep.mubr.bf16.mxu1 %v2016_v9  ;;  %v2017_v12 = vld [vmem:[%s3775_s0 + $0x88] sm:$0xff]   ;;  %v2018_v13 = vld [vmem:[%s3775_s0 + $0x90] sm:$0xff]   ;;  %v2003_v14 = vld [vmem:[%s3775_s0 + $0x18] sm:$0xff]  }
   0x6   :  { %v2004_v15 = vld [vmem:[%s3775_s0 + $0x20] sm:$0xff]   ;;  %v2019_v16 = vld [vmem:[%s3775_s0 + $0x98] sm:$0xff]   ;;  %v2005_v18 = vld [vmem:[%s3775_s0 + $0x28] sm:$0xff]  }
   0x7   :  { %1899 = vmatpush3.bf16.msra.mxu0 %v1993_v1  ;;  %1985 = vmatpush3.bf16.msra.mxu1 %v1993_v1  ;;  %v2020_v17 = vld [vmem:[%s3775_s0 + $0xa0] sm:$0xff]   ;;  %v2021_v19 = vld [vmem:[%s3775_s0 + $0xa8] sm:$0xff]   ;;  %v2006_v20 = vld [vmem:[%s3775_s0 + $0x30] sm:$0xff]  }
   0x8   :  { %1900 = vmatprep.subr.bf16.mxu0 %v1994_v2  ;;  %1978 = vmatprep.subr.bf16.mxu1 %v1994_v2  ;;  %v2022_v21 = vld [vmem:[%s3775_s0 + $0xb0] sm:$0xff]   ;;  %v2007_v22 = vld [vmem:[%s3775_s0 + $0x38] sm:$0xff]   ;;  %v2008_v24 = vld [vmem:[%s3775_s0 + $0x40] sm:$0xff]  }
   0x9   :  { %v2023_v23 = vld [vmem:[%s3775_s0 + $0xb8] sm:$0xff]   ;;  %v2024_v25 = vld [vmem:[%s3775_s0 + $0xc0] sm:$0xff]   ;;  %v2009_v26 = vld [vmem:[%s3775_s0 + $0x48] sm:$0xff]  }
   0xa   :  { %v2025_v27 = vld [vmem:[%s3775_s0 + $0xc8] sm:$0xff]   ;;  %v2010_v28 = vld [vmem:[%s3775_s0 + $0x50] sm:$0xff]   ;;  %v2011_v30 = vld [vmem:[%s3775_s0 + $0x58] sm:$0xff]  }
   0xb   :  { %1901 = vmatpush3.bf16.msra.mxu0 %v1994_v2  ;;  %1986 = vmatpush3.bf16.msra.mxu1 %v1994_v2  ;;  %v2026_v29 = vld [vmem:[%s3775_s0 + $0xd0] sm:$0xff]   ;;  %v2027_v31 = vld [vmem:[%s3775_s0 + $0xd8] sm:$0xff]   ;;  %v2012_v32 = vld [vmem:[%s3775_s0 + $0x60] sm:$0xff]  }
   0xc   :  { %1902 = vmatprep.subr.bf16.mxu0 %v1995_v3  ;;  %1979 = vmatprep.subr.bf16.mxu1 %v1995_v3  ;;  %v2028_v33 = vld [vmem:[%s3775_s0 + $0xe0] sm:$0xff]   ;;  %v2013_v34 = vld [vmem:[%s3775_s0 + $0x68] sm:$0xff]   ;;  %v2014_v36 = vld [vmem:[%s3775_s0 + $0x70] sm:$0xff]  }
   0xd   :  { %v2029_v35 = vld [vmem:[%s3775_s0 + $0xe8] sm:$0xff]   ;;  %v2030_v37 = vld [vmem:[%s3775_s0 + $0xf0] sm:$0xff]   ;;  %v2015_v38 = vld [vmem:[%s3775_s0 + $0x78] sm:$0xff]  }
   0xe   :  { %v2031_v39 = vld [vmem:[%s3775_s0 + $0xf8] sm:$0xff]  }
   0xf   :  { %1903 = vmatpush3.bf16.msra.mxu0 %v1995_v3  ;;  %1987 = vmatpush3.bf16.msra.mxu1 %v1995_v3 }
  0x10   :  { %1904 = vmatprep.subr.bf16.mxu0 %v1996_v5  ;;  %1980 = vmatprep.subr.bf16.mxu1 %v1996_v5 }
  0x13   :  { %1905 = vmatpush3.bf16.msra.mxu0 %v1996_v5  ;;  %1988 = vmatpush3.bf16.msra.mxu1 %v1996_v5 }
  0x14   :  { %1906 = vmatprep.subr.bf16.mxu0 %v1997_v6  ;;  %1981 = vmatprep.subr.bf16.mxu1 %v1997_v6 }
  0x17   :  { %1907 = vmatpush3.bf16.msra.mxu0 %v1997_v6  ;;  %1989 = vmatpush3.bf16.msra.mxu1 %v1997_v6 }
  0x18   :  { %1908 = vmatprep.subr.bf16.mxu0 %v1998_v7  ;;  %1982 = vmatprep.subr.bf16.mxu1 %v1998_v7 }
  0x1b   :  { %1909 = vmatpush3.bf16.msra.mxu0 %v1998_v7  ;;  %1990 = vmatpush3.bf16.msra.mxu1 %v1998_v7 }
  0x1c   :  { %1910 = vmatprep.subr.bf16.mxu0 %v1999_v8  ;;  %1983 = vmatprep.subr.bf16.mxu1 %v1999_v8 }
  0x1f   :  { %1911 = vmatpush3.bf16.msra.mxu0 %v1999_v8  ;;  %1991 = vmatpush3.bf16.msra.mxu1 %v1999_v8 }
  0x22   :  { %1913 = vmatmul.mubr.bf16.vlgmr.msra.gmra.mrb[0].mxu0 %v2001_v10  ;;  %1945 = vmatmul.mubr.bf16.vlgmr.msra.gmra.mrb[0].mxu1 %v2017_v12 }
  0x23   :  { %1916 = vmatprep.mubr.bf16.mxu0 %v2002_v11  ;;  %1948 = vmatprep.mubr.bf16.mxu1 %v2018_v13 }
  0x2a   :  { %1917 = vmatmul.mubr.bf16.gmra.mrb[4].mxu0 %v2003_v14  ;;  %1949 = vmatmul.mubr.bf16.gmra.mrb[4].mxu1 %v2019_v16 }
  0x2b   :  { %1920 = vmatprep.mubr.bf16.mxu0 %v2004_v15  ;;  %1952 = vmatprep.mubr.bf16.mxu1 %v2020_v17 }
  0x32   :  { %1921 = vmatmul.mubr.bf16.gmra.mrb[8].mxu0 %v2005_v18  ;;  %1953 = vmatmul.mubr.bf16.gmra.mrb[8].mxu1 %v2021_v19 }
  0x33   :  { %1924 = vmatprep.mubr.bf16.mxu0 %v2006_v20  ;;  %1956 = vmatprep.mubr.bf16.mxu1 %v2022_v21 }
  0x3a   :  { %1925 = vmatmul.mubr.bf16.gmra.mrb[12].mxu0 %v2007_v22  ;;  %1957 = vmatmul.mubr.bf16.gmra.mrb[12].mxu1 %v2023_v23 }
  0x3b   :  { %1928 = vmatprep.mubr.bf16.mxu0 %v2008_v24  ;;  %1960 = vmatprep.mubr.bf16.mxu1 %v2024_v25 }
  0x42   :  { %1929 = vmatmul.mubr.bf16.gmra.mrb[16].mxu0 %v2009_v26  ;;  %1961 = vmatmul.mubr.bf16.gmra.mrb[16].mxu1 %v2025_v27 }
  0x43   :  { %1932 = vmatprep.mubr.bf16.mxu0 %v2010_v28  ;;  %1964 = vmatprep.mubr.bf16.mxu1 %v2026_v29 }
  0x4a   :  { %1933 = vmatmul.mubr.bf16.gmra.mrb[20].mxu0 %v2011_v30  ;;  %1965 = vmatmul.mubr.bf16.gmra.mrb[20].mxu1 %v2027_v31 }
  0x4b   :  { %1936 = vmatprep.mubr.bf16.mxu0 %v2012_v32  ;;  %1968 = vmatprep.mubr.bf16.mxu1 %v2028_v33 }
  0x52   :  { %1937 = vmatmul.mubr.bf16.gmra.mrb[24].mxu0 %v2013_v34  ;;  %1969 = vmatmul.mubr.bf16.gmra.mrb[24].mxu1 %v2029_v35 }
  0x53   :  { %1940 = vmatprep.mubr.bf16.mxu0 %v2014_v36  ;;  %1972 = vmatprep.mubr.bf16.mxu1 %v2030_v37 }
  0x5a   :  { %1941 = vmatmul.mubr.bf16.gmra.mrb[28].mxu0 %v2015_v38  ;;  %1973 = vmatmul.mubr.bf16.gmra.mrb[28].mxu1 %v2031_v39 }
  0xf5   :  { %v2179_v40 = vpop.f32.mrb[0].mxu0  ;;  %v2181_v41 = vpop.f32.mrb[0].mxu1 }
  0xf6   :  { %v2183_v42 = vpop.f32.mrb[1].mxu0  ;;  %v2185_v43 = vpop.f32.mrb[1].mxu1  ;;  %v699_v51 = vmul.f32 %v2179_v40, %v2179_v40 }
  0xf7   :  { %v2187_v44 = vpop.f32.mrb[2].mxu0  ;;  %v2189_v45 = vpop.f32.mrb[2].mxu1  ;;  %v697_v48 = vmul.f32 %v2183_v42, %v2183_v42 }
  0xf8   :  { %v2191_v46 = vpop.f32.mrb[3].mxu0  ;;  %v2193_v47 = vpop.f32.mrb[3].mxu1  ;;  %v700_v54 = vmul.f32 %v2187_v44, %v2187_v44 }
  0xf9   :  { %v627_v49 = vadd.f32 %v2191_v46, %v2183_v42  ;;  %v698_v50 = vmul.f32 %v2191_v46, %v2191_v46 }
  0xfb   :  { %v628_v52 = vadd.f32 %v2179_v40, %v627_v49  ;;  %v761_v53 = vadd.f32 %v698_v50, %v697_v48 }
  0xfd   :  { %v762_v55 = vadd.f32 %v761_v53, %v699_v51  ;;  %v2206_v56 = vpop.f32.mrb[4].mxu0  ;;  %v629_v57 = vadd.f32 %v2187_v44, %v628_v52  ;;  %v2209_v58 = vpop.f32.mrb[4].mxu1 }
  0xfe   :  { %v2211_v59 = vpop.f32.mrb[5].mxu0  ;;  %v2213_v60 = vpop.f32.mrb[5].mxu1  ;;  %v703_v7 = vmul.f32 %v2206_v56, %v2206_v56 }
  0xff   :  { %v630_v61 = vadd.f32 %v629_v57, %v2211_v59  ;;  %v701_v62 = vmul.f32 %v2211_v59, %v2211_v59  ;;  %v763_v63 = vadd.f32 %v762_v55, %v700_v54  ;;  %v2218_v0 = vpop.f32.mrb[6].mxu0  ;;  %v2220_v1 = vpop.f32.mrb[6].mxu1 }
 0x100   :  { %v2222_v2 = vpop.f32.mrb[7].mxu0  ;;  %v2224_v3 = vpop.f32.mrb[7].mxu1  ;;  %v704_v10 = vmul.f32 %v2218_v0, %v2218_v0 }
 0x101   :  { %v764_v4 = vadd.f32 %v763_v63, %v701_v62  ;;  %v631_v5 = vadd.f32 %v630_v61, %v2222_v2  ;;  %v702_v6 = vmul.f32 %v2222_v2, %v2222_v2 }
 0x103   :  { %v632_v8 = vadd.f32 %v2206_v56, %v631_v5  ;;  %v765_v9 = vadd.f32 %v764_v4, %v702_v6 }
 0x105   :  { %v766_v11 = vadd.f32 %v765_v9, %v703_v7  ;;  %v2234_v12 = vpop.f32.mrb[8].mxu0  ;;  %v633_v13 = vadd.f32 %v2218_v0, %v632_v8  ;;  %v2237_v14 = vpop.f32.mrb[8].mxu1 }
 0x106   :  { %v2239_v15 = vpop.f32.mrb[9].mxu0  ;;  %v2241_v16 = vpop.f32.mrb[9].mxu1  ;;  %v707_v27 = vmul.f32 %v2234_v12, %v2234_v12 }
 0x107   :  { %v634_v17 = vadd.f32 %v633_v13, %v2239_v15  ;;  %v705_v18 = vmul.f32 %v2239_v15, %v2239_v15  ;;  %v767_v19 = vadd.f32 %v766_v11, %v704_v10  ;;  %v2246_v20 = vpop.f32.mrb[10].mxu0  ;;  %v2248_v21 = vpop.f32.mrb[10].mxu1 }
 0x108   :  { %v2250_v22 = vpop.f32.mrb[11].mxu0  ;;  %v2252_v23 = vpop.f32.mrb[11].mxu1  ;;  %v708_v30 = vmul.f32 %v2246_v20, %v2246_v20 }
 0x109   :  { %v768_v24 = vadd.f32 %v767_v19, %v705_v18  ;;  %v635_v25 = vadd.f32 %v634_v17, %v2250_v22  ;;  %v706_v26 = vmul.f32 %v2250_v22, %v2250_v22 }
 0x10b   :  { %v636_v28 = vadd.f32 %v2234_v12, %v635_v25  ;;  %v769_v29 = vadd.f32 %v768_v24, %v706_v26 }
 0x10d   :  { %v770_v31 = vadd.f32 %v769_v29, %v707_v27  ;;  %v2262_v32 = vpop.f32.mrb[12].mxu0  ;;  %v637_v33 = vadd.f32 %v2246_v20, %v636_v28  ;;  %v2265_v34 = vpop.f32.mrb[12].mxu1 }
 0x10e   :  { %v2267_v35 = vpop.f32.mrb[13].mxu0  ;;  %v2269_v36 = vpop.f32.mrb[13].mxu1  ;;  %v711_v55 = vmul.f32 %v2262_v32, %v2262_v32 }
 0x10f   :  { %v638_v37 = vadd.f32 %v637_v33, %v2267_v35  ;;  %v709_v38 = vmul.f32 %v2267_v35, %v2267_v35  ;;  %v771_v39 = vadd.f32 %v770_v31, %v708_v30  ;;  %v2274_v48 = vpop.f32.mrb[14].mxu0  ;;  %v2276_v49 = vpop.f32.mrb[14].mxu1 }
 0x110   :  { %3834 = vst [vmem:[#allocation2_spill] sm:$0xff] %v2274_v48  ;;  %v2278_v50 = vpop.f32.mrb[15].mxu0  ;;  %v2280_v51 = vpop.f32.mrb[15].mxu1  ;;  %v712_v62 = vmul.f32 %v2274_v48, %v2274_v48 }
 0x111   :  { %v772_v52 = vadd.f32 %v771_v39, %v709_v38  ;;  %v639_v53 = vadd.f32 %v638_v37, %v2278_v50  ;;  %v710_v54 = vmul.f32 %v2278_v50, %v2278_v50 }
 0x113   :  { %v640_v57 = vadd.f32 %v2262_v32, %v639_v53  ;;  %v773_v61 = vadd.f32 %v772_v52, %v710_v54 }
 0x115   :  { %v774_v63 = vadd.f32 %v773_v61, %v711_v55  ;;  %v2290_v4 = vpop.f32.mrb[16].mxu0  ;;  %v641_v5 = vadd.f32 %v2274_v48, %v640_v57  ;;  %v2293_v6 = vpop.f32.mrb[16].mxu1  ;;  %v730_v48 = vmul.f32 %v2193_v47, %v2193_v47 }
 0x116   :  { %3835 = vst [vmem:[#allocation3_spill] sm:$0xff] %v2290_v4  ;;  %v2295_v7 = vpop.f32.mrb[17].mxu0  ;;  %v2297_v8 = vpop.f32.mrb[17].mxu1  ;;  %v715_v27 = vmul.f32 %v2290_v4, %v2290_v4 }
 0x117   :  { %3836 = vst [vmem:[#allocation4_spill] sm:$0xff] %v2295_v7  ;;  %v642_v9 = vadd.f32 %v641_v5, %v2295_v7  ;;  %v713_v10 = vmul.f32 %v2295_v7, %v2295_v7  ;;  %v775_v11 = vadd.f32 %v774_v63, %v712_v62  ;;  %v2302_v13 = vpop.f32.mrb[18].mxu0  ;;  %v2304_v17 = vpop.f32.mrb[18].mxu1 }
 0x118   :  { %3837 = vst [vmem:[#allocation5_spill] sm:$0xff] %v2302_v13  ;;  %v2306_v18 = vpop.f32.mrb[19].mxu0  ;;  %v2308_v19 = vpop.f32.mrb[19].mxu1  ;;  %v716_v30 = vmul.f32 %v2302_v13, %v2302_v13 }
 0x119   :  { %3838 = vst [vmem:[#allocation6_spill] sm:$0xff] %v2306_v18  ;;  %v776_v24 = vadd.f32 %v775_v11, %v713_v10  ;;  %v643_v25 = vadd.f32 %v642_v9, %v2306_v18  ;;  %v714_v26 = vmul.f32 %v2306_v18, %v2306_v18 }
 0x11b   :  { %v644_v28 = vadd.f32 %v2290_v4, %v643_v25  ;;  %v777_v29 = vadd.f32 %v776_v24, %v714_v26 }
 0x11d   :  { %v778_v31 = vadd.f32 %v777_v29, %v715_v27  ;;  %v2318_v33 = vpop.f32.mrb[20].mxu0  ;;  %v645_v37 = vadd.f32 %v2302_v13, %v644_v28  ;;  %v2321_v38 = vpop.f32.mrb[20].mxu1 }
 0x11e   :  { %3839 = vst [vmem:[#allocation7_spill] sm:$0xff] %v2318_v33  ;;  %3840 = vst [vmem:[#allocation8_spill] sm:$0xff] %v2321_v38  ;;  %v2323_v39 = vpop.f32.mrb[21].mxu0  ;;  %v2325_v52 = vpop.f32.mrb[21].mxu1  ;;  %v719_v11 = vmul.f32 %v2318_v33, %v2318_v33 }
 0x11f   :  { %3841 = vst [vmem:[#allocation9_spill] sm:$0xff] %v2323_v39  ;;  %v646_v53 = vadd.f32 %v645_v37, %v2323_v39  ;;  %v717_v54 = vmul.f32 %v2323_v39, %v2323_v39  ;;  %v779_v55 = vadd.f32 %v778_v31, %v716_v30  ;;  %v2330_v57 = vpop.f32.mrb[22].mxu0  ;;  %v2332_v61 = vpop.f32.mrb[22].mxu1 }
 0x120   :  { %3842 = vst [vmem:[#allocation10_spill] sm:$0xff] %v2330_v57  ;;  %3843 = vst [vmem:[#allocation11_spill] sm:$0xff] %v2332_v61  ;;  %v2334_v62 = vpop.f32.mrb[23].mxu0  ;;  %v2336_v63 = vpop.f32.mrb[23].mxu1  ;;  %v720_v26 = vmul.f32 %v2330_v57, %v2330_v57 }
 0x121   :  { %3844 = vst [vmem:[#allocation12_spill] sm:$0xff] %v2334_v62  ;;  %v780_v5 = vadd.f32 %v779_v55, %v717_v54  ;;  %v647_v9 = vadd.f32 %v646_v53, %v2334_v62  ;;  %v718_v10 = vmul.f32 %v2334_v62, %v2334_v62 }
 0x123   :  { %v648_v24 = vadd.f32 %v2318_v33, %v647_v9  ;;  %v781_v25 = vadd.f32 %v780_v5, %v718_v10 }
 0x125   :  { %v782_v27 = vadd.f32 %v781_v25, %v719_v11  ;;  %v2346_v28 = vpop.f32.mrb[24].mxu0  ;;  %v649_v29 = vadd.f32 %v2330_v57, %v648_v24  ;;  %v2349_v30 = vpop.f32.mrb[24].mxu1 }
 0x126   :  { %3845 = vst [vmem:[#allocation13_spill] sm:$0xff] %v2346_v28  ;;  %3846 = vst [vmem:[#allocation14_spill] sm:$0xff] %v2349_v30  ;;  %v2351_v31 = vpop.f32.mrb[25].mxu0  ;;  %v2353_v37 = vpop.f32.mrb[25].mxu1 }
 0x127   :  { %3847 = vst [vmem:[#allocation15_spill] sm:$0xff] %v2351_v31  ;;  %3848 = vst [vmem:[#allocation16_spill] sm:$0xff] %v2353_v37  ;;  %v650_v53 = vadd.f32 %v649_v29, %v2351_v31  ;;  %v721_v54 = vmul.f32 %v2351_v31, %v2351_v31  ;;  %v783_v55 = vadd.f32 %v782_v27, %v720_v26  ;;  %v2358_v5 = vpop.f32.mrb[26].mxu0  ;;  %v2360_v9 = vpop.f32.mrb[26].mxu1 }
 0x128   :  { %3849 = vst [vmem:[#allocation17_spill] sm:$0xff] %v2358_v5  ;;  %3850 = vst [vmem:[#allocation18_spill] sm:$0xff] %v2360_v9  ;;  %v2362_v10 = vpop.f32.mrb[27].mxu0  ;;  %v2364_v11 = vpop.f32.mrb[27].mxu1  ;;  %v723_v29 = vmul.f32 %v2346_v28, %v2346_v28  ;;  %v724_v27 = vmul.f32 %v2358_v5, %v2358_v5 }
 0x129   :  { %3851 = vst [vmem:[#allocation19_spill] sm:$0xff] %v2362_v10  ;;  %3852 = vst [vmem:[#allocation20_spill] sm:$0xff] %v2364_v11  ;;  %v784_v24 = vadd.f32 %v783_v55, %v721_v54  ;;  %v651_v25 = vadd.f32 %v650_v53, %v2362_v10  ;;  %v722_v57 = vmul.f32 %v2362_v10, %v2362_v10 }
 0x12b   :  { %v652_v31 = vadd.f32 %v2346_v28, %v651_v25  ;;  %v785_v26 = vadd.f32 %v784_v24, %v722_v57 }
 0x12d   :  { %v786_v33 = vadd.f32 %v785_v26, %v723_v29  ;;  %v2374_v62 = vpop.f32.mrb[28].mxu0  ;;  %v653_v39 = vadd.f32 %v2358_v5, %v652_v31  ;;  %v2377_v54 = vpop.f32.mrb[28].mxu1 }
 0x12e   :  { %3853 = vst [vmem:[#allocation21_spill] sm:$0xff] %v2377_v54  ;;  %v2379_v53 = vpop.f32.mrb[29].mxu0  ;;  %v2381_v55 = vpop.f32.mrb[29].mxu1 }
 0x12f   :  { %3854 = vst [vmem:[#allocation22_spill] sm:$0xff] %v2379_v53  ;;  %3855 = vst [vmem:[#allocation23_spill] sm:$0xff] %v2381_v55  ;;  %v654_v10 = vadd.f32 %v653_v39, %v2379_v53  ;;  %v725_v25 = vmul.f32 %v2379_v53, %v2379_v53  ;;  %v787_v57 = vadd.f32 %v786_v33, %v724_v27  ;;  %v2386_v24 = vpop.f32.mrb[30].mxu0  ;;  %v2388_v28 = vpop.f32.mrb[30].mxu1 }
 0x130   :  { %v2390_v29 = vpop.f32.mrb[31].mxu0  ;;  %v2392_v26 = vpop.f32.mrb[31].mxu1  ;;  %v727_v39 = vmul.f32 %v2374_v62, %v2374_v62  ;;  %v728_v27 = vmul.f32 %v2386_v24, %v2386_v24 }
 0x131   :  { %3856 = vst [vmem:[#allocation24_spill] sm:$0xff] %v2390_v29  ;;  %3857 = vst [vmem:[#allocation25_spill] sm:$0xff] %v2392_v26  ;;  %v788_v31 = vadd.f32 %v787_v57, %v725_v25  ;;  %v655_v5 = vadd.f32 %v654_v10, %v2390_v29  ;;  %v726_v13 = vmul.f32 %v2390_v29, %v2390_v29 }
 0x132   :  { %v729_v25 = vmul.f32 %v2185_v43, %v2185_v43 }
 0x133   :  { %v656_v53 = vadd.f32 %v2374_v62, %v655_v5  ;;  %v789_v33 = vadd.f32 %v788_v31, %v726_v13  ;;  %v731_v13 = vmul.f32 %v2181_v41, %v2181_v41 }
 0x135   :  { %v790_v4 = vadd.f32 %v789_v33, %v727_v39  ;;  %v657_v18 = vadd.f32 %v2386_v24, %v656_v53  ;;  %v732_v53 = vmul.f32 %v2189_v45, %v2189_v45 }
 0x137   :  { %v658_v10 = vadd.f32 %v657_v18, %v2185_v43  ;;  %v791_v57 = vadd.f32 %v790_v4, %v728_v27  ;;  %v733_v4 = vmul.f32 %v2213_v60, %v2213_v60 }
 0x139   :  { %v792_v7 = vadd.f32 %v791_v57, %v729_v25  ;;  %v659_v29 = vadd.f32 %v658_v10, %v2193_v47  ;;  %v734_v57 = vmul.f32 %v2224_v3, %v2224_v3 }
 0x13b   :  { %v660_v5 = vadd.f32 %v2181_v41, %v659_v29  ;;  %v793_v31 = vadd.f32 %v792_v7, %v730_v48  ;;  %v735_v48 = vmul.f32 %v2209_v58, %v2209_v58 }
 0x13d   :  { %v794_v39 = vadd.f32 %v793_v31, %v731_v13  ;;  %v661_v33 = vadd.f32 %v2189_v45, %v660_v5  ;;  %v736_v13 = vmul.f32 %v2220_v1, %v2220_v1 }
 0x13f   :  { %v662_v18 = vadd.f32 %v661_v33, %v2213_v60  ;;  %v795_v27 = vadd.f32 %v794_v39, %v732_v53  ;;  %v737_v53 = vmul.f32 %v2241_v16, %v2241_v16 }
 0x141   :  { %v796_v25 = vadd.f32 %v795_v27, %v733_v4  ;;  %v663_v10 = vadd.f32 %v662_v18, %v2224_v3  ;;  %v738_v27 = vmul.f32 %v2252_v23, %v2252_v23 }
 0x143   :  { %v664_v7 = vadd.f32 %v2209_v58, %v663_v10  ;;  %v797_v29 = vadd.f32 %v796_v25, %v734_v57  ;;  %v739_v25 = vmul.f32 %v2237_v14, %v2237_v14 }
 0x145   :  { %v798_v5 = vadd.f32 %v797_v29, %v735_v48  ;;  %v665_v31 = vadd.f32 %v2220_v1, %v664_v7  ;;  %v740_v48 = vmul.f32 %v2248_v21, %v2248_v21 }
 0x147   :  { %v666_v39 = vadd.f32 %v665_v31, %v2241_v16  ;;  %v799_v33 = vadd.f32 %v798_v5, %v736_v13  ;;  %v741_v13 = vmul.f32 %v2269_v36, %v2269_v36 }
 0x149   :  { %v800_v4 = vadd.f32 %v799_v33, %v737_v53  ;;  %v667_v18 = vadd.f32 %v666_v39, %v2252_v23  ;;  %v742_v33 = vmul.f32 %v2280_v51, %v2280_v51 }
 0x14b   :  { %v668_v10 = vadd.f32 %v2237_v14, %v667_v18  ;;  %v801_v57 = vadd.f32 %v800_v4, %v738_v27  ;;  %v743_v4 = vmul.f32 %v2265_v34, %v2265_v34 }
 0x14d   :  { %v802_v7 = vadd.f32 %v801_v57, %v739_v25  ;;  %v669_v29 = vadd.f32 %v2248_v21, %v668_v10  ;;  %v744_v25 = vmul.f32 %v2276_v49, %v2276_v49 }
 0x14f   :  { %v670_v5 = vadd.f32 %v669_v29, %v2269_v36  ;;  %v803_v31 = vadd.f32 %v802_v7, %v740_v48  ;;  %v745_v48 = vmul.f32 %v2297_v8, %v2297_v8 }
 0x151   :  { %v804_v53 = vadd.f32 %v803_v31, %v741_v13  ;;  %v671_v39 = vadd.f32 %v670_v5, %v2280_v51  ;;  %v746_v31 = vmul.f32 %v2308_v19, %v2308_v19 }
 0x153   :  { %v672_v18 = vadd.f32 %v2265_v34, %v671_v39  ;;  %v805_v27 = vadd.f32 %v804_v53, %v742_v33  ;;  %v747_v53 = vmul.f32 %v2293_v6, %v2293_v6 }
 0x155   :  { %v806_v10 = vadd.f32 %v805_v27, %v743_v4  ;;  %v673_v57 = vadd.f32 %v2276_v49, %v672_v18  ;;  %v748_v4 = vmul.f32 %v2304_v17, %v2304_v17 }
 0x157   :  { %v674_v7 = vadd.f32 %v673_v57, %v2297_v8  ;;  %v807_v29 = vadd.f32 %v806_v10, %v744_v25  ;;  %v749_v25 = vmul.f32 %v2325_v52, %v2325_v52 }
 0x159   :  { %v808_v13 = vadd.f32 %v807_v29, %v745_v48  ;;  %v675_v5 = vadd.f32 %v674_v7, %v2308_v19  ;;  %v750_v29 = vmul.f32 %v2336_v63, %v2336_v63 }
 0x15b   :  { %v676_v39 = vadd.f32 %v2293_v6, %v675_v5  ;;  %v809_v33 = vadd.f32 %v808_v13, %v746_v31  ;;  %v751_v13 = vmul.f32 %v2321_v38, %v2321_v38 }
 0x15d   :  { %v810_v18 = vadd.f32 %v809_v33, %v747_v53  ;;  %v677_v27 = vadd.f32 %v2304_v17, %v676_v39  ;;  %v752_v53 = vmul.f32 %v2332_v61, %v2332_v61 }
 0x15f   :  { %v678_v10 = vadd.f32 %v677_v27, %v2325_v52  ;;  %v811_v57 = vadd.f32 %v810_v18, %v748_v4  ;;  %v753_v4 = vmul.f32 %v2353_v37, %v2353_v37 }
 0x161   :  { %v812_v48 = vadd.f32 %v811_v57, %v749_v25  ;;  %v679_v7 = vadd.f32 %v678_v10, %v2336_v63  ;;  %v754_v57 = vmul.f32 %v2364_v11, %v2364_v11 }
 0x163   :  { %v680_v5 = vadd.f32 %v2321_v38, %v679_v7  ;;  %v813_v31 = vadd.f32 %v812_v48, %v750_v29  ;;  %v755_v48 = vmul.f32 %v2349_v30, %v2349_v30 }
 0x165   :  { %v814_v39 = vadd.f32 %v813_v31, %v751_v13  ;;  %v681_v33 = vadd.f32 %v2332_v61, %v680_v5  ;;  %v756_v13 = vmul.f32 %v2360_v9, %v2360_v9 }
 0x167   :  { %v682_v18 = vadd.f32 %v681_v33, %v2353_v37  ;;  %v815_v27 = vadd.f32 %v814_v39, %v752_v53  ;;  %v757_v53 = vmul.f32 %v2381_v55, %v2381_v55 }
 0x169   :  { %v816_v25 = vadd.f32 %v815_v27, %v753_v4  ;;  %v683_v10 = vadd.f32 %v682_v18, %v2364_v11  ;;  %v758_v27 = vmul.f32 %v2392_v26, %v2392_v26 }
 0x16b   :  { %v684_v7 = vadd.f32 %v2349_v30, %v683_v10  ;;  %v817_v29 = vadd.f32 %v816_v25, %v754_v57  ;;  %v759_v25 = vmul.f32 %v2377_v54, %v2377_v54 }
 0x16d   :  { %v818_v5 = vadd.f32 %v817_v29, %v755_v48  ;;  %v685_v31 = vadd.f32 %v2360_v9, %v684_v7  ;;  %v760_v48 = vmul.f32 %v2388_v28, %v2388_v28 }
 0x16f   :  { %v686_v39 = vadd.f32 %v685_v31, %v2381_v55  ;;  %v819_v33 = vadd.f32 %v818_v5, %v756_v13 }
 0x171   :  { %v820_v4 = vadd.f32 %v819_v33, %v757_v53  ;;  %v687_v18 = vadd.f32 %v686_v39, %v2392_v26 }
 0x173   :  { %v688_v10 = vadd.f32 %v2377_v54, %v687_v18  ;;  %v821_v57 = vadd.f32 %v820_v4, %v758_v27 }
 0x175   :  { %v689_v7 = vadd.f32 %v2388_v28, %v688_v10  ;;  %v822_v29 = vadd.f32 %v821_v57, %v759_v25  ;;  %v842_v25 = vlaneseq }
 0x177   :  { %v690_v31 = vrot.slane %v689_v7, 4  ;;  %v823_v13 = vadd.f32 %v822_v29, %v760_v48  ;;  %v2499_v57 = vshrl.u32 %v842_v25, 7  ;;  %v834_v48 = vld [vmem:[%s3776_s2] sm:$0x1]  ;;  %v3865_v25 = vld [vmem:[#allocation7_spill] sm:$0xff] }
 0x179   :  { %v691_v5 = vadd.f32 %v690_v31, %v689_v7  ;;  %v824_v53 = vrot.slane %v823_v13, 4  ;;  %v3803_v7 = vsub.s32 0, %v2499_v57 }
 0x17b   :  { %v692_v39 = vrot.slane %v691_v5, 2  ;;  %v825_v33 = vadd.f32 %v824_v53, %v823_v13  ;;  %v3858_v13 = vld [vmem:[#allocation2_spill] sm:$0xff] }
 0x17c   :  { %v3860_v53 = vld [vmem:[#allocation6_spill] sm:$0xff] }
 0x17d   :  { %v693_v55 = vadd.f32 %v692_v39, %v691_v5  ;;  %v826_v26 = vrot.slane %v825_v33, 2  ;;  %v3859_v5 = vld [vmem:[#allocation4_spill] sm:$0xff]  ;;  %v3861_v39 = vld [vmem:[#allocation3_spill] sm:$0xff] }
 0x17f   :  { %v694_v9 = vrot.slane %v693_v55, 1  ;;  %v827_v30 = vadd.f32 %v826_v26, %v825_v33  ;;  %v3862_v33 = vld [vmem:[#allocation5_spill] sm:$0xff] }
 0x181   :  { %v695_v11 = vadd.f32 %v694_v9, %v693_v55  ;;  %v828_v37 = vrot.slane %v827_v30, 1 }
 0x183   :  { %v696_v18 = vmul.f32 0.001953125, %v695_v11  ;;  %v829_v4 = vadd.f32 %v828_v37, %v827_v30  ;;  %v2508_v30 = vld [vmem:[%s3777_s3] sm:$0x1] }
 0x185   :  { %v830_v27 = vmul.f32 0.001953125, %v829_v4  ;;  %v831_v54 = vmul.f32 %v696_v18, %v696_v18 }
 0x187   :  { %v832_v61 = vsub.f32 %v830_v27, %v831_v54  ;;  %v3864_v27 = vld [vmem:[#allocation12_spill] sm:$0xff] }
 0x189   :  { %v833_v38 = vmax.f32 %v832_v61, 0.0  ;;  %v3871_v61 = vld [vmem:[#allocation22_spill] sm:$0xff] }
 0x18b   :  { %v835_v10 = vadd.f32 1e-05, %v833_v38 }
 0x18d   :  { %2032 = vrsqrt.f32 %v835_v10 }
 0x197   :  { %v2033_v26 = vpop.eup %2032 }
 0x198   :  { %v837_v9 = vmul.f32 %v2033_v26, %v834_v48  ;;  %v3866_v26 = vld [vmem:[#allocation10_spill] sm:$0xff] }
 0x19a   :  { %v2510_v37 = vmul.f32 %v837_v9, %v696_v18  ;;  %v2514_v38 = vrot.slane %v837_v9, %v3803_v7  ;;  %v3863_v18 = vld [vmem:[#allocation9_spill] sm:$0xff]  ;;  %v3872_v7 = vld [vmem:[#allocation24_spill] sm:$0xff] }
 0x19c   :  { %v2520_v11 = vmul.f32 %v2514_v38, %v2183_v42  ;;  %v2524_v54 = vmul.f32 %v2514_v38, %v2191_v46  ;;  %v2528_v55 = vmul.f32 %v2179_v40, %v2514_v38  ;;  %v2532_v29 = vmul.f32 %v2187_v44, %v2514_v38 }
 0x19d   :  { %v2536_v31 = vmul.f32 %v2514_v38, %v2211_v59  ;;  %v2540_v42 = vmul.f32 %v2514_v38, %v2222_v2  ;;  %v2544_v46 = vmul.f32 %v2206_v56, %v2514_v38  ;;  %v2548_v40 = vmul.f32 %v2218_v0, %v2514_v38 }
 0x19e   :  { %v2552_v44 = vmul.f32 %v2514_v38, %v2239_v15  ;;  %v2556_v59 = vmul.f32 %v2514_v38, %v2250_v22  ;;  %v2560_v2 = vmul.f32 %v2234_v12, %v2514_v38  ;;  %v2564_v56 = vmul.f32 %v2246_v20, %v2514_v38 }
 0x19f   :  { %v2568_v0 = vmul.f32 %v2514_v38, %v2267_v35  ;;  %v2572_v15 = vmul.f32 %v2514_v38, %v2278_v50  ;;  %v2576_v22 = vmul.f32 %v2262_v32, %v2514_v38  ;;  %v2580_v12 = vmul.f32 %v3858_v13, %v2514_v38  ;;  %v3867_v13 = vld [vmem:[#allocation15_spill] sm:$0xff] }
 0x1a0   :  { %v2584_v20 = vmul.f32 %v2514_v38, %v3859_v5  ;;  %v2588_v35 = vmul.f32 %v2514_v38, %v3860_v53  ;;  %v2592_v50 = vmul.f32 %v3861_v39, %v2514_v38  ;;  %v2596_v32 = vmul.f32 %v3862_v33, %v2514_v38  ;;  %v3868_v53 = vld [vmem:[#allocation19_spill] sm:$0xff]  ;;  %v3869_v33 = vld [vmem:[#allocation13_spill] sm:$0xff] }
 0x1a1   :  { %v2600_v4 = vmul.f32 %v2514_v38, %v3863_v18  ;;  %v2604_v10 = vmul.f32 %v2514_v38, %v3864_v27  ;;  %v2608_v48 = vmul.f32 %v3865_v25, %v2514_v38  ;;  %v2612_v9 = vmul.f32 %v3866_v26, %v2514_v38  ;;  %v3870_v27 = vld [vmem:[#allocation17_spill] sm:$0xff] }
 0x1a2   :  { %v2616_v5 = vmul.f32 %v2514_v38, %v3867_v13  ;;  %v2620_v39 = vmul.f32 %v2514_v38, %v3868_v53  ;;  %v2624_v18 = vmul.f32 %v3869_v33, %v2514_v38  ;;  %v2628_v25 = vmul.f32 %v3870_v27, %v2514_v38 }
 0x1a3   :  { %v2632_v26 = vmul.f32 %v2514_v38, %v3871_v61  ;;  %v2636_v13 = vmul.f32 %v2514_v38, %v3872_v7  ;;  %v2640_v53 = vmul.f32 %v2374_v62, %v2514_v38  ;;  %v2644_v33 = vmul.f32 %v2386_v24, %v2514_v38 }
 0x1a4   :  { %v2648_v27 = vmul.f32 %v2514_v38, %v2185_v43  ;;  %v2652_v61 = vmul.f32 %v2514_v38, %v2193_v47  ;;  %v2656_v7 = vmul.f32 %v2181_v41, %v2514_v38  ;;  %v2660_v62 = vmul.f32 %v2189_v45, %v2514_v38 }
 0x1a5   :  { %v2664_v24 = vmul.f32 %v2514_v38, %v2213_v60  ;;  %v2668_v43 = vmul.f32 %v2514_v38, %v2224_v3  ;;  %v2672_v47 = vmul.f32 %v2209_v58, %v2514_v38  ;;  %v2676_v41 = vmul.f32 %v2220_v1, %v2514_v38 }
 0x1a6   :  { %v2680_v45 = vmul.f32 %v2514_v38, %v2241_v16  ;;  %v2684_v60 = vmul.f32 %v2514_v38, %v2252_v23  ;;  %v2688_v3 = vmul.f32 %v2237_v14, %v2514_v38  ;;  %v2692_v58 = vmul.f32 %v2248_v21, %v2514_v38 }
 0x1a7   :  { %v2696_v1 = vmul.f32 %v2514_v38, %v2269_v36  ;;  %v2700_v16 = vmul.f32 %v2514_v38, %v2280_v51  ;;  %v2704_v23 = vmul.f32 %v2265_v34, %v2514_v38  ;;  %v2708_v14 = vmul.f32 %v2276_v49, %v2514_v38 }
 0x1a8   :  { %v2712_v21 = vmul.f32 %v2514_v38, %v2297_v8  ;;  %v2716_v36 = vmul.f32 %v2514_v38, %v2308_v19  ;;  %v2720_v51 = vmul.f32 %v2293_v6, %v2514_v38  ;;  %v2724_v34 = vmul.f32 %v2304_v17, %v2514_v38 }
 0x1a9   :  { %v2728_v49 = vmul.f32 %v2514_v38, %v2325_v52  ;;  %v2732_v8 = vmul.f32 %v2514_v38, %v2336_v63 }
 0x1aa   :  { %3873 = vst [vmem:[#allocation2_spill] sm:$0xff] %v2712_v21  ;;  %3874 = vst [vmem:[#allocation4_spill] sm:$0xff] %v2716_v36  ;;  %v3879_v21 = vld [vmem:[#allocation8_spill] sm:$0xff]  ;;  %v3881_v36 = vld [vmem:[#allocation11_spill] sm:$0xff] }
 0x1ab   :  { %3875 = vst [vmem:[#allocation6_spill] sm:$0xff] %v2720_v51  ;;  %3876 = vst [vmem:[#allocation3_spill] sm:$0xff] %v2724_v34  ;;  %v2736_v19 = vmul.f32 %v3879_v21, %v2514_v38  ;;  %v2740_v6 = vmul.f32 %v3881_v36, %v2514_v38  ;;  %v3883_v51 = vld [vmem:[#allocation16_spill] sm:$0xff] }
 0x1ac   :  { %3877 = vst [vmem:[#allocation5_spill] sm:$0xff] %v2728_v49  ;;  %3878 = vst [vmem:[#allocation9_spill] sm:$0xff] %v2732_v8  ;;  %v2744_v17 = vmul.f32 %v2514_v38, %v3883_v51  ;;  %v3885_v34 = vld [vmem:[#allocation20_spill] sm:$0xff]  ;;  %v3886_v49 = vld [vmem:[#allocation14_spill] sm:$0xff] }
 0x1ad   :  { %3880 = vst [vmem:[#allocation12_spill] sm:$0xff] %v2736_v19  ;;  %3882 = vst [vmem:[#allocation7_spill] sm:$0xff] %v2740_v6  ;;  %v2748_v52 = vmul.f32 %v2514_v38, %v3885_v34  ;;  %v2752_v63 = vmul.f32 %v3886_v49, %v2514_v38  ;;  %v3888_v8 = vld [vmem:[#allocation18_spill] sm:$0xff]  ;;  %v3890_v19 = vld [vmem:[#allocation23_spill] sm:$0xff]  ;;  %v2772_v49 = vmul.f32 %v2388_v28, %v2514_v38 }
 0x1ae   :  { %3884 = vst [vmem:[#allocation10_spill] sm:$0xff] %v2744_v17  ;;  %v2756_v21 = vmul.f32 %v3888_v8, %v2514_v38  ;;  %v2760_v36 = vmul.f32 %v2514_v38, %v3890_v19  ;;  %v3891_v6 = vld [vmem:[#allocation25_spill] sm:$0xff]  ;;  %v3894_v8 = vsub.f32 %v2508_v30, %v2510_v37 }
 0x1af   :  { %3887 = vst [vmem:[#allocation15_spill] sm:$0xff] %v2752_v63  ;;  %v2764_v51 = vmul.f32 %v2514_v38, %v3891_v6  ;;  %v3892_v17 = vld [vmem:[#allocation21_spill] sm:$0xff]  ;;  %v3893_v63 = vsub.s32 0, %v2499_v57 }
 0x1b0   :  { %3889 = vst [vmem:[#allocation19_spill] sm:$0xff] %v2756_v21  ;;  %v2768_v34 = vmul.f32 %v3892_v17, %v2514_v38 }
 0x1b1   :  { %v2779_v21 = vrot.slane %v3894_v8, %v3893_v63 }
 0x1b2   :  { %v3902_v63 = vld [vmem:[#allocation3_spill] sm:$0xff] }
 0x1b3   :  { %v2783_v19 = vadd.f32 %v2779_v21, %v2520_v11  ;;  %v2787_v6 = vadd.f32 %v2779_v21, %v2524_v54  ;;  %v2791_v17 = vadd.f32 %v2779_v21, %v2528_v55  ;;  %v2795_v28 = vadd.f32 %v2779_v21, %v2532_v29  ;;  %v3904_v8 = vld [vmem:[#allocation5_spill] sm:$0xff] }
 0x1b4   :  { %v2799_v57 = vadd.f32 %v2779_v21, %v2536_v31  ;;  %v2803_v30 = vadd.f32 %v2779_v21, %v2540_v42  ;;  %v2807_v37 = vadd.f32 %v2779_v21, %v2544_v46  ;;  %v2811_v38 = vadd.f32 %v2779_v21, %v2548_v40 }
 0x1b5   :  { %v2815_v11 = vadd.f32 %v2779_v21, %v2552_v44  ;;  %v2819_v54 = vadd.f32 %v2779_v21, %v2556_v59  ;;  %v2823_v55 = vadd.f32 %v2779_v21, %v2560_v2  ;;  %v2827_v29 = vadd.f32 %v2779_v21, %v2564_v56 }
 0x1b6   :  { %v2831_v31 = vadd.f32 %v2779_v21, %v2568_v0  ;;  %v2835_v42 = vadd.f32 %v2779_v21, %v2572_v15  ;;  %v2839_v46 = vadd.f32 %v2779_v21, %v2576_v22  ;;  %v2843_v40 = vadd.f32 %v2779_v21, %v2580_v12 }
 0x1b7   :  { %v2847_v44 = vadd.f32 %v2779_v21, %v2584_v20  ;;  %v2851_v59 = vadd.f32 %v2779_v21, %v2588_v35  ;;  %v2855_v2 = vadd.f32 %v2779_v21, %v2592_v50  ;;  %v2859_v56 = vadd.f32 %v2779_v21, %v2596_v32 }
 0x1b8   :  { %v2863_v0 = vadd.f32 %v2779_v21, %v2600_v4  ;;  %v2867_v15 = vadd.f32 %v2779_v21, %v2604_v10  ;;  %v2871_v22 = vadd.f32 %v2779_v21, %v2608_v48  ;;  %v2875_v12 = vadd.f32 %v2779_v21, %v2612_v9 }
 0x1b9   :  { %v2879_v20 = vadd.f32 %v2779_v21, %v2616_v5  ;;  %v2883_v35 = vadd.f32 %v2779_v21, %v2620_v39  ;;  %v2887_v50 = vadd.f32 %v2779_v21, %v2624_v18  ;;  %v2891_v32 = vadd.f32 %v2779_v21, %v2628_v25 }
 0x1ba   :  { %v2895_v4 = vadd.f32 %v2779_v21, %v2632_v26  ;;  %v2899_v10 = vadd.f32 %v2779_v21, %v2636_v13  ;;  %v2903_v48 = vadd.f32 %v2779_v21, %v2640_v53  ;;  %v2907_v9 = vadd.f32 %v2779_v21, %v2644_v33 }
 0x1bb   :  { %v2911_v5 = vadd.f32 %v2779_v21, %v2648_v27  ;;  %v2915_v39 = vadd.f32 %v2779_v21, %v2652_v61  ;;  %v2919_v18 = vadd.f32 %v2779_v21, %v2656_v7  ;;  %v2923_v25 = vadd.f32 %v2779_v21, %v2660_v62 }
 0x1bc   :  { %v2927_v26 = vadd.f32 %v2779_v21, %v2664_v24  ;;  %v2931_v13 = vadd.f32 %v2779_v21, %v2668_v43  ;;  %v2935_v53 = vadd.f32 %v2779_v21, %v2672_v47  ;;  %v2939_v33 = vadd.f32 %v2779_v21, %v2676_v41 }
 0x1bd   :  { %v2943_v27 = vadd.f32 %v2779_v21, %v2680_v45  ;;  %v2947_v61 = vadd.f32 %v2779_v21, %v2684_v60  ;;  %v2951_v7 = vadd.f32 %v2779_v21, %v2688_v3  ;;  %v2955_v62 = vadd.f32 %v2779_v21, %v2692_v58  ;;  %v3896_v45 = vld [vmem:[#allocation2_spill] sm:$0xff]  ;;  %v3898_v3 = vld [vmem:[#allocation4_spill] sm:$0xff] }
 0x1be   :  { %v2959_v24 = vadd.f32 %v2779_v21, %v2696_v1  ;;  %v2963_v43 = vadd.f32 %v2779_v21, %v2700_v16  ;;  %v2967_v47 = vadd.f32 %v2779_v21, %v2704_v23  ;;  %v2971_v41 = vadd.f32 %v2779_v21, %v2708_v14  ;;  %v3900_v1 = vld [vmem:[#allocation6_spill] sm:$0xff] }
 0x1bf   :  { %v2975_v60 = vadd.f32 %v2779_v21, %v3896_v45  ;;  %v2979_v58 = vadd.f32 %v2779_v21, %v3898_v3  ;;  %v2983_v16 = vadd.f32 %v2779_v21, %v3900_v1  ;;  %v2987_v23 = vadd.f32 %v2779_v21, %v3902_v63 }
 0x1c0   :  { %3895 = vst [vmem:[#allocation13_spill] sm:$0xff] %v2971_v41  ;;  %v2991_v14 = vadd.f32 %v2779_v21, %v3904_v8  ;;  %v3906_v41 = vld [vmem:[#allocation9_spill] sm:$0xff]  ;;  %v3011_v8 = vadd.f32 %v2779_v21, %v2748_v52  ;;  %v3031_v52 = vadd.f32 %v2779_v21, %v2768_v34  ;;  %vm981_vm0 = vcmp.ge.f32.partialorder %v2783_v19, 0.0 }
 0x1c1   :  { %3897 = vst [vmem:[#allocation17_spill] sm:$0xff] %v2975_v60  ;;  %3899 = vst [vmem:[#allocation22_spill] sm:$0xff] %v2979_v58  ;;  %v2995_v45 = vadd.f32 %v2779_v21, %v3906_v41  ;;  %v3908_v60 = vld [vmem:[#allocation12_spill] sm:$0xff]  ;;  %v3910_v58 = vld [vmem:[#allocation7_spill] sm:$0xff]  ;;  %vm982_vm1 = vcmp.ge.f32.partialorder %v2787_v6, 0.0  ;;  %vm983_vm2 = vcmp.ge.f32.partialorder %v2791_v17, 0.0 }
 0x1c2   :  { %3901 = vst [vmem:[#allocation24_spill] sm:$0xff] %v2983_v16  ;;  %3903 = vst [vmem:[#allocation8_spill] sm:$0xff] %v2987_v23  ;;  %v2999_v3 = vadd.f32 %v2779_v21, %v3908_v60  ;;  %v3003_v1 = vadd.f32 %v2779_v21, %v3910_v58  ;;  %v3912_v16 = vld [vmem:[#allocation10_spill] sm:$0xff]  ;;  %v3023_v58 = vadd.f32 %v2779_v21, %v2760_v36  ;;  %vm984_vm3 = vcmp.ge.f32.partialorder %v2795_v28, 0.0 }
 0x1c3   :  { %3905 = vst [vmem:[#allocation11_spill] sm:$0xff] %v2991_v14  ;;  %3907 = vst [vmem:[#allocation16_spill] sm:$0xff] %v2995_v45  ;;  %v3007_v63 = vadd.f32 %v2779_v21, %v3912_v16  ;;  %v3915_v14 = vld [vmem:[#allocation15_spill] sm:$0xff]  ;;  %v3027_v16 = vadd.f32 %v2779_v21, %v2764_v51  ;;  %vm985_vm4 = vcmp.ge.f32.partialorder %v2799_v57, 0.0  ;;  %vm986_vm5 = vcmp.ge.f32.partialorder %v2803_v30, 0.0 }
 0x1c4   :  { %3909 = vst [vmem:[#allocation20_spill] sm:$0xff] %v2999_v3  ;;  %3911 = vst [vmem:[#allocation14_spill] sm:$0xff] %v3003_v1  ;;  %v3015_v41 = vadd.f32 %v2779_v21, %v3915_v14  ;;  %v3917_v45 = vld [vmem:[#allocation19_spill] sm:$0xff]  ;;  %v3035_v14 = vadd.f32 %v2779_v21, %v2772_v49  ;;  %vm987_vm6 = vcmp.ge.f32.partialorder %v2807_v37, 0.0  ;;  %vm988_vm7 = vcmp.ge.f32.partialorder %v2811_v38, 0.0 }
 0x1c5   :  { %3913 = vst [vmem:[#allocation18_spill] sm:$0xff] %v3007_v63  ;;  %3914 = vst [vmem:[#allocation23_spill] sm:$0xff] %v3011_v8  ;;  %v3019_v60 = vadd.f32 %v2779_v21, %v3917_v45  ;;  %vm989_vm8 = vcmp.ge.f32.partialorder %v2815_v11, 0.0  ;;  %vm990_vm9 = vcmp.ge.f32.partialorder %v2819_v54, 0.0  ;;  %v1045_v21 = vmul.f32 0.2, %v2783_v19 }
 0x1c6   :  { %3916 = vst [vmem:[#allocation25_spill] sm:$0xff] %v3015_v41  ;;  %3919 = vst [vmem:[#allocation2_spill] sm:$0xff] %v3023_v58  ;;  %v1046_v36 = vmul.f32 0.2, %v2787_v6  ;;  %v1047_v51 = vmul.f32 0.2, %v2791_v17 }
 0x1c7   :  { %3918 = vst [vmem:[#allocation21_spill] sm:$0xff] %v3019_v60  ;;  %3920 = vst [vmem:[#allocation4_spill] sm:$0xff] %v3027_v16  ;;  %vm991_vm10 = vcmp.ge.f32.partialorder %v2823_v55, 0.0  ;;  %v1048_v34 = vmul.f32 0.2, %v2795_v28  ;;  %vm992_vm11 = vcmp.ge.f32.partialorder %v2827_v29, 0.0  ;;  %v3061_v58 = vsel %vm981_vm0, %v2783_v19, %v1045_v21 }
 0x1c8   :  { %3921 = vst [vmem:[#allocation6_spill] sm:$0xff] %v3031_v52  ;;  %3922 = vst [vmem:[#allocation3_spill] sm:$0xff] %v3035_v14  ;;  %v1049_v49 = vmul.f32 0.2, %v2799_v57  ;;  %v1050_v45 = vmul.f32 0.2, %v2803_v30  ;;  %v3072_v63 = vsel %vm982_vm1, %v2787_v6, %v1046_v36 }
 0x1c9   :  { %v1051_v14 = vmul.f32 0.2, %v2807_v37  ;;  %v1052_v52 = vmul.f32 0.2, %v2811_v38  ;;  %v1053_v16 = vmul.f32 0.2, %v2815_v11  ;;  %v3102_v3 = vsel %vm984_vm3, %v2795_v28, %v1048_v34 }
 0x1ca   :  { %3923 = vst [vmem:[#allocation5_spill] sm:$0xff] %v3061_v58  ;;  %vm993_vm12 = vcmp.ge.f32.partialorder %v2831_v31, 0.0  ;;  %v1054_v60 = vmul.f32 0.2, %v2819_v54  ;;  %v1055_v41 = vmul.f32 0.2, %v2823_v55  ;;  %v3087_v58 = vsel %vm983_vm2, %v2791_v17, %v1047_v51 }
 0x1cb   :  { %v3067_v8 = vmul.f32 0.2, %v2827_v29  ;;  %3924 = vst [vmem:[#allocation9_spill] sm:$0xff] %v3072_v63  ;;  %vm994_vm13 = vcmp.ge.f32.partialorder %v2835_v42, 0.0  ;;  %v3076_v1 = vmul.f32 0.2, %v2831_v31 }
 0x1cc   :  { %v3079_v19 = vmul.f32 0.2, %v2835_v42  ;;  %v3082_v21 = vmul.f32 0.2, %v2839_v46  ;;  %3925 = vst [vmem:[#allocation12_spill] sm:$0xff] %v3087_v58  ;;  %vm995_vm14 = vcmp.ge.f32.partialorder %v2839_v46, 0.0 }
 0x1cd   :  { %v3091_v6 = vmul.f32 0.2, %v2843_v40  ;;  %v3094_v36 = vmul.f32 0.2, %v2847_v44  ;;  %v3097_v63 = vmul.f32 0.2, %v2851_v59 }
 0x1ce   :  { %3927 = vst [vmem:[#allocation10_spill] sm:$0xff] %v3102_v3  ;;  %vm996_vm15 = vcmp.ge.f32.partialorder %v2843_v40, 0.0  ;;  %v3106_v17 = vmul.f32 0.2, %v2855_v2  ;;  %v3109_v51 = vmul.f32 0.2, %v2859_v56 }
 0x1cf   :  { %3926 = vst [vmem:[#allocation7_spill] sm:$0xff] %v3097_v63  ;;  %v3112_v58 = vmul.f32 0.2, %v2863_v0  ;;  %v3117_v63 = vsel %vm985_vm4, %v2799_v57, %v1049_v49  ;;  %vm997_vm0 = vcmp.ge.f32.partialorder %v2847_v44, 0.0  ;;  %v3121_v28 = vmul.f32 0.2, %v2867_v15 }
 0x1d0   :  { %3929 = vst [vmem:[#allocation19_spill] sm:$0xff] %v3117_v63  ;;  %v3124_v34 = vmul.f32 0.2, %v2871_v22  ;;  %v3127_v3 = vmul.f32 0.2, %v2875_v12  ;;  %vm998_vm1 = vcmp.ge.f32.partialorder %v2851_v59, 0.0 }
 0x1d1   :  { %3928 = vst [vmem:[#allocation15_spill] sm:$0xff] %v3112_v58  ;;  %v3132_v58 = vsel %vm986_vm5, %v2803_v30, %v1050_v45  ;;  %v3136_v57 = vmul.f32 0.2, %v2879_v20  ;;  %v3139_v49 = vmul.f32 0.2, %v2883_v35  ;;  %vm999_vm2 = vcmp.ge.f32.partialorder %v2855_v2, 0.0 }
 0x1d2   :  { %3930 = vst [vmem:[#allocation26_spill] sm:$0xff] %v3127_v3  ;;  %3931 = vst [vmem:[#allocation27_spill] sm:$0xff] %v3132_v58  ;;  %v3142_v63 = vmul.f32 0.2, %v2887_v50  ;;  %v3147_v3 = vsel %vm987_vm6, %v2807_v37, %v1051_v14  ;;  %v3151_v30 = vmul.f32 0.2, %v2891_v32 }
 0x1d3   :  { %3933 = vst [vmem:[#allocation29_spill] sm:$0xff] %v3147_v3  ;;  %v3154_v45 = vmul.f32 0.2, %v2895_v4  ;;  %v3157_v58 = vmul.f32 0.2, %v2899_v10  ;;  %vm1000_vm3 = vcmp.ge.f32.partialorder %v2859_v56, 0.0 }
 0x1d4   :  { %3932 = vst [vmem:[#allocation28_spill] sm:$0xff] %v3142_v63  ;;  %v3162_v63 = vsel %vm988_vm7, %v2811_v38, %v1052_v52  ;;  %v3168_v37 = vmul.f32 0.2, %v2903_v48  ;;  %v3171_v14 = vmul.f32 0.2, %v2907_v9  ;;  %v3179_v38 = vsel %vm989_vm8, %v2815_v11, %v1053_v16 }
 0x1d5   :  { %3934 = vst [vmem:[#allocation30_spill] sm:$0xff] %v3162_v63  ;;  %v3174_v3 = vmul.f32 0.2, %v2911_v5  ;;  %3936 = vst [vmem:[#allocation32_spill] sm:$0xff] %v3179_v38  ;;  %vm1003_vm6 = vcmp.ge.f32.partialorder %v2871_v22, 0.0  ;;  %v3197_v11 = vsel %vm990_vm9, %v2819_v54, %v1054_v60  ;;  %vm1007_vm8 = vcmp.ge.f32.partialorder %v2887_v50, 0.0 }
 0x1d6   :  { %v3186_v52 = vmul.f32 0.2, %v2915_v39  ;;  %v3189_v63 = vmul.f32 0.2, %v2919_v18  ;;  %3938 = vst [vmem:[#allocation34_spill] sm:$0xff] %v3197_v11  ;;  %v3215_v54 = vsel %vm991_vm10, %v2823_v55, %v1055_v41  ;;  %vm1011_vm9 = vcmp.ge.f32.partialorder %v2903_v48, 0.0 }
 0x1d7   :  { %3935 = vst [vmem:[#allocation31_spill] sm:$0xff] %v3174_v3  ;;  %v3192_v3 = vmul.f32 0.2, %v2923_v25  ;;  %v3204_v16 = vmul.f32 0.2, %v2927_v26  ;;  %3940 = vst [vmem:[#allocation36_spill] sm:$0xff] %v3215_v54  ;;  %v3234_v55 = vsel %vm992_vm11, %v2827_v29, %v3067_v8  ;;  %v3253_v29 = vsel %vm993_vm12, %v2831_v31, %v3076_v1 }
 0x1d8   :  { %v3207_v38 = vmul.f32 0.2, %v2931_v13  ;;  %v3222_v60 = vmul.f32 0.2, %v2939_v33  ;;  %v3225_v11 = vmul.f32 0.2, %v2943_v27  ;;  %v3272_v31 = vsel %vm994_vm13, %v2835_v42, %v3079_v19 }
 0x1d9   :  { %3937 = vst [vmem:[#allocation33_spill] sm:$0xff] %v3192_v3  ;;  %v3210_v3 = vmul.f32 0.2, %v2935_v53  ;;  %3942 = vst [vmem:[#allocation38_spill] sm:$0xff] %v3234_v55  ;;  %vm1015_vm10 = vcmp.ge.f32.partialorder %v2919_v18, 0.0  ;;  %vm1019_vm11 = vcmp.ge.f32.partialorder %v2935_v53, 0.0  ;;  %v3291_v42 = vsel %vm995_vm14, %v2839_v46, %v3082_v21 }
 0x1da   :  { %v3241_v41 = vmul.f32 0.2, %v2951_v7  ;;  %v3244_v54 = vmul.f32 0.2, %v2955_v62  ;;  %3946 = vst [vmem:[#allocation42_spill] sm:$0xff] %v3253_v29  ;;  %3951 = vst [vmem:[#allocation45_spill] sm:$0xff] %v3272_v31  ;;  %v3310_v46 = vsel %vm996_vm15, %v2843_v40, %v3091_v6  ;;  %v3323_v40 = vsel %vm997_vm0, %v2847_v44, %v3094_v36 }
 0x1db   :  { %3939 = vst [vmem:[#allocation35_spill] sm:$0xff] %v3210_v3  ;;  %v3228_v3 = vmul.f32 0.2, %v2947_v61  ;;  %v3260_v8 = vmul.f32 0.2, %v2963_v43  ;;  %vm1023_vm12 = vcmp.ge.f32.partialorder %v2951_v7, 0.0 }
 0x1dc   :  { %3943 = vst [vmem:[#allocation39_spill] sm:$0xff] %v3241_v41  ;;  %3944 = vst [vmem:[#allocation40_spill] sm:$0xff] %v3244_v54  ;;  %v3263_v55 = vmul.f32 0.2, %v2967_v47  ;;  %v3952_v1 = vld [vmem:[#allocation17_spill] sm:$0xff]  ;;  %vm1027_vm13 = vcmp.ge.f32.partialorder %v2967_v47, 0.0 }
 0x1dd   :  { %3941 = vst [vmem:[#allocation37_spill] sm:$0xff] %v3228_v3  ;;  %v3247_v3 = vmul.f32 0.2, %v2959_v24  ;;  %3947 = vst [vmem:[#allocation43_spill] sm:$0xff] %v3260_v8  ;;  %v3279_v29 = vmul.f32 0.2, %v3952_v1 }
 0x1de   :  { %3948 = vst [vmem:[#allocation44_spill] sm:$0xff] %v3263_v55  ;;  %v3954_v55 = vld [vmem:[#allocation22_spill] sm:$0xff]  ;;  %3958 = vst [vmem:[#allocation49_spill] sm:$0xff] %v3291_v42  ;;  %v3298_v19 = vmul.f32 0.2, %v2987_v23  ;;  %v3960_v31 = vld [vmem:[#allocation11_spill] sm:$0xff] }
 0x1df   :  { %3945 = vst [vmem:[#allocation41_spill] sm:$0xff] %v3247_v3  ;;  %v3949_v3 = vld [vmem:[#allocation13_spill] sm:$0xff]  ;;  %3953 = vst [vmem:[#allocation46_spill] sm:$0xff] %v3279_v29  ;;  %v3282_v8 = vmul.f32 0.2, %v3954_v55  ;;  %v3965_v21 = vld [vmem:[#allocation20_spill] sm:$0xff] }
 0x1e0   :  { %v3266_v54 = vmul.f32 0.2, %v3949_v3  ;;  %3959 = vst [vmem:[#allocation50_spill] sm:$0xff] %v3298_v19  ;;  %3964 = vst [vmem:[#allocation53_spill] sm:$0xff] %v3310_v46  ;;  %v1099_v42 = vmul.f32 0.2, %v3965_v21 }
 0x1e1   :  { %3955 = vst [vmem:[#allocation47_spill] sm:$0xff] %v3282_v8  ;;  %v3301_v8 = vmul.f32 0.2, %v3960_v31  ;;  %v3967_v55 = vld [vmem:[#allocation18_spill] sm:$0xff]  ;;  %3968 = vst [vmem:[#allocation54_spill] sm:$0xff] %v3323_v40  ;;  %vm1035_vm15 = vcmp.ge.f32.partialorder %v3965_v21, 0.0 }
 0x1e2   :  { %3950 = vst [vmem:[#allocation13_spill] sm:$0xff] %v3266_v54  ;;  %v3956_v54 = vld [vmem:[#allocation24_spill] sm:$0xff]  ;;  %v3969_v6 = vld [vmem:[#allocation23_spill] sm:$0xff]  ;;  %v3971_v23 = vld [vmem:[#allocation21_spill] sm:$0xff]  ;;  %vm3979_vm7 = vcmp.ge.f32.partialorder %v2863_v0, 0.0 }
 0x1e3   :  { %v3285_v41 = vmul.f32 0.2, %v3956_v54  ;;  %3961 = vst [vmem:[#allocation51_spill] sm:$0xff] %v3301_v8  ;;  %vm1031_vm14 = vcmp.ge.f32.partialorder %v3956_v54, 0.0  ;;  %v3966_v8 = vld [vmem:[#allocation14_spill] sm:$0xff]  ;;  %v3972_v1 = vld [vmem:[#allocation7_spill] sm:$0xff] }
 0x1e4   :  { %v1100_v19 = vmul.f32 0.2, %v3966_v8  ;;  %v1102_v46 = vmul.f32 0.2, %v3969_v6  ;;  %v1104_v54 = vmul.f32 0.2, %v3971_v23  ;;  %v3336_v44 = vsel %vm998_vm1, %v2851_v59, %v3972_v1 }
 0x1e5   :  { %3957 = vst [vmem:[#allocation48_spill] sm:$0xff] %v3285_v41  ;;  %v3962_v41 = vld [vmem:[#allocation16_spill] sm:$0xff]  ;;  %v3974_v36 = vld [vmem:[#allocation2_spill] sm:$0xff]  ;;  %v3349_v59 = vsel %vm999_vm2, %v2855_v2, %v3106_v17  ;;  %v3977_v1 = vld [vmem:[#allocation3_spill] sm:$0xff]  ;;  %vm3980_vm2 = vcmp.ge.f32.partialorder %v2867_v15, 0.0  ;;  %v3376_v17 = vsel %vm1003_vm6, %v2871_v22, %v3124_v34  ;;  %vm3986_vm6 = vcmp.ge.f32.partialorder %v2891_v32, 0.0 }
 0x1e6   :  { %v3304_v29 = vmul.f32 0.2, %v3962_v41  ;;  %v3970_v41 = vld [vmem:[#allocation25_spill] sm:$0xff]  ;;  %vm1041_vm4 = vcmp.ge.f32.partialorder %v3974_v36, 0.0  ;;  %v3975_v40 = vld [vmem:[#allocation4_spill] sm:$0xff]  ;;  %v3976_v8 = vld [vmem:[#allocation6_spill] sm:$0xff]  ;;  %v3370_v2 = vsel %vm3980_vm2, %v2867_v15, %v3121_v28 }
 0x1e7   :  { %v1103_v31 = vmul.f32 0.2, %v3970_v41  ;;  %3973 = vst [vmem:[#allocation25_spill] sm:$0xff] %v3336_v44  ;;  %vm1039_vm0 = vcmp.ge.f32.partialorder %v3970_v41, 0.0  ;;  %v1105_v6 = vmul.f32 0.2, %v3974_v36  ;;  %v3358_v36 = vsel %vm1000_vm3, %v2859_v56, %v3109_v51 }
 0x1e8   :  { %3963 = vst [vmem:[#allocation52_spill] sm:$0xff] %v3304_v29  ;;  %v1101_v29 = vmul.f32 0.2, %v3967_v55  ;;  %v1106_v55 = vmul.f32 0.2, %v3975_v40  ;;  %vm1043_vm1 = vcmp.ge.f32.partialorder %v3976_v8, 0.0 }
 0x1e9   :  { %v1107_v21 = vmul.f32 0.2, %v3976_v8  ;;  %vm1044_vm5 = vcmp.ge.f32.partialorder %v3977_v1, 0.0  ;;  %v1108_v44 = vmul.f32 0.2, %v3977_v1  ;;  %v3978_v40 = vld [vmem:[#allocation15_spill] sm:$0xff] }
 0x1ea   :  { %v3364_v23 = vsel %vm3979_vm7, %v2863_v0, %v3978_v40  ;;  %v3981_v56 = vld [vmem:[#allocation26_spill] sm:$0xff]  ;;  %vm3982_vm3 = vcmp.ge.f32.partialorder %v2875_v12, 0.0  ;;  %vm3983_vm7 = vcmp.ge.f32.partialorder %v2879_v20, 0.0  ;;  %vm3984_vm2 = vcmp.ge.f32.partialorder %v2883_v35, 0.0  ;;  %v3985_v22 = vld [vmem:[#allocation28_spill] sm:$0xff] }
 0x1eb   :  { %v3382_v51 = vsel %vm3982_vm3, %v2875_v12, %v3981_v56  ;;  %v3388_v0 = vsel %vm3983_vm7, %v2879_v20, %v3136_v57  ;;  %v3394_v15 = vsel %vm3984_vm2, %v2883_v35, %v3139_v49  ;;  %v3400_v28 = vsel %vm1007_vm8, %v2887_v50, %v3985_v22  ;;  %v4019_v40 = vld [vmem:[#allocation24_spill] sm:$0xff] }
 0x1ec   :  { %v3406_v12 = vsel %vm3986_vm6, %v2891_v32, %v3151_v30  ;;  %vm3987_vm3 = vcmp.ge.f32.partialorder %v2895_v4, 0.0  ;;  %vm3988_vm7 = vcmp.ge.f32.partialorder %v2899_v10, 0.0  ;;  %v3424_v50 = vsel %vm1011_vm9, %v2903_v48, %v3168_v37  ;;  %v4021_v22 = vld [vmem:[#allocation8_spill] sm:$0xff] }
 0x1ed   :  { %v3412_v20 = vsel %vm3987_vm3, %v2895_v4, %v3154_v45  ;;  %v3418_v35 = vsel %vm3988_vm7, %v2899_v10, %v3157_v58  ;;  %vm3989_vm8 = vcmp.ge.f32.partialorder %v2907_v9, 0.0  ;;  %v3990_v4 = vld [vmem:[#allocation31_spill] sm:$0xff]  ;;  %vm3991_vm2 = vcmp.ge.f32.partialorder %v2911_v5, 0.0 }
 0x1ee   :  { %v3430_v32 = vsel %vm3989_vm8, %v2907_v9, %v3171_v14  ;;  %v3436_v34 = vsel %vm3991_vm2, %v2911_v5, %v3990_v4  ;;  %vm3992_vm6 = vcmp.ge.f32.partialorder %v2915_v39, 0.0  ;;  %v3448_v48 = vsel %vm1015_vm10, %v2919_v18, %v3189_v63  ;;  %v3993_v9 = vld [vmem:[#allocation33_spill] sm:$0xff]  ;;  %v3997_v18 = vld [vmem:[#allocation35_spill] sm:$0xff] }
 0x1ef   :  { %v3442_v10 = vsel %vm3992_vm6, %v2915_v39, %v3186_v52  ;;  %vm3994_vm9 = vcmp.ge.f32.partialorder %v2923_v25, 0.0  ;;  %vm3995_vm3 = vcmp.ge.f32.partialorder %v2927_v26, 0.0  ;;  %vm3996_vm7 = vcmp.ge.f32.partialorder %v2931_v13, 0.0  ;;  %v4013_v52 = vld [vmem:[#allocation17_spill] sm:$0xff] }
 0x1f0   :  { %v3454_v58 = vsel %vm3994_vm9, %v2923_v25, %v3993_v9  ;;  %v3460_v5 = vsel %vm3995_vm3, %v2927_v26, %v3204_v16  ;;  %v3466_v39 = vsel %vm3996_vm7, %v2931_v13, %v3207_v38  ;;  %v3472_v63 = vsel %vm1019_vm11, %v2935_v53, %v3997_v18  ;;  %v4000_v13 = vld [vmem:[#allocation37_spill] sm:$0xff]  ;;  %v4002_v53 = vld [vmem:[#allocation39_spill] sm:$0xff]  ;;  %v4016_v16 = vld [vmem:[#allocation22_spill] sm:$0xff] }
 0x1f1   :  { %vm3998_vm10 = vcmp.ge.f32.partialorder %v2939_v33, 0.0  ;;  %vm3999_vm8 = vcmp.ge.f32.partialorder %v2943_v27, 0.0  ;;  %vm4001_vm2 = vcmp.ge.f32.partialorder %v2947_v61, 0.0  ;;  %v3496_v49 = vsel %vm1023_vm12, %v2951_v7, %v4002_v53  ;;  %v4009_v7 = vld [vmem:[#allocation44_spill] sm:$0xff]  ;;  %v4023_v9 = vld [vmem:[#allocation51_spill] sm:$0xff] }
 0x1f2   :  { %v3478_v25 = vsel %vm3998_vm10, %v2939_v33, %v3222_v60  ;;  %v3484_v26 = vsel %vm3999_vm8, %v2943_v27, %v3225_v11  ;;  %v3490_v57 = vsel %vm4001_vm2, %v2947_v61, %v4000_v13  ;;  %v4003_v33 = vld [vmem:[#allocation40_spill] sm:$0xff]  ;;  %vm4004_vm11 = vcmp.ge.f32.partialorder %v2955_v62, 0.0  ;;  %v4005_v27 = vld [vmem:[#allocation41_spill] sm:$0xff]  ;;  %v4007_v61 = vld [vmem:[#allocation43_spill] sm:$0xff] }
 0x1f3   :  { %v3502_v30 = vsel %vm4004_vm11, %v2955_v62, %v4003_v33  ;;  %vm4006_vm6 = vcmp.ge.f32.partialorder %v2959_v24, 0.0  ;;  %vm4008_vm9 = vcmp.ge.f32.partialorder %v2963_v43, 0.0  ;;  %v3520_v14 = vsel %vm1027_vm13, %v2967_v47, %v4009_v7  ;;  %v4010_v62 = vld [vmem:[#allocation13_spill] sm:$0xff]  ;;  %v4018_v47 = vld [vmem:[#allocation48_spill] sm:$0xff]  ;;  %v4024_v18 = vld [vmem:[#allocation11_spill] sm:$0xff] }
 0x1f4   :  { %v3508_v45 = vsel %vm4006_vm6, %v2959_v24, %v4005_v27  ;;  %v3514_v37 = vsel %vm4008_vm9, %v2963_v43, %v4007_v61  ;;  %vm4011_vm12 = vcmp.ge.f32.partialorder %v3949_v3, 0.0  ;;  %v4012_v24 = vld [vmem:[#allocation46_spill] sm:$0xff]  ;;  %vm4014_vm3 = vcmp.ge.f32.partialorder %v4013_v52, 0.0  ;;  %v4015_v43 = vld [vmem:[#allocation47_spill] sm:$0xff]  ;;  %v4026_v53 = vld [vmem:[#allocation52_spill] sm:$0xff] }
 0x1f5   :  { %v3526_v38 = vsel %vm4011_vm12, %v3949_v3, %v4010_v62  ;;  %v3532_v11 = vsel %vm4014_vm3, %v4013_v52, %v4012_v24  ;;  %vm4017_vm7 = vcmp.ge.f32.partialorder %v4016_v16, 0.0  ;;  %v3544_v56 = vsel %vm1031_vm14, %v4019_v40, %v4018_v47  ;;  %v4020_v3 = vld [vmem:[#allocation50_spill] sm:$0xff]  ;;  %v4027_v33 = vld [vmem:[#allocation16_spill] sm:$0xff]  ;;  %v4036_v40 = vld [vmem:[#allocation21_spill] sm:$0xff] }
 0x1f6   :  { %v3538_v60 = vsel %vm4017_vm7, %v4016_v16, %v4015_v43  ;;  %vm4022_vm13 = vcmp.ge.f32.partialorder %v4021_v22, 0.0  ;;  %vm4025_vm10 = vcmp.ge.f32.partialorder %v4024_v18, 0.0  ;;  %vm4028_vm8 = vcmp.ge.f32.partialorder %v4027_v33, 0.0  ;;  %v4029_v61 = vld [vmem:[#allocation20_spill] sm:$0xff]  ;;  %v4030_v62 = vld [vmem:[#allocation14_spill] sm:$0xff]  ;;  %v4034_v16 = vld [vmem:[#allocation23_spill] sm:$0xff] }
 0x1f7   :  { %v3550_v4 = vsel %vm4022_vm13, %v4021_v22, %v4020_v3  ;;  %v3556_v13 = vsel %vm4025_vm10, %v4024_v18, %v4023_v9  ;;  %v3562_v27 = vsel %vm4028_vm8, %v4027_v33, %v4026_v53  ;;  %v3567_v7 = vsel %vm1035_vm15, %v4029_v61, %v1099_v42  ;;  %v4032_v52 = vld [vmem:[#allocation18_spill] sm:$0xff]  ;;  %v4039_v22 = vld [vmem:[#allocation4_spill] sm:$0xff]  ;;  %v4044_v9 = vld [vmem:[#allocation9_spill] sm:$0xff] }
 0x1f8   :  { %vm4031_vm14 = vcmp.ge.f32.partialorder %v4030_v62, 0.0  ;;  %vm4033_vm2 = vcmp.ge.f32.partialorder %v4032_v52, 0.0  ;;  %vm4035_vm11 = vcmp.ge.f32.partialorder %v4034_v16, 0.0  ;;  %v3587_v42 = vsel %vm1039_vm0, %v3970_v41, %v1103_v31  ;;  %v4038_v3 = vld [vmem:[#allocation2_spill] sm:$0xff]  ;;  %v4043_v31 = vld [vmem:[#allocation5_spill] sm:$0xff]  ;;  %v4047_v61 = vld [vmem:[#allocation19_spill] sm:$0xff] }
 0x1f9   :  { %v3572_v24 = vsel %vm4031_vm14, %v4030_v62, %v1100_v19  ;;  %v3577_v43 = vsel %vm4033_vm2, %v4032_v52, %v1101_v29  ;;  %v3582_v47 = vsel %vm4035_vm11, %v4034_v16, %v1102_v46  ;;  %vm4037_vm15 = vcmp.ge.f32.partialorder %v4036_v40, 0.0  ;;  %v4046_v53 = vld [vmem:[#allocation10_spill] sm:$0xff]  ;;  %v4048_v62 = vld [vmem:[#allocation27_spill] sm:$0xff]  ;;  %v4049_v52 = vld [vmem:[#allocation29_spill] sm:$0xff] }
 0x1fa   :  { %v3592_v19 = vsel %vm4037_vm15, %v4036_v40, %v1104_v54  ;;  %v3597_v29 = vsel %vm1041_vm4, %v4038_v3, %v1105_v6  ;;  %vm4040_vm6 = vcmp.ge.f32.partialorder %v4039_v22, 0.0  ;;  %v3607_v41 = vsel %vm1043_vm1, %v3976_v8, %v1107_v21  ;;  %v4045_v6 = vld [vmem:[#allocation12_spill] sm:$0xff]  ;;  %v4050_v16 = vld [vmem:[#allocation30_spill] sm:$0xff] }
 0x1fb   :  { %v3602_v46 = vsel %vm4040_vm6, %v4039_v22, %v1106_v55  ;;  %4042 = vst [vmem:[#allocation6_spill] sm:$0xff] %v3607_v41  ;;  %v3612_v54 = vsel %vm1044_vm5, %v3977_v1, %v1108_v44  ;;  %v1668_v18 = vpack.c.bf16 %v4044_v9, %v4043_v31  ;;  %v1673_v33 = vpack.c.bf16 %v4046_v53, %v4045_v6  ;;  %v4051_v3 = vld [vmem:[#allocation32_spill] sm:$0xff]  ;;  %v4052_v8 = vld [vmem:[#allocation34_spill] sm:$0xff]  ;;  %v4056_v1 = vld [vmem:[#allocation45_spill] sm:$0xff] }
 0x1fc   :  { %4041 = vst [vmem:[#allocation7_spill] sm:$0xff] %v3602_v46  ;;  %v1678_v55 = vpack.c.bf16 %v4048_v62, %v4047_v61  ;;  %v1683_v40 = vpack.c.bf16 %v4050_v16, %v4049_v52  ;;  %v1688_v21 = vpack.c.bf16 %v4052_v8, %v4051_v3  ;;  %v4053_v22 = vld [vmem:[#allocation36_spill] sm:$0xff]  ;;  %v4054_v41 = vld [vmem:[#allocation38_spill] sm:$0xff]  ;;  %v4057_v9 = vld [vmem:[#allocation49_spill] sm:$0xff] }
 0x1fd   :  { %v1693_v46 = vpack.c.bf16 %v4054_v41, %v4053_v22  ;;  %1669 = vst [vmem:[%s3778_s4] sm:$0xff] %v1668_v18   ;;  %1825 = vst [vmem:[%s3778_s4 + $0x8] sm:$0xff] %v1673_v33   ;;  %v4055_v44 = vld [vmem:[#allocation42_spill] sm:$0xff]  ;;  %v4058_v6 = vld [vmem:[#allocation53_spill] sm:$0xff]  ;;  %v1713_v41 = vpack.c.bf16 %v3358_v36, %v3349_v59  ;;  %v1718_v18 = vpack.c.bf16 %v3370_v2, %v3364_v23 }
 0x1fe   :  { %v1698_v31 = vpack.c.bf16 %v4056_v1, %v4055_v44  ;;  %v1703_v53 = vpack.c.bf16 %v4058_v6, %v4057_v9  ;;  %v4059_v61 = vld [vmem:[#allocation54_spill] sm:$0xff]  ;;  %v4060_v62 = vld [vmem:[#allocation25_spill] sm:$0xff]  ;;  %1826 = vst [vmem:[%s3778_s4 + $0x10] sm:$0xff] %v1678_v55   ;;  %1827 = vst [vmem:[%s3778_s4 + $0x18] sm:$0xff] %v1683_v40   ;;  %v1723_v36 = vpack.c.bf16 %v3382_v51, %v3376_v17 }
 0x1ff   :  { %v1708_v52 = vpack.c.bf16 %v4060_v62, %v4059_v61  ;;  %1828 = vst [vmem:[%s3778_s4 + $0x20] sm:$0xff] %v1688_v21   ;;  %1829 = vst [vmem:[%s3778_s4 + $0x28] sm:$0xff] %v1693_v46   ;;  %v1728_v59 = vpack.c.bf16 %v3394_v15, %v3388_v0  ;;  %v1733_v33 = vpack.c.bf16 %v3406_v12, %v3400_v28 }
 0x200   :  { %1830 = vst [vmem:[%s3778_s4 + $0x30] sm:$0xff] %v1698_v31   ;;  %1831 = vst [vmem:[%s3778_s4 + $0x38] sm:$0xff] %v1703_v53   ;;  %v1738_v23 = vpack.c.bf16 %v3418_v35, %v3412_v20  ;;  %v1743_v2 = vpack.c.bf16 %v3430_v32, %v3424_v50  ;;  %v1748_v17 = vpack.c.bf16 %v3442_v10, %v3436_v34 }
 0x201   :  { %1832 = vst [vmem:[%s3778_s4 + $0x40] sm:$0xff] %v1708_v52   ;;  %1833 = vst [vmem:[%s3778_s4 + $0x48] sm:$0xff] %v1713_v41   ;;  %v1753_v51 = vpack.c.bf16 %v3454_v58, %v3448_v48  ;;  %v1758_v0 = vpack.c.bf16 %v3466_v39, %v3460_v5  ;;  %v1763_v15 = vpack.c.bf16 %v3478_v25, %v3472_v63 }
 0x202   :  { %1834 = vst [vmem:[%s3778_s4 + $0x50] sm:$0xff] %v1718_v18   ;;  %1835 = vst [vmem:[%s3778_s4 + $0x58] sm:$0xff] %v1723_v36   ;;  %v1768_v28 = vpack.c.bf16 %v3490_v57, %v3484_v26  ;;  %v1773_v12 = vpack.c.bf16 %v3502_v30, %v3496_v49  ;;  %v1778_v20 = vpack.c.bf16 %v3514_v37, %v3508_v45  ;;  %v4062_v63 = vld [vmem:[#allocation6_spill] sm:$0xff] }
 0x203   :  { %1836 = vst [vmem:[%s3778_s4 + $0x60] sm:$0xff] %v1728_v59   ;;  %1837 = vst [vmem:[%s3778_s4 + $0x68] sm:$0xff] %v1733_v33   ;;  %v1783_v35 = vpack.c.bf16 %v3526_v38, %v3520_v14  ;;  %v1788_v50 = vpack.c.bf16 %v3538_v60, %v3532_v11  ;;  %v1793_v32 = vpack.c.bf16 %v3550_v4, %v3544_v56  ;;  %v4061_v5 = vld [vmem:[#allocation7_spill] sm:$0xff] }
 0x204   :  { %1838 = vst [vmem:[%s3778_s4 + $0x70] sm:$0xff] %v1738_v23   ;;  %1839 = vst [vmem:[%s3778_s4 + $0x78] sm:$0xff] %v1743_v2   ;;  %v1798_v34 = vpack.c.bf16 %v3562_v27, %v3556_v13  ;;  %v1803_v10 = vpack.c.bf16 %v3572_v24, %v3567_v7  ;;  %v1808_v48 = vpack.c.bf16 %v3582_v47, %v3577_v43 }
 0x205   :  { %1840 = vst [vmem:[%s3778_s4 + $0x80] sm:$0xff] %v1748_v17   ;;  %1841 = vst [vmem:[%s3778_s4 + $0x88] sm:$0xff] %v1753_v51   ;;  %v1813_v58 = vpack.c.bf16 %v3592_v19, %v3587_v42  ;;  %v1818_v39 = vpack.c.bf16 %v4061_v5, %v3597_v29  ;;  %v1823_v25 = vpack.c.bf16 %v3612_v54, %v4062_v63 }
 0x206   :  { %1842 = vst [vmem:[%s3778_s4 + $0x90] sm:$0xff] %v1758_v0   ;;  %1843 = vst [vmem:[%s3778_s4 + $0x98] sm:$0xff] %v1763_v15  }
 0x207   :  { %1844 = vst [vmem:[%s3778_s4 + $0xa0] sm:$0xff] %v1768_v28   ;;  %1845 = vst [vmem:[%s3778_s4 + $0xa8] sm:$0xff] %v1773_v12  }
 0x208   :  { %1846 = vst [vmem:[%s3778_s4 + $0xb0] sm:$0xff] %v1778_v20   ;;  %1847 = vst [vmem:[%s3778_s4 + $0xb8] sm:$0xff] %v1783_v35  }
 0x209   :  { %1848 = vst [vmem:[%s3778_s4 + $0xc0] sm:$0xff] %v1788_v50   ;;  %1849 = vst [vmem:[%s3778_s4 + $0xc8] sm:$0xff] %v1793_v32  }
 0x20a   :  { %1850 = vst [vmem:[%s3778_s4 + $0xd0] sm:$0xff] %v1798_v34   ;;  %1851 = vst [vmem:[%s3778_s4 + $0xd8] sm:$0xff] %v1803_v10  }
 0x20b   :  { %1852 = vst [vmem:[%s3778_s4 + $0xe0] sm:$0xff] %v1808_v48   ;;  %1853 = vst [vmem:[%s3778_s4 + $0xe8] sm:$0xff] %v1813_v58  }
 0x20c   :  { %1854 = vst [vmem:[%s3778_s4 + $0xf0] sm:$0xff] %v1818_v39   ;;  %1855 = vst [vmem:[%s3778_s4 + $0xf8] sm:$0xff] %v1823_v25  }

// kernel: discriminator_forward.6
= control target key start
LH: loop header
LB: loop body
LE: loop exit
PB: predicated region body
PF: predicated region fallthrough
CT: control target
= control target key end

     0   :  { %s1081_s1 = inlined_call_operand.vmem [shape: bf16[256,128], index: 1, kind: input, shape index: {}]   ;;  %s1082_s0 = inlined_call_operand.vmem [shape: bf16[128,256], index: 0, kind: input, shape index: {}]   ;;  %s1083_s2 = inlined_call_operand.vmem [shape: f32[1,128], index: 2, kind: input, shape index: {}]   ;;  %s1084_s3 = inlined_call_operand.vmem [shape: f32[1,128], index: 3, kind: input, shape index: {}]   ;;  %s1085_s4 = inlined_call_operand.vmem [shape: bf16[128,128], index: 4, kind: output, shape index: {}]  }
   0x1   :  { %v776_v0 = vld [vmem:[%s1081_s1 + $0x40] sm:$0xff]   ;;  %v778_v2 = vld [vmem:[%s1081_s1 + $0x48] sm:$0xff]   ;;  %v780_v4 = vld [vmem:[%s1081_s1 + $0x50] sm:$0xff]  }
   0x2   :  { %v777_v1 = vld [vmem:[%s1081_s1] sm:$0xff]   ;;  %696 = vmatprep.subr.bf16.mxu0 %v776_v0  ;;  %760 = vmatprep.subr.bf16.mxu1 %v776_v0  ;;  %v779_v3 = vld [vmem:[%s1081_s1 + $0x8] sm:$0xff]   ;;  %v781_v5 = vld [vmem:[%s1081_s1 + $0x10] sm:$0xff]  }
   0x3   :  { %697 = vmatpush3.bf16.msra.mxu0 %v777_v1  ;;  %768 = vmatpush3.bf16.msra.mxu1 %v777_v1  ;;  %v782_v6 = vld [vmem:[%s1081_s1 + $0x58] sm:$0xff]   ;;  %v784_v8 = vld [vmem:[%s1081_s1 + $0x60] sm:$0xff]   ;;  %v786_v10 = vld [vmem:[%s1081_s1 + $0x68] sm:$0xff]  }
   0x4   :  { %698 = vmatprep.subr.bf16.mxu0 %v778_v2  ;;  %761 = vmatprep.subr.bf16.mxu1 %v778_v2  ;;  %v783_v7 = vld [vmem:[%s1081_s1 + $0x18] sm:$0xff]   ;;  %v785_v9 = vld [vmem:[%s1081_s1 + $0x20] sm:$0xff]   ;;  %v787_v12 = vld [vmem:[%s1081_s1 + $0x28] sm:$0xff]  }
   0x5   :  { %v794_v11 = vld [vmem:[%s1082_s0 + $0x4] ss:$8 sps:$4 sm:$0xff]   ;;  %v788_v14 = vld [vmem:[%s1081_s1 + $0x70] sm:$0xff]   ;;  %v790_v16 = vld [vmem:[%s1081_s1 + $0x78] sm:$0xff]  }
   0x6   :  { %v800_v13 = vld [vmem:[%s1082_s0 + $0x44] ss:$8 sps:$4 sm:$0xff]   ;;  %274 = vmatprep.mubr.bf16.mxu0 %v794_v11  ;;  %v789_v15 = vld [vmem:[%s1081_s1 + $0x30] sm:$0xff]   ;;  %v791_v17 = vld [vmem:[%s1081_s1 + $0x38] sm:$0xff]  }
   0x7   :  { %699 = vmatpush3.bf16.msra.mxu0 %v779_v3  ;;  %769 = vmatpush3.bf16.msra.mxu1 %v779_v3  ;;  %v792_v18 = vld [vmem:[%s1082_s0] ss:$8 sps:$4 sm:$0xff]   ;;  %v795_v20 = vld [vmem:[%s1082_s0 + $0x14] ss:$8 sps:$4 sm:$0xff]   ;;  %v797_v22 = vld [vmem:[%s1082_s0 + $0x10] ss:$8 sps:$4 sm:$0xff]  }
   0x8   :  { %700 = vmatprep.subr.bf16.mxu0 %v780_v4  ;;  %762 = vmatprep.subr.bf16.mxu1 %v780_v4  ;;  %v798_v19 = vld [vmem:[%s1082_s0 + $0x40] ss:$8 sps:$4 sm:$0xff]   ;;  %v804_v21 = vld [vmem:[%s1082_s0 + $0x54] ss:$8 sps:$4 sm:$0xff]   ;;  %v806_v23 = vld [vmem:[%s1082_s0 + $0x50] ss:$8 sps:$4 sm:$0xff]  }
   0x9   :  { %306 = vmatprep.mubr.bf16.mxu1 %v800_v13  ;;  %v801_v24 = vld [vmem:[%s1082_s0 + $0x24] ss:$8 sps:$4 sm:$0xff]   ;;  %v803_v26 = vld [vmem:[%s1082_s0 + $0x20] ss:$8 sps:$4 sm:$0xff]   ;;  %v807_v28 = vld [vmem:[%s1082_s0 + $0x34] ss:$8 sps:$4 sm:$0xff]  }
   0xa   :  { %v810_v25 = vld [vmem:[%s1082_s0 + $0x64] ss:$8 sps:$4 sm:$0xff]   ;;  %v812_v27 = vld [vmem:[%s1082_s0 + $0x60] ss:$8 sps:$4 sm:$0xff]   ;;  %v813_v29 = vld [vmem:[%s1082_s0 + $0x74] ss:$8 sps:$4 sm:$0xff]  }
   0xb   :  { %701 = vmatpush3.bf16.msra.mxu0 %v781_v5  ;;  %770 = vmatpush3.bf16.msra.mxu1 %v781_v5  ;;  %v809_v30 = vld [vmem:[%s1082_s0 + $0x30] ss:$8 sps:$4 sm:$0xff]  }
   0xc   :  { %702 = vmatprep.subr.bf16.mxu0 %v782_v6  ;;  %763 = vmatprep.subr.bf16.mxu1 %v782_v6  ;;  %v815_v31 = vld [vmem:[%s1082_s0 + $0x70] ss:$8 sps:$4 sm:$0xff]  }
   0xf   :  { %703 = vmatpush3.bf16.msra.mxu0 %v783_v7  ;;  %771 = vmatpush3.bf16.msra.mxu1 %v783_v7 }
  0x10   :  { %704 = vmatprep.subr.bf16.mxu0 %v784_v8  ;;  %764 = vmatprep.subr.bf16.mxu1 %v784_v8 }
  0x13   :  { %705 = vmatpush3.bf16.msra.mxu0 %v785_v9  ;;  %772 = vmatpush3.bf16.msra.mxu1 %v785_v9 }
  0x14   :  { %706 = vmatprep.subr.bf16.mxu0 %v786_v10  ;;  %765 = vmatprep.subr.bf16.mxu1 %v786_v10 }
  0x17   :  { %707 = vmatpush3.bf16.msra.mxu0 %v787_v12  ;;  %773 = vmatpush3.bf16.msra.mxu1 %v787_v12 }
  0x18   :  { %708 = vmatprep.subr.bf16.mxu0 %v788_v14  ;;  %766 = vmatprep.subr.bf16.mxu1 %v788_v14 }
  0x1b   :  { %709 = vmatpush3.bf16.msra.mxu0 %v789_v15  ;;  %774 = vmatpush3.bf16.msra.mxu1 %v789_v15 }
  0x1c   :  { %710 = vmatprep.subr.bf16.mxu0 %v790_v16  ;;  %767 = vmatprep.subr.bf16.mxu1 %v790_v16 }
  0x1f   :  { %711 = vmatpush3.bf16.msra.mxu0 %v791_v17  ;;  %775 = vmatpush3.bf16.msra.mxu1 %v791_v17 }
  0x22   :  { %275 = vmatmul.mubr.bf16.vlgmr.msra.gmra.mrb[0].mxu0 %v792_v18  ;;  %307 = vmatmul.mubr.bf16.vlgmr.msra.gmra.mrb[0].mxu1 %v798_v19 }
  0x23   :  { %282 = vmatprep.mubr.bf16.mxu0 %v795_v20  ;;  %314 = vmatprep.mubr.bf16.mxu1 %v804_v21 }
  0x2a   :  { %283 = vmatmul.mubr.bf16.gmra.mrb[4].mxu0 %v797_v22  ;;  %315 = vmatmul.mubr.bf16.gmra.mrb[4].mxu1 %v806_v23 }
  0x2b   :  { %290 = vmatprep.mubr.bf16.mxu0 %v801_v24  ;;  %322 = vmatprep.mubr.bf16.mxu1 %v810_v25 }
  0x32   :  { %291 = vmatmul.mubr.bf16.gmra.mrb[8].mxu0 %v803_v26  ;;  %323 = vmatmul.mubr.bf16.gmra.mrb[8].mxu1 %v812_v27 }
  0x33   :  { %298 = vmatprep.mubr.bf16.mxu0 %v807_v28  ;;  %330 = vmatprep.mubr.bf16.mxu1 %v813_v29 }
  0x3a   :  { %299 = vmatmul.mubr.bf16.gmra.mrb[12].mxu0 %v809_v30  ;;  %331 = vmatmul.mubr.bf16.gmra.mrb[12].mxu1 %v815_v31 }
  0xf5   :  { %v712_v32 = vpop.f32.mrb[0].mxu0  ;;  %v736_v33 = vpop.f32.mrb[0].mxu1 }
  0xf6   :  { %v713_v34 = vpop.f32.mrb[1].mxu0  ;;  %v737_v35 = vpop.f32.mrb[1].mxu1 }
  0xf7   :  { %v939_v36 = vadd.f32 %v713_v34, %v712_v32  ;;  %v715_v37 = vpop.f32.mrb[2].mxu0  ;;  %v941_v38 = vadd.f32 %v737_v35, %v736_v33  ;;  %v739_v39 = vpop.f32.mrb[2].mxu1 }
  0xf8   :  { %v716_v40 = vpop.f32.mrb[3].mxu0  ;;  %v740_v41 = vpop.f32.mrb[3].mxu1 }
  0xf9   :  { %v943_v42 = vadd.f32 %v716_v40, %v715_v37  ;;  %v945_v43 = vadd.f32 %v740_v41, %v739_v39  ;;  %v361_v55 = vmul.f32 %v939_v36, %v939_v36  ;;  %v369_v39 = vmul.f32 %v941_v38, %v941_v38 }
  0xfb   :  { %v362_v48 = vmul.f32 %v943_v42, %v943_v42  ;;  %v339_v56 = vadd.f32 %v943_v42, %v939_v36 }
  0xfd   :  { %v718_v44 = vpop.f32.mrb[4].mxu0  ;;  %v742_v45 = vpop.f32.mrb[4].mxu1  ;;  %v377_v60 = vadd.f32 %v362_v48, %v361_v55 }
  0xfe   :  { %v719_v46 = vpop.f32.mrb[5].mxu0  ;;  %v743_v47 = vpop.f32.mrb[5].mxu1 }
  0xff   :  { %v949_v49 = vadd.f32 %v719_v46, %v718_v44  ;;  %v721_v50 = vpop.f32.mrb[6].mxu0  ;;  %v951_v51 = vadd.f32 %v743_v47, %v742_v45  ;;  %v745_v52 = vpop.f32.mrb[6].mxu1  ;;  %v370_v44 = vmul.f32 %v945_v43, %v945_v43 }
 0x100   :  { %v722_v53 = vpop.f32.mrb[7].mxu0  ;;  %v746_v54 = vpop.f32.mrb[7].mxu1 }
 0x101   :  { %v363_v57 = vmul.f32 %v949_v49, %v949_v49  ;;  %v959_v58 = vadd.f32 %v722_v53, %v721_v50  ;;  %v961_v59 = vadd.f32 %v746_v54, %v745_v52  ;;  %v340_v61 = vadd.f32 %v949_v49, %v339_v56 }
 0x102   :  { %v371_v47 = vmul.f32 %v951_v51, %v951_v51 }
 0x103   :  { %v378_v62 = vadd.f32 %v377_v60, %v363_v57  ;;  %v364_v63 = vmul.f32 %v959_v58, %v959_v58  ;;  %v341_v4 = vadd.f32 %v959_v58, %v340_v61  ;;  %v372_v52 = vmul.f32 %v961_v59, %v961_v59 }
 0x105   :  { %v724_v0 = vpop.f32.mrb[8].mxu0  ;;  %v748_v1 = vpop.f32.mrb[8].mxu1  ;;  %v379_v11 = vadd.f32 %v378_v62, %v364_v63 }
 0x106   :  { %v725_v2 = vpop.f32.mrb[9].mxu0  ;;  %v749_v3 = vpop.f32.mrb[9].mxu1 }
 0x107   :  { %v967_v5 = vadd.f32 %v725_v2, %v724_v0  ;;  %v727_v6 = vpop.f32.mrb[10].mxu0  ;;  %v969_v7 = vadd.f32 %v749_v3, %v748_v1  ;;  %v751_v8 = vpop.f32.mrb[10].mxu1 }
 0x108   :  { %v728_v9 = vpop.f32.mrb[11].mxu0  ;;  %v752_v10 = vpop.f32.mrb[11].mxu1 }
 0x109   :  { %v342_v12 = vadd.f32 %v967_v5, %v341_v4  ;;  %v365_v13 = vmul.f32 %v967_v5, %v967_v5  ;;  %v974_v14 = vadd.f32 %v728_v9, %v727_v6  ;;  %v976_v15 = vadd.f32 %v752_v10, %v751_v8 }
 0x10a   :  { %v373_v56 = vmul.f32 %v969_v7, %v969_v7 }
 0x10b   :  { %v380_v16 = vadd.f32 %v379_v11, %v365_v13  ;;  %v343_v17 = vadd.f32 %v974_v14, %v342_v12  ;;  %v366_v18 = vmul.f32 %v974_v14, %v974_v14  ;;  %v374_v62 = vmul.f32 %v976_v15, %v976_v15 }
 0x10d   :  { %v381_v19 = vadd.f32 %v380_v16, %v366_v18  ;;  %v730_v20 = vpop.f32.mrb[12].mxu0  ;;  %v754_v21 = vpop.f32.mrb[12].mxu1 }
 0x10e   :  { %v731_v22 = vpop.f32.mrb[13].mxu0  ;;  %v755_v23 = vpop.f32.mrb[13].mxu1 }
 0x10f   :  { %v981_v24 = vadd.f32 %v731_v22, %v730_v20  ;;  %v733_v25 = vpop.f32.mrb[14].mxu0  ;;  %v983_v26 = vadd.f32 %v755_v23, %v754_v21  ;;  %v757_v27 = vpop.f32.mrb[14].mxu1 }
 0x110   :  { %v734_v28 = vpop.f32.mrb[15].mxu0  ;;  %v758_v29 = vpop.f32.mrb[15].mxu1 }
 0x111   :  { %v344_v30 = vadd.f32 %v981_v24, %v343_v17  ;;  %v367_v31 = vmul.f32 %v981_v24, %v981_v24  ;;  %v988_v32 = vadd.f32 %v734_v28, %v733_v25  ;;  %v990_v33 = vadd.f32 %v758_v29, %v757_v27 }
 0x112   :  { %v375_v63 = vmul.f32 %v983_v26, %v983_v26 }
 0x113   :  { %v382_v34 = vadd.f32 %v381_v19, %v367_v31  ;;  %v345_v35 = vadd.f32 %v988_v32, %v344_v30  ;;  %v368_v37 = vmul.f32 %v988_v32, %v988_v32  ;;  %v376_v4 = vmul.f32 %v990_v33, %v990_v33 }
 0x114   :  { %v410_v30 = vlaneseq }
 0x115   :  { %v346_v40 = vadd.f32 %v941_v38, %v345_v35  ;;  %v383_v41 = vadd.f32 %v382_v34, %v368_v37  ;;  %v402_v34 = vld [vmem:[%s1083_s2] sm:$0x1] }
 0x116   :  { %v411_v31 = vshrl.u32 %v410_v30, 7 }
 0x117   :  { %v347_v45 = vadd.f32 %v945_v43, %v346_v40  ;;  %v384_v46 = vadd.f32 %v383_v41, %v369_v39  ;;  %v406_v40 = vld [vmem:[%s1084_s3] sm:$0x1] }
 0x118   :  { %v412_v35 = vsub.s32 0, %v411_v31 }
 0x119   :  { %v385_v48 = vadd.f32 %v384_v46, %v370_v44  ;;  %v348_v50 = vadd.f32 %v951_v51, %v347_v45 }
 0x11b   :  { %v349_v53 = vadd.f32 %v961_v59, %v348_v50  ;;  %v386_v54 = vadd.f32 %v385_v48, %v371_v47 }
 0x11d   :  { %v350_v55 = vadd.f32 %v969_v7, %v349_v53  ;;  %v387_v57 = vadd.f32 %v386_v54, %v372_v52 }
 0x11f   :  { %v388_v60 = vadd.f32 %v387_v57, %v373_v56  ;;  %v351_v61 = vadd.f32 %v976_v15, %v350_v55 }
 0x121   :  { %v389_v0 = vadd.f32 %v388_v60, %v374_v62  ;;  %v352_v1 = vadd.f32 %v983_v26, %v351_v61 }
 0x123   :  { %v390_v2 = vadd.f32 %v389_v0, %v375_v63  ;;  %v353_v3 = vadd.f32 %v990_v33, %v352_v1 }
 0x125   :  { %v354_v6 = vrot.slane %v353_v3, 4  ;;  %v391_v8 = vadd.f32 %v390_v2, %v376_v4 }
 0x127   :  { %v355_v9 = vadd.f32 %v354_v6, %v353_v3  ;;  %v392_v10 = vrot.slane %v391_v8, 4 }
 0x129   :  { %v356_v11 = vrot.slane %v355_v9, 2  ;;  %v393_v12 = vadd.f32 %v392_v10, %v391_v8 }
 0x12b   :  { %v357_v13 = vadd.f32 %v356_v11, %v355_v9  ;;  %v394_v16 = vrot.slane %v393_v12, 2 }
 0x12d   :  { %v358_v17 = vrot.slane %v357_v13, 1  ;;  %v395_v18 = vadd.f32 %v394_v16, %v393_v12 }
 0x12f   :  { %v359_v19 = vadd.f32 %v358_v17, %v357_v13  ;;  %v396_v20 = vrot.slane %v395_v18, 1 }
 0x131   :  { %v360_v21 = vmul.f32 0.0078125, %v359_v19  ;;  %v397_v22 = vadd.f32 %v396_v20, %v395_v18 }
 0x133   :  { %v398_v23 = vmul.f32 0.0078125, %v397_v22  ;;  %v399_v25 = vmul.f32 %v360_v21, %v360_v21 }
 0x135   :  { %v400_v27 = vsub.f32 %v398_v23, %v399_v25 }
 0x137   :  { %v401_v28 = vmax.f32 %v400_v27, 0.0 }
 0x139   :  { %v403_v29 = vadd.f32 1e-05, %v401_v28 }
 0x13b   :  { %816 = vrsqrt.f32 %v403_v29 }
 0x145   :  { %v817_v37 = vpop.eup %816 }
 0x146   :  { %v405_v39 = vmul.f32 %v817_v37, %v402_v34 }
 0x148   :  { %v407_v41 = vmul.f32 %v405_v39, %v360_v21  ;;  %v413_v44 = vrot.slane %v405_v39, %v412_v35 }
 0x14a   :  { %v408_v45 = vsub.f32 %v406_v40, %v407_v41  ;;  %v415_v46 = vmul.f32 %v939_v36, %v413_v44  ;;  %v416_v47 = vmul.f32 %v943_v42, %v413_v44  ;;  %v419_v48 = vmul.f32 %v967_v5, %v413_v44 }
 0x14b   :  { %v420_v50 = vmul.f32 %v974_v14, %v413_v44  ;;  %v421_v52 = vmul.f32 %v981_v24, %v413_v44  ;;  %v422_v53 = vmul.f32 %v988_v32, %v413_v44  ;;  %v423_v54 = vmul.f32 %v941_v38, %v413_v44 }
 0x14c   :  { %v424_v55 = vmul.f32 %v945_v43, %v413_v44  ;;  %v425_v56 = vmul.f32 %v951_v51, %v413_v44  ;;  %v426_v57 = vmul.f32 %v961_v59, %v413_v44  ;;  %v427_v36 = vmul.f32 %v969_v7, %v413_v44 }
 0x14d   :  { %v428_v42 = vmul.f32 %v976_v15, %v413_v44  ;;  %v429_v5 = vmul.f32 %v983_v26, %v413_v44  ;;  %v417_v14 = vmul.f32 %v949_v49, %v413_v44  ;;  %v418_v24 = vmul.f32 %v959_v58, %v413_v44 }
 0x14e   :  { %v430_v32 = vmul.f32 %v990_v33, %v413_v44  ;;  %v435_v60 = vrot.slane %v408_v45, %v412_v35 }
 0x150   :  { %v437_v38 = vadd.f32 %v435_v60, %v415_v46  ;;  %v438_v61 = vadd.f32 %v435_v60, %v416_v47  ;;  %v439_v43 = vadd.f32 %v435_v60, %v417_v14  ;;  %v440_v62 = vadd.f32 %v435_v60, %v418_v24 }
 0x151   :  { %v441_v51 = vadd.f32 %v435_v60, %v419_v48  ;;  %v442_v63 = vadd.f32 %v435_v60, %v420_v50  ;;  %v443_v59 = vadd.f32 %v435_v60, %v421_v52  ;;  %v444_v0 = vadd.f32 %v435_v60, %v422_v53 }
 0x152   :  { %v445_v7 = vadd.f32 %v435_v60, %v423_v54  ;;  %v446_v1 = vadd.f32 %v435_v60, %v424_v55  ;;  %v447_v15 = vadd.f32 %v435_v60, %v425_v56  ;;  %v448_v2 = vadd.f32 %v435_v60, %v426_v57 }
 0x153   :  { %v449_v26 = vadd.f32 %v435_v60, %v427_v36  ;;  %v450_v3 = vadd.f32 %v435_v60, %v428_v42  ;;  %v451_v49 = vadd.f32 %v435_v60, %v429_v5  ;;  %v452_v4 = vadd.f32 %v435_v60, %v430_v32 }
 0x154   :  { %vm453_vm0 = vcmp.ge.f32.partialorder %v437_v38, 0.0  ;;  %vm454_vm1 = vcmp.ge.f32.partialorder %v438_v61, 0.0  ;;  %vm455_vm2 = vcmp.ge.f32.partialorder %v439_v43, 0.0  ;;  %vm456_vm3 = vcmp.ge.f32.partialorder %v440_v62, 0.0 }
 0x155   :  { %vm457_vm4 = vcmp.ge.f32.partialorder %v441_v51, 0.0  ;;  %vm458_vm5 = vcmp.ge.f32.partialorder %v442_v63, 0.0  ;;  %vm459_vm6 = vcmp.ge.f32.partialorder %v443_v59, 0.0  ;;  %vm460_vm7 = vcmp.ge.f32.partialorder %v444_v0, 0.0 }
 0x156   :  { %vm461_vm8 = vcmp.ge.f32.partialorder %v445_v7, 0.0  ;;  %vm462_vm9 = vcmp.ge.f32.partialorder %v446_v1, 0.0  ;;  %vm463_vm10 = vcmp.ge.f32.partialorder %v447_v15, 0.0  ;;  %vm464_vm11 = vcmp.ge.f32.partialorder %v448_v2, 0.0 }
 0x157   :  { %vm465_vm12 = vcmp.ge.f32.partialorder %v449_v26, 0.0  ;;  %vm466_vm13 = vcmp.ge.f32.partialorder %v450_v3, 0.0  ;;  %vm467_vm14 = vcmp.ge.f32.partialorder %v451_v49, 0.0  ;;  %vm468_vm15 = vcmp.ge.f32.partialorder %v452_v4, 0.0 }
 0x158   :  { %v469_v58 = vmul.f32 0.2, %v437_v38  ;;  %v470_v33 = vmul.f32 0.2, %v438_v61  ;;  %v471_v6 = vmul.f32 0.2, %v439_v43 }
 0x159   :  { %v472_v8 = vmul.f32 0.2, %v440_v62  ;;  %v473_v9 = vmul.f32 0.2, %v441_v51  ;;  %v474_v10 = vmul.f32 0.2, %v442_v63 }
 0x15a   :  { %v475_v11 = vmul.f32 0.2, %v443_v59  ;;  %v476_v12 = vmul.f32 0.2, %v444_v0  ;;  %v477_v13 = vmul.f32 0.2, %v445_v7  ;;  %v485_v16 = vsel %vm453_vm0, %v437_v38, %v469_v58 }
 0x15b   :  { %v478_v17 = vmul.f32 0.2, %v446_v1  ;;  %v479_v18 = vmul.f32 0.2, %v447_v15  ;;  %v480_v19 = vmul.f32 0.2, %v448_v2  ;;  %v486_v20 = vsel %vm454_vm1, %v438_v61, %v470_v33 }
 0x15c   :  { %v481_v21 = vmul.f32 0.2, %v449_v26  ;;  %v482_v22 = vmul.f32 0.2, %v450_v3  ;;  %v483_v23 = vmul.f32 0.2, %v451_v49  ;;  %v487_v25 = vsel %vm455_vm2, %v439_v43, %v471_v6 }
 0x15d   :  { %v484_v27 = vmul.f32 0.2, %v452_v4  ;;  %v488_v28 = vsel %vm456_vm3, %v440_v62, %v472_v8  ;;  %v489_v29 = vsel %vm457_vm4, %v441_v51, %v473_v9  ;;  %v490_v30 = vsel %vm458_vm5, %v442_v63, %v474_v10 }
 0x15e   :  { %v491_v31 = vsel %vm459_vm6, %v443_v59, %v475_v11  ;;  %v492_v34 = vsel %vm460_vm7, %v444_v0, %v476_v12  ;;  %v493_v35 = vsel %vm461_vm8, %v445_v7, %v477_v13  ;;  %v494_v37 = vsel %vm462_vm9, %v446_v1, %v478_v17 }
 0x15f   :  { %v495_v39 = vsel %vm463_vm10, %v447_v15, %v479_v18  ;;  %v496_v40 = vsel %vm464_vm11, %v448_v2, %v480_v19  ;;  %v497_v41 = vsel %vm465_vm12, %v449_v26, %v481_v21  ;;  %v498_v44 = vsel %vm466_vm13, %v450_v3, %v482_v22 }
 0x160   :  { %v499_v45 = vsel %vm467_vm14, %v451_v49, %v483_v23  ;;  %v500_v46 = vsel %vm468_vm15, %v452_v4, %v484_v27  ;;  %v652_v47 = vpack.c.bf16 %v486_v20, %v485_v16  ;;  %v657_v48 = vpack.c.bf16 %v488_v28, %v487_v25 }
 0x161   :  { %v662_v50 = vpack.c.bf16 %v490_v30, %v489_v29  ;;  %v667_v52 = vpack.c.bf16 %v492_v34, %v491_v31  ;;  %v672_v53 = vpack.c.bf16 %v494_v37, %v493_v35  ;;  %v677_v54 = vpack.c.bf16 %v496_v40, %v495_v39 }
 0x162   :  { %653 = vst [vmem:[%s1085_s4] sm:$0xff] %v652_v47   ;;  %689 = vst [vmem:[%s1085_s4 + $0x8] sm:$0xff] %v657_v48   ;;  %v682_v55 = vpack.c.bf16 %v498_v44, %v497_v41  ;;  %v687_v56 = vpack.c.bf16 %v500_v46, %v499_v45 }
 0x163   :  { %690 = vst [vmem:[%s1085_s4 + $0x10] sm:$0xff] %v662_v50   ;;  %691 = vst [vmem:[%s1085_s4 + $0x18] sm:$0xff] %v667_v52  }
 0x164   :  { %692 = vst [vmem:[%s1085_s4 + $0x20] sm:$0xff] %v672_v53   ;;  %693 = vst [vmem:[%s1085_s4 + $0x28] sm:$0xff] %v677_v54  }
 0x165   :  { %694 = vst [vmem:[%s1085_s4 + $0x30] sm:$0xff] %v682_v55   ;;  %695 = vst [vmem:[%s1085_s4 + $0x38] sm:$0xff] %v687_v56  }

// kernel: discriminator_forward.7
= control target key start
LH: loop header
LB: loop body
LE: loop exit
PB: predicated region body
PF: predicated region fallthrough
CT: control target
= control target key end

     0   :  { %v752_v40 = vmov 0.0|0.0   ;;  %vm753_vm0 = vmmov 0   ;;  %v754_v41 = vmov 0.0   ;;  %vm501_vm5 = vcmask 261120   ;;  %s936_s1 = inlined_call_operand.vmem [shape: bf16[512,128], index: 1, kind: input, shape index: {}]   ;;  %s937_s0 = inlined_call_operand.vmem [shape: bf16[32,512], index: 0, kind: input, shape index: {}]   ;;  %s938_s2 = inlined_call_operand.vmem [shape: f32[1,128], index: 2, kind: input, shape index: {}]   ;;  %s939_s3 = inlined_call_operand.vmem [shape: f32[1,128], index: 3, kind: input, shape index: {}]   ;;  %s940_s4 = inlined_call_operand.vmem [shape: f32[32,128], index: 4, kind: input, shape index: {}]   ;;  %s941_s5 = inlined_call_operand.vmem [shape: f32[2,32], index: 5, kind: input, shape index: {}]   ;;  %s942_s6 = inlined_call_operand.vmem [shape: f32[2,128], index: 6, kind: output, shape index: {}]  }
   0x1   :  { %v706_v0 = vld [vmem:[%s936_s1 + $0x40] sm:$0xff]   ;;  %v710_v4 = vld [vmem:[%s936_s1 + $0x48] sm:$0xff]   ;;  %v714_v8 = vld [vmem:[%s936_s1 + $0x50] sm:$0xff]   ;;  %vm575_vm6 = vcmask 1041408  }
   0x2   :  { %v707_v1 = vld [vmem:[%s936_s1 + $0xc0] sm:$0xff]   ;;  %625 = vmatprep.subr.bf16.mxu0 %v706_v0  ;;  %v711_v5 = vld [vmem:[%s936_s1 + $0xc8] sm:$0xff]   ;;  %v715_v9 = vld [vmem:[%s936_s1 + $0xd0] sm:$0xff]  }
   0x3   :  { %v708_v2 = vld [vmem:[%s936_s1] sm:$0xff]   ;;  %653 = vmatprep.subr.bf16.mxu1 %v707_v1  ;;  %v712_v6 = vld [vmem:[%s936_s1 + $0x8] sm:$0xff]   ;;  %v716_v10 = vld [vmem:[%s936_s1 + $0x10] sm:$0xff]  }
   0x4   :  { %v709_v3 = vld [vmem:[%s936_s1 + $0x80] sm:$0xff]   ;;  %626 = vmatpush3.bf16.msra.mxu0 %v708_v2  ;;  %v713_v7 = vld [vmem:[%s936_s1 + $0x88] sm:$0xff]   ;;  %v717_v11 = vld [vmem:[%s936_s1 + $0x90] sm:$0xff]  }
   0x5   :  { %654 = vmatpush3.bf16.msra.mxu1 %v709_v3  ;;  %627 = vmatprep.subr.bf16.mxu0 %v710_v4  ;;  %v718_v12 = vld [vmem:[%s936_s1 + $0x58] sm:$0xff]   ;;  %v722_v16 = vld [vmem:[%s936_s1 + $0x60] sm:$0xff]   ;;  %v726_v20 = vld [vmem:[%s936_s1 + $0x68] sm:$0xff]  }
   0x6   :  { %655 = vmatprep.subr.bf16.mxu1 %v711_v5  ;;  %v719_v13 = vld [vmem:[%s936_s1 + $0xd8] sm:$0xff]   ;;  %v723_v17 = vld [vmem:[%s936_s1 + $0xe0] sm:$0xff]   ;;  %v727_v21 = vld [vmem:[%s936_s1 + $0xe8] sm:$0xff]  }
   0x7   :  { %v720_v14 = vld [vmem:[%s936_s1 + $0x18] sm:$0xff]   ;;  %v724_v18 = vld [vmem:[%s936_s1 + $0x20] sm:$0xff]   ;;  %v728_v22 = vld [vmem:[%s936_s1 + $0x28] sm:$0xff]  }
   0x8   :  { %628 = vmatpush3.bf16.msra.mxu0 %v712_v6  ;;  %v721_v15 = vld [vmem:[%s936_s1 + $0x98] sm:$0xff]   ;;  %v725_v19 = vld [vmem:[%s936_s1 + $0xa0] sm:$0xff]   ;;  %v729_v23 = vld [vmem:[%s936_s1 + $0xa8] sm:$0xff]  }
   0x9   :  { %656 = vmatpush3.bf16.msra.mxu1 %v713_v7  ;;  %629 = vmatprep.subr.bf16.mxu0 %v714_v8  ;;  %v730_v24 = vld [vmem:[%s936_s1 + $0x70] sm:$0xff]   ;;  %v734_v28 = vld [vmem:[%s936_s1 + $0x78] sm:$0xff]  }
   0xa   :  { %657 = vmatprep.subr.bf16.mxu1 %v715_v9  ;;  %v731_v25 = vld [vmem:[%s936_s1 + $0xf0] sm:$0xff]   ;;  %v735_v29 = vld [vmem:[%s936_s1 + $0xf8] sm:$0xff]  }
   0xb   :  { %v732_v26 = vld [vmem:[%s936_s1 + $0x30] sm:$0xff]   ;;  %v736_v30 = vld [vmem:[%s936_s1 + $0x38] sm:$0xff]  }
   0xc   :  { %630 = vmatpush3.bf16.msra.mxu0 %v716_v10  ;;  %v733_v27 = vld [vmem:[%s936_s1 + $0xb0] sm:$0xff]   ;;  %v737_v31 = vld [vmem:[%s936_s1 + $0xb8] sm:$0xff]  }
   0xd   :  { %658 = vmatpush3.bf16.msra.mxu1 %v717_v11  ;;  %631 = vmatprep.subr.bf16.mxu0 %v718_v12  ;;  %v738_v32 = vld [vmem:[%s937_s0] ss:$16 sps:$4 sm:$0xff]   ;;  %v740_v33 = vld [vmem:[%s937_s0 + $0x4] ss:$16 sps:$4 sm:$0xff]   ;;  %v741_v34 = vld [vmem:[%s937_s0 + $0x8] ss:$16 sps:$4 sm:$0xff]  }
   0xe   :  { %659 = vmatprep.subr.bf16.mxu1 %v719_v13  ;;  %v743_v35 = vld [vmem:[%s937_s0 + $0xc] ss:$16 sps:$4 sm:$0xff]   ;;  %360 = vmatprep.mubr.bf16.mxu0 %v740_v33  ;;  %v744_v36 = vld [vmem:[%s937_s0 + $0x24] ss:$16 sps:$4 sm:$0xff]   ;;  %v748_v38 = vld [vmem:[%s937_s0 + $0x20] ss:$16 sps:$4 sm:$0xff]  }
   0xf   :  { %409 = vmatprep.mubr.bf16.mxu1 %v743_v35  ;;  %v746_v37 = vld [vmem:[%s937_s0 + $0x2c] ss:$16 sps:$4 sm:$0xff]   ;;  %v749_v39 = vld [vmem:[%s937_s0 + $0x28] ss:$16 sps:$4 sm:$0xff]  }
  0x10   :  { %632 = vmatpush3.bf16.msra.mxu0 %v720_v14 }
  0x11   :  { %660 = vmatpush3.bf16.msra.mxu1 %v721_v15  ;;  %633 = vmatprep.subr.bf16.mxu0 %v722_v16 }
  0x12   :  { %661 = vmatprep.subr.bf16.mxu1 %v723_v17 }
  0x14   :  { %634 = vmatpush3.bf16.msra.mxu0 %v724_v18 }
  0x15   :  { %662 = vmatpush3.bf16.msra.mxu1 %v725_v19  ;;  %635 = vmatprep.subr.bf16.mxu0 %v726_v20 }
  0x16   :  { %663 = vmatprep.subr.bf16.mxu1 %v727_v21 }
  0x18   :  { %636 = vmatpush3.bf16.msra.mxu0 %v728_v22 }
  0x19   :  { %664 = vmatpush3.bf16.msra.mxu1 %v729_v23  ;;  %637 = vmatprep.subr.bf16.mxu0 %v730_v24 }
  0x1a   :  { %665 = vmatprep.subr.bf16.mxu1 %v731_v25 }
  0x1c   :  { %638 = vmatpush3.bf16.msra.mxu0 %v732_v26 }
  0x1d   :  { %666 = vmatpush3.bf16.msra.mxu1 %v733_v27  ;;  %639 = vmatprep.subr.bf16.mxu0 %v734_v28 }
  0x1e   :  { %667 = vmatprep.subr.bf16.mxu1 %v735_v29 }
  0x20   :  { %640 = vmatpush3.bf16.msra.mxu0 %v736_v30 }
  0x21   :  { %668 = vmatpush3.bf16.msra.mxu1 %v737_v31  ;;  %697 = vmatprep.subr.bf16.mxu0 %v752_v40 }
  0x23   :  { %361 = vmatmul.mubr.bf16.vlgmr.msra.gmra.mrb[0].mxu0 %v738_v32 }
  0x24   :  { %410 = vmatmul.mubr.bf16.vlgmr.msra.gmra.mrb[0].mxu1 %v741_v34  ;;  %368 = vmatprep.mubr.bf16.mxu0 %v744_v36  ;;  %v461_v34 = vlaneseq  ;;  %v453_v36 = vld [vmem:[%s938_s2] sm:$0x1] }
  0x25   :  { %417 = vmatprep.mubr.bf16.mxu1 %v746_v37 }
  0x26   :  { %v462_v35 = vshrl.u32 %v461_v34, 7 }
  0x28   :  { %v463_v37 = vsub.s32 0, %v462_v35 }
  0x2b   :  { %369 = vmatmul.mubr.bf16.gmra.mrb[4].mxu0 %v748_v38 }
  0x2c   :  { %418 = vmatmul.mubr.bf16.gmra.mrb[4].mxu1 %v749_v39  ;;  %694 = vmatprep.mubr.msk.f32.mxu0 %vm753_vm0, %v754_v41  ;;  %v457_v41 = vld [vmem:[%s939_s3] sm:$0x1] }
  0xf6   :  { %v641_v42 = vpop.f32.mrb[0].mxu0 }
  0xf7   :  { %v669_v43 = vpop.f32.mrb[0].mxu1  ;;  %v642_v44 = vpop.f32.mrb[1].mxu0 }
  0xf8   :  { %v643_v45 = vadd.f32 %v642_v44, %v641_v42  ;;  %v670_v46 = vpop.f32.mrb[1].mxu1  ;;  %v644_v47 = vpop.f32.mrb[2].mxu0 }
  0xf9   :  { %v671_v48 = vadd.f32 %v670_v46, %v669_v43  ;;  %v672_v49 = vpop.f32.mrb[2].mxu1  ;;  %v645_v50 = vpop.f32.mrb[3].mxu0 }
  0xfa   :  { %v646_v51 = vadd.f32 %v645_v50, %v644_v47  ;;  %v673_v52 = vpop.f32.mrb[3].mxu1 }
  0xfb   :  { %v412_v53 = vadd.f32 %v671_v48, %v643_v45  ;;  %v674_v54 = vadd.f32 %v673_v52, %v672_v49 }
  0xfd   :  { %v415_v55 = vadd.f32 %v674_v54, %v646_v51  ;;  %v436_v57 = vmul.f32 %v412_v53, %v412_v53  ;;  %v493_v54 = vld [vmem:[%s940_s4] sm:$0xff] }
  0xfe   :  { %v647_v56 = vpop.f32.mrb[4].mxu0 }
  0xff   :  { %v426_v58 = vadd.f32 %v415_v55, %v412_v53  ;;  %v437_v59 = vmul.f32 %v415_v55, %v415_v55  ;;  %v675_v60 = vpop.f32.mrb[4].mxu1  ;;  %v648_v61 = vpop.f32.mrb[5].mxu0 }
 0x100   :  { %v649_v62 = vadd.f32 %v648_v61, %v647_v56  ;;  %v676_v63 = vpop.f32.mrb[5].mxu1  ;;  %v650_v0 = vpop.f32.mrb[6].mxu0 }
 0x101   :  { %v440_v1 = vadd.f32 %v437_v59, %v436_v57  ;;  %v677_v2 = vadd.f32 %v676_v63, %v675_v60  ;;  %v678_v3 = vpop.f32.mrb[6].mxu1  ;;  %v651_v4 = vpop.f32.mrb[7].mxu0  ;;  %v494_v57 = vld [vmem:[%s940_s4 + $0x8] sm:$0xff] }
 0x102   :  { %v652_v5 = vadd.f32 %v651_v4, %v650_v0  ;;  %v679_v6 = vpop.f32.mrb[7].mxu1 }
 0x103   :  { %v420_v7 = vadd.f32 %v677_v2, %v649_v62  ;;  %v680_v8 = vadd.f32 %v679_v6, %v678_v3 }
 0x105   :  { %v427_v9 = vadd.f32 %v426_v58, %v420_v7  ;;  %v438_v10 = vmul.f32 %v420_v7, %v420_v7  ;;  %v423_v11 = vadd.f32 %v680_v8, %v652_v5  ;;  %v495_v58 = vld [vmem:[%s940_s4 + $0x10] sm:$0xff]  ;;  %v492_v8 = vld [vmem:[%s941_s5] sm:$0x3] }
 0x107   :  { %v441_v12 = vadd.f32 %v440_v1, %v438_v10  ;;  %v428_v13 = vadd.f32 %v427_v9, %v423_v11  ;;  %v439_v14 = vmul.f32 %v423_v11, %v423_v11 }
 0x109   :  { %v429_v15 = vrot.slane %v428_v13, 4  ;;  %v442_v16 = vadd.f32 %v441_v12, %v439_v14 }
 0x10b   :  { %v430_v17 = vadd.f32 %v429_v15, %v428_v13  ;;  %v443_v18 = vrot.slane %v442_v16, 4 }
 0x10d   :  { %v431_v19 = vrot.slane %v430_v17, 2  ;;  %v444_v20 = vadd.f32 %v443_v18, %v442_v16 }
 0x10f   :  { %v432_v21 = vadd.f32 %v431_v19, %v430_v17  ;;  %v445_v22 = vrot.slane %v444_v20, 2 }
 0x111   :  { %v433_v23 = vrot.slane %v432_v21, 1  ;;  %v446_v24 = vadd.f32 %v445_v22, %v444_v20 }
 0x113   :  { %v434_v25 = vadd.f32 %v433_v23, %v432_v21  ;;  %v447_v26 = vrot.slane %v446_v24, 1 }
 0x115   :  { %v435_v27 = vmul.f32 0.03125, %v434_v25  ;;  %v448_v28 = vadd.f32 %v447_v26, %v446_v24 }
 0x117   :  { %v449_v29 = vmul.f32 0.03125, %v448_v28  ;;  %v450_v30 = vmul.f32 %v435_v27, %v435_v27 }
 0x119   :  { %v451_v31 = vsub.f32 %v449_v29, %v450_v30 }
 0x11b   :  { %v452_v32 = vmax.f32 %v451_v31, 0.0 }
 0x11d   :  { %v454_v33 = vadd.f32 1e-05, %v452_v32 }
 0x11f   :  { %750 = vrsqrt.f32 %v454_v33 }
 0x129   :  { %v751_v38 = vpop.eup %750 }
 0x12a   :  { %v456_v39 = vmul.f32 %v751_v38, %v453_v36 }
 0x12c   :  { %v458_v42 = vmul.f32 %v456_v39, %v435_v27  ;;  %v464_v43 = vrot.slane %v456_v39, %v463_v37 }
 0x12e   :  { %v459_v44 = vsub.f32 %v457_v41, %v458_v42  ;;  %v469_v45 = vmul.f32 %v464_v43, %v423_v11  ;;  %v466_v46 = vmul.f32 %v464_v43, %v412_v53  ;;  %v467_v47 = vmul.f32 %v464_v43, %v415_v55  ;;  %v496_v53 = vld [vmem:[%s940_s4 + $0x18] sm:$0xff] }
 0x12f   :  { %v468_v48 = vmul.f32 %v464_v43, %v420_v7 }
 0x130   :  { %v474_v49 = vrot.slane %v459_v44, %v463_v37 }
 0x132   :  { %v479_v50 = vadd.f32 %v474_v49, %v469_v45  ;;  %v476_v51 = vadd.f32 %v474_v49, %v466_v46  ;;  %v477_v52 = vadd.f32 %v474_v49, %v467_v47  ;;  %v478_v56 = vadd.f32 %v474_v49, %v468_v48 }
 0x134   :  { %v487_v55 = vmul.f32 0.2, %v479_v50  ;;  %vm480_vm1 = vcmp.ge.f32.partialorder %v476_v51, 0.0  ;;  %vm481_vm2 = vcmp.ge.f32.partialorder %v477_v52, 0.0  ;;  %v484_v59 = vmul.f32 0.2, %v476_v51 }
 0x135   :  { %v485_v60 = vmul.f32 0.2, %v477_v52  ;;  %vm482_vm3 = vcmp.ge.f32.partialorder %v478_v56, 0.0  ;;  %vm483_vm4 = vcmp.ge.f32.partialorder %v479_v50, 0.0  ;;  %v486_v61 = vmul.f32 0.2, %v478_v56 }
 0x136   :  { %v488_v62 = vsel %vm480_vm1, %v476_v51, %v484_v59  ;;  %v491_v63 = vsel %vm483_vm4, %v479_v50, %v487_v55 }
 0x137   :  { %v489_v0 = vsel %vm481_vm2, %v477_v52, %v485_v60  ;;  %v497_v1 = vmul.f32 %v493_v54, %v488_v62  ;;  %v490_v2 = vsel %vm482_vm3, %v478_v56, %v486_v61  ;;  %v500_v3 = vmul.f32 %v496_v53, %v491_v63 }
 0x138   :  { %v498_v4 = vmul.f32 %v494_v57, %v489_v0  ;;  %v499_v5 = vmul.f32 %v495_v58, %v490_v2 }
 0x13a   :  { %v698_v6 = vpack.c.bf16 %v498_v4, %v497_v1  ;;  %v701_v7 = vpack.c.bf16 %v500_v3, %v499_v5 }
 0x13c   :  { %699 = vmatpush3.bf16.msra.mxu0 %v698_v6 }
 0x13d   :  { %700 = vmatprep.subr.bf16.mxu0 %v752_v40 }
 0x140   :  { %702 = vmatpush3.bf16.msra.mxu0 %v701_v7 }
 0x143   :  { %695 = vmatmul.mubr.msk.f32.vlgmr.msra.gmra.mrb[8].mxu0 %vm501_vm5, %v492_v8 }
 0x216   :  { %v571_v9 = vpop.f32.mrb[8].mxu0 }
 0x217   :  { %v696_v10 = vpop.f32.mrb[9].mxu0  ;;  %v576_v11 = vsel %vm575_vm6, %v571_v9, 0.0 }
 0x218   :  { %577 = vadd.xlane.f32.xlu0 %v576_v11 }
 0x2a5   :  { %v578_v12 = vpop.xlane.xlu0 %577 }
 0x2a6   :  { %579 = vst [vmem:[%s942_s6] sm:$0x3] %v578_v12 }

</bundles_post_ra>
